<compile_context>
chip_gen: v7x
topology: tpu7x:2x2x1
jax: 0.10.0
libtpu: 0.0.40
codegen_flags: <defaults>
</compile_context>

<pallas_src>
import functools

import jax
import jax.numpy as jnp
import numpy as np
from jax.experimental import pallas as pl
from jax.experimental.pallas import tpu as pltpu

EPS = 1e-5
VMEM_LIMIT = 32 * 1024 * 1024  # conservative; valid on v5e/v6e (128 MiB) and v7x (64 MiB physical)


# ----------------------------- fused Pallas kernel -----------------------------

def _spade_fused_kernel(segpad_ref, w_sh_ref, b_sh_ref, w_gb_ref, b_gb_ref, x_ref,
                        o_ref, actv_ref, *, H, W, C, NH):
    """One batch element: shared conv+ReLU -> in-VMEM reflect pad -> gamma/beta conv ->
    instance norm -> SPADE affine.

    segpad_ref: (1, H+2, W+2, Cs) bf16  reflect-padded resized segmap (channels zero-padded to Cs)
    w_sh_ref  : (9, Cs, NH)       bf16  shared conv taps, k = ky*3 + kx
    b_sh_ref  : (1, NH)           f32
    w_gb_ref  : (9, NH, 2*C)      bf16  gamma|beta conv taps
    b_gb_ref  : (1, 2*C)          f32
    x_ref     : (1, C, H*W)       bf16  features to normalize, channel-major
    o_ref     : (1, C, H*W)       f32   normalized * (1 + gamma) + beta, channel-major
    actv_ref  : (H+2, W+2, NH)    bf16  VMEM scratch: reflect-padded shared-conv activations
    """
    HW = H * W
    Cs = segpad_ref.shape[-1]

    # ---- mlp_shared: ReflectionPad(1) + Conv3x3(label_nc -> NH) + ReLU ----
    acc = jnp.zeros((HW, NH), jnp.float32)
    for dx in range(3):
        slab = segpad_ref[0, :, dx:dx + W, :]               # one sublane-shift per dx (3, not 9)
        for dy in range(3):
            win = slab[dy:dy + H].reshape(HW, Cs)
            acc = acc + jnp.dot(win, w_sh_ref[dy * 3 + dx],
                                preferred_element_type=jnp.float32)
    actv = jnp.maximum(acc + b_sh_ref[...], 0.0).astype(jnp.bfloat16).reshape(H, W, NH)

    # ---- in-VMEM ReflectionPad2d(1) of actv (no HBM round trip) ----
    actv_ref[1:H + 1, 1:W + 1, :] = actv
    actv_ref[0:1, 1:W + 1, :] = actv[1:2]                    # top row    <- orig row 1
    actv_ref[H + 1:H + 2, 1:W + 1, :] = actv[H - 2:H - 1]    # bottom row <- orig row H-2
    actv_ref[:, 0:1, :] = actv_ref[:, 2:3, :]                # left col (corners included)
    actv_ref[:, W + 1:W + 2, :] = actv_ref[:, W - 1:W, :]    # right col

    # ---- mlp_gamma | mlp_beta: ReflectionPad(1) + Conv3x3(NH -> 2C) ----
    acc2 = jnp.zeros((HW, 2 * C), jnp.float32)
    for dx in range(3):
        slab = actv_ref[:, dx:dx + W, :]                     # (H+2, W, NH)
        for dy in range(3):
            win = slab[dy:dy + H].reshape(HW, NH)
            acc2 = acc2 + jnp.dot(win, w_gb_ref[dy * 3 + dx],
                                  preferred_element_type=jnp.float32)
    gb = (acc2 + b_gb_ref[...]).T                            # tiny (H*W,2C)->(2C,H*W) VMEM relayout
    gamma = gb[:C]                                           # (C, H*W)
    beta = gb[C:]                                            # (C, H*W)

    # ---- InstanceNorm2d (affine=False, biased var) in lane-dense (C, H*W) layout ----
    x = x_ref[0].astype(jnp.float32)                         # (C, H*W)
    mean = jnp.mean(x, axis=1, keepdims=True)                # lane reduction (H*W on lanes)
    var = jnp.mean(jnp.square(x - mean), axis=1, keepdims=True)
    normalized = (x - mean) * jax.lax.rsqrt(var + EPS)

    o_ref[0] = (normalized * (1.0 + gamma) + beta).astype(o_ref.dtype)


def spade_fused(seg_pad, w_sh, b_sh, w_gb, b_gb, x_cm, *, H, W):
    N, Hp, Wp, Cs = seg_pad.shape
    NH = w_sh.shape[-1]
    C = x_cm.shape[1]
    HW = H * W
    return pl.pallas_call(
        functools.partial(_spade_fused_kernel, H=H, W=W, C=C, NH=NH),
        out_shape=jax.ShapeDtypeStruct((N, C, HW), jnp.float32),
        grid=(N,),
        in_specs=[
            pl.BlockSpec((1, Hp, Wp, Cs), lambda n: (n, 0, 0, 0)),
            pl.BlockSpec((9, Cs, NH), lambda n: (0, 0, 0)),
            pl.BlockSpec((1, NH), lambda n: (0, 0)),
            pl.BlockSpec((9, NH, 2 * C), lambda n: (0, 0, 0)),
            pl.BlockSpec((1, 2 * C), lambda n: (0, 0)),
            pl.BlockSpec((1, C, HW), lambda n: (n, 0, 0)),
        ],
        out_specs=pl.BlockSpec((1, C, HW), lambda n: (n, 0, 0)),
        scratch_shapes=[pltpu.VMEM((H + 2, W + 2, NH), jnp.bfloat16)],
        compiler_params=pltpu.CompilerParams(
            dimension_semantics=("parallel",),
            vmem_limit_bytes=VMEM_LIMIT),
    )(seg_pad, w_sh, b_sh, w_gb, b_gb, x_cm)


# ----------------------------- JAX glue -----------------------------

def _prep_conv_weight(w_oihw, cin_pad=None):
    """(Cout, Cin, 3, 3) -> (9, Cin[_pad], Cout) bf16, tap order k = ky*3 + kx."""
    cout, cin = w_oihw.shape[0], w_oihw.shape[1]
    w = jnp.transpose(w_oihw, (2, 3, 1, 0)).reshape(9, cin, cout)
    if cin_pad is not None and cin_pad > cin:
        w = jnp.pad(w, ((0, 0), (0, cin_pad - cin), (0, 0)))
    return w.astype(jnp.bfloat16)


@jax.jit
def spade_forward(x_nchw, segmap_nchw, params):
    N, C, H, W = x_nchw.shape
    label_nc = segmap_nchw.shape[1]

    # F.interpolate(..., mode='bilinear', align_corners=False); antialias off for PyTorch parity.
    seg = jax.image.resize(segmap_nchw, (N, label_nc, H, W),
                           method="bilinear", antialias=False)
    seg_nhwc = jnp.transpose(seg, (0, 2, 3, 1))              # tiny (label_nc channels)

    # pad label channels only to the bf16 packing minimum (16), NOT 128: K<128 is one MXU pass.
    cs = max(16, ((label_nc + 15) // 16) * 16)
    if cs > label_nc:
        seg_nhwc = jnp.pad(seg_nhwc, ((0, 0), (0, 0), (0, 0), (0, cs - label_nc)))
    seg_pad = jnp.pad(seg_nhwc, ((0, 0), (1, 1), (1, 1), (0, 0)),
                      mode="reflect").astype(jnp.bfloat16)

    w_sh = _prep_conv_weight(params["w_shared"], cin_pad=cs)               # (9, cs, 128)
    b_sh = params["b_shared"].reshape(1, -1).astype(jnp.float32)
    w_gb = _prep_conv_weight(
        jnp.concatenate([params["w_gamma"], params["w_beta"]], axis=0))    # (9, 128, 2C)
    b_gb = jnp.concatenate([params["b_gamma"], params["b_beta"]]
                           ).reshape(1, -1).astype(jnp.float32)

    # channel-major, lane-dense x: pure reshape of NCHW (no transpose), bf16 HBM stream.
    x_cm = x_nchw.reshape(N, C, H * W).astype(jnp.bfloat16)

    out_cm = spade_fused(seg_pad, w_sh, b_sh, w_gb, b_gb, x_cm, H=H, W=W)  # (N, C, H*W) f32
    return out_cm.reshape(N, C, H, W)                                      # pure reshape


# ----------------------------- pure-JAX reference (sanity check only) -----------------------------

def spade_reference(x, segmap, params):
    N, C, H, W = x.shape
    mean = jnp.mean(x, axis=(2, 3), keepdims=True)
    var = jnp.mean(jnp.square(x - mean), axis=(2, 3), keepdims=True)
    normalized = (x - mean) / jnp.sqrt(var + EPS)
    seg = jax.image.resize(segmap, (N, segmap.shape[1], H, W),
                           method="bilinear", antialias=False)

    def conv(z, w, b):
        zp = jnp.pad(z, ((0, 0), (0, 0), (1, 1), (1, 1)), mode="reflect")
        y = jax.lax.conv_general_dilated(
            zp, w, (1, 1), "VALID",
            dimension_numbers=("NCHW", "OIHW", "NCHW"),
            precision=jax.lax.Precision.HIGHEST)
        return y + b.reshape(1, -1, 1, 1)

    actv = jax.nn.relu(conv(seg, params["w_shared"], params["b_shared"]))
    gamma = conv(actv, params["w_gamma"], params["b_gamma"])
    beta = conv(actv, params["w_beta"], params["b_beta"])
    return normalized * (1.0 + gamma) + beta


# ----------------------------- main -----------------------------

if __name__ == "__main__":
    # SPADE('spadeinstance3x3', norm_nc=4, label_nc=3), nhidden=128, ks=3, pw=1
    N, norm_nc, label_nc, H, W = 2, 4, 3, 16, 16
    nhidden = 128
    seg_h, seg_w = 8, 8

    key = jax.random.PRNGKey(0)
    kx, ks, k1, k2, k3, k4, k5, k6 = jax.random.split(key, 8)

    x = jax.random.normal(kx, (N, norm_nc, H, W), dtype=jnp.float32)
    segmap = jax.random.normal(ks, (N, label_nc, seg_h, seg_w), dtype=jnp.float32)

    params = {
        "w_shared": 0.05 * jax.random.normal(k1, (nhidden, label_nc, 3, 3), jnp.float32),
        "b_shared": 0.05 * jax.random.normal(k2, (nhidden,), jnp.float32),
        "w_gamma": 0.05 * jax.random.normal(k3, (norm_nc, nhidden, 3, 3), jnp.float32),
        "b_gamma": 0.05 * jax.random.normal(k4, (norm_nc,), jnp.float32),
        "w_beta": 0.05 * jax.random.normal(k5, (norm_nc, nhidden, 3, 3), jnp.float32),
        "b_beta": 0.05 * jax.random.normal(k6, (norm_nc,), jnp.float32),
    }

    out = jax.block_until_ready(spade_forward(x, segmap, params))
    ref = jax.block_until_ready(spade_reference(x, segmap, params))

    # tolerance covers bf16 x / bf16 MXU operands (f32 accumulation) vs the f32 HIGHEST reference
    if not np.allclose(np.asarray(out), np.asarray(ref), rtol=2e-2, atol=2e-2):
        raise AssertionError("Pallas SPADE output mismatch vs reference")

    print("KERNEL_OK")
</pallas_src>

<mosaic_0001>
module attributes {stable_mosaic.version = 11 : i64} {
  func.func @_spade_fused_kernel(%arg0: i32, %arg1: memref<1x18x18x16xbf16, #tpu.memory_space<vmem>>, %arg2: memref<9x16x128xbf16, #tpu.memory_space<vmem>>, %arg3: memref<1x128xf32, #tpu.memory_space<vmem>>, %arg4: memref<9x128x8xbf16, #tpu.memory_space<vmem>>, %arg5: memref<1x8xf32, #tpu.memory_space<vmem>>, %arg6: memref<1x4x256xbf16, #tpu.memory_space<vmem>>, %arg7: memref<1x4x256xf32, #tpu.memory_space<vmem>>, %arg8: memref<18x18x128xbf16, #tpu.memory_space<vmem>>) attributes {dimension_semantics = [#tpu.dimension_semantics<parallel>], iteration_bounds = array<i64: 2>, scalar_prefetch = 0 : i64, scratch_operands = 1 : i64, tpu.core_type = #tpu.core_type<tc>, window_params = [{transform_indices = @transform_0, window_bounds = array<i64: 1, 18, 18, 16>}, {pipeline_mode = #tpu.pipeline_mode<synchronous>, transform_indices = @transform_1, window_bounds = array<i64: 9, 16, 128>}, {pipeline_mode = #tpu.pipeline_mode<synchronous>, transform_indices = @transform_2, window_bounds = array<i64: 1, 128>}, {pipeline_mode = #tpu.pipeline_mode<synchronous>, transform_indices = @transform_3, window_bounds = array<i64: 9, 128, 8>}, {pipeline_mode = #tpu.pipeline_mode<synchronous>, transform_indices = @transform_4, window_bounds = array<i64: 1, 8>}, {transform_indices = @transform_5, window_bounds = array<i64: 1, 4, 256>}, {transform_indices = @transform_6, window_bounds = array<i64: 1, 4, 256>}]} {
    %cst = arith.constant 0.000000e+00 : f32
    %0 = vector.broadcast %cst : f32 to vector<256x128xf32>
    %c0 = arith.constant 0 : index
    %c0_0 = arith.constant 0 : index
    %c0_1 = arith.constant 0 : index
    %c0_2 = arith.constant 0 : index
    %1 = vector.load %arg1[%c0, %c0_0, %c0_1, %c0_2] : memref<1x18x18x16xbf16, #tpu.memory_space<vmem>>, vector<1x18x16x16xbf16>
    %2 = vector.shape_cast %1 : vector<1x18x16x16xbf16> to vector<18x16x16xbf16>
    %3 = vector.extract_strided_slice %2 {offsets = [0, 0, 0], sizes = [16, 16, 16], strides = [1, 1, 1]} : vector<18x16x16xbf16> to vector<16x16x16xbf16>
    %4 = vector.shape_cast %3 : vector<16x16x16xbf16> to vector<256x16xbf16>
    %c0_3 = arith.constant 0 : index
    %c0_4 = arith.constant 0 : index
    %c0_5 = arith.constant 0 : index
    %5 = vector.load %arg2[%c0_3, %c0_4, %c0_5] : memref<9x16x128xbf16, #tpu.memory_space<vmem>>, vector<1x16x128xbf16>
    %6 = vector.shape_cast %5 : vector<1x16x128xbf16> to vector<16x128xbf16>
    %cst_6 = arith.constant dense<0.000000e+00> : vector<256x128xf32>
    %7 = tpu.matmul %4, %6, %cst_6 {dimension_numbers = #tpu.dot_dimension_numbers<[1], [0], [0], [1], [0, 0, 1, 1], [], []>} : vector<256x16xbf16>, vector<16x128xbf16>, vector<256x128xf32> -> vector<256x128xf32>
    %8 = arith.addf %0, %7 : vector<256x128xf32>
    %9 = vector.extract_strided_slice %2 {offsets = [1, 0, 0], sizes = [16, 16, 16], strides = [1, 1, 1]} : vector<18x16x16xbf16> to vector<16x16x16xbf16>
    %10 = vector.shape_cast %9 : vector<16x16x16xbf16> to vector<256x16xbf16>
    %c3 = arith.constant 3 : index
    %c0_7 = arith.constant 0 : index
    %c0_8 = arith.constant 0 : index
    %11 = vector.load %arg2[%c3, %c0_7, %c0_8] : memref<9x16x128xbf16, #tpu.memory_space<vmem>>, vector<1x16x128xbf16>
    %12 = vector.shape_cast %11 : vector<1x16x128xbf16> to vector<16x128xbf16>
    %cst_9 = arith.constant dense<0.000000e+00> : vector<256x128xf32>
    %13 = tpu.matmul %10, %12, %cst_9 {dimension_numbers = #tpu.dot_dimension_numbers<[1], [0], [0], [1], [0, 0, 1, 1], [], []>} : vector<256x16xbf16>, vector<16x128xbf16>, vector<256x128xf32> -> vector<256x128xf32>
    %14 = arith.addf %8, %13 : vector<256x128xf32>
    %15 = vector.extract_strided_slice %2 {offsets = [2, 0, 0], sizes = [16, 16, 16], strides = [1, 1, 1]} : vector<18x16x16xbf16> to vector<16x16x16xbf16>
    %16 = vector.shape_cast %15 : vector<16x16x16xbf16> to vector<256x16xbf16>
    %c6 = arith.constant 6 : index
    %c0_10 = arith.constant 0 : index
    %c0_11 = arith.constant 0 : index
    %17 = vector.load %arg2[%c6, %c0_10, %c0_11] : memref<9x16x128xbf16, #tpu.memory_space<vmem>>, vector<1x16x128xbf16>
    %18 = vector.shape_cast %17 : vector<1x16x128xbf16> to vector<16x128xbf16>
    %cst_12 = arith.constant dense<0.000000e+00> : vector<256x128xf32>
    %19 = tpu.matmul %16, %18, %cst_12 {dimension_numbers = #tpu.dot_dimension_numbers<[1], [0], [0], [1], [0, 0, 1, 1], [], []>} : vector<256x16xbf16>, vector<16x128xbf16>, vector<256x128xf32> -> vector<256x128xf32>
    %20 = arith.addf %14, %19 : vector<256x128xf32>
    %c0_13 = arith.constant 0 : index
    %c0_14 = arith.constant 0 : index
    %c1 = arith.constant 1 : index
    %c0_15 = arith.constant 0 : index
    %21 = vector.load %arg1[%c0_13, %c0_14, %c1, %c0_15] : memref<1x18x18x16xbf16, #tpu.memory_space<vmem>>, vector<1x18x16x16xbf16>
    %22 = vector.shape_cast %21 : vector<1x18x16x16xbf16> to vector<18x16x16xbf16>
    %23 = vector.extract_strided_slice %22 {offsets = [0, 0, 0], sizes = [16, 16, 16], strides = [1, 1, 1]} : vector<18x16x16xbf16> to vector<16x16x16xbf16>
    %24 = vector.shape_cast %23 : vector<16x16x16xbf16> to vector<256x16xbf16>
    %c1_16 = arith.constant 1 : index
    %c0_17 = arith.constant 0 : index
    %c0_18 = arith.constant 0 : index
    %25 = vector.load %arg2[%c1_16, %c0_17, %c0_18] : memref<9x16x128xbf16, #tpu.memory_space<vmem>>, vector<1x16x128xbf16>
    %26 = vector.shape_cast %25 : vector<1x16x128xbf16> to vector<16x128xbf16>
    %cst_19 = arith.constant dense<0.000000e+00> : vector<256x128xf32>
    %27 = tpu.matmul %24, %26, %cst_19 {dimension_numbers = #tpu.dot_dimension_numbers<[1], [0], [0], [1], [0, 0, 1, 1], [], []>} : vector<256x16xbf16>, vector<16x128xbf16>, vector<256x128xf32> -> vector<256x128xf32>
    %28 = arith.addf %20, %27 : vector<256x128xf32>
    %29 = vector.extract_strided_slice %22 {offsets = [1, 0, 0], sizes = [16, 16, 16], strides = [1, 1, 1]} : vector<18x16x16xbf16> to vector<16x16x16xbf16>
    %30 = vector.shape_cast %29 : vector<16x16x16xbf16> to vector<256x16xbf16>
    %c4 = arith.constant 4 : index
    %c0_20 = arith.constant 0 : index
    %c0_21 = arith.constant 0 : index
    %31 = vector.load %arg2[%c4, %c0_20, %c0_21] : memref<9x16x128xbf16, #tpu.memory_space<vmem>>, vector<1x16x128xbf16>
    %32 = vector.shape_cast %31 : vector<1x16x128xbf16> to vector<16x128xbf16>
    %cst_22 = arith.constant dense<0.000000e+00> : vector<256x128xf32>
    %33 = tpu.matmul %30, %32, %cst_22 {dimension_numbers = #tpu.dot_dimension_numbers<[1], [0], [0], [1], [0, 0, 1, 1], [], []>} : vector<256x16xbf16>, vector<16x128xbf16>, vector<256x128xf32> -> vector<256x128xf32>
    %34 = arith.addf %28, %33 : vector<256x128xf32>
    %35 = vector.extract_strided_slice %22 {offsets = [2, 0, 0], sizes = [16, 16, 16], strides = [1, 1, 1]} : vector<18x16x16xbf16> to vector<16x16x16xbf16>
    %36 = vector.shape_cast %35 : vector<16x16x16xbf16> to vector<256x16xbf16>
    %c7 = arith.constant 7 : index
    %c0_23 = arith.constant 0 : index
    %c0_24 = arith.constant 0 : index
    %37 = vector.load %arg2[%c7, %c0_23, %c0_24] : memref<9x16x128xbf16, #tpu.memory_space<vmem>>, vector<1x16x128xbf16>
    %38 = vector.shape_cast %37 : vector<1x16x128xbf16> to vector<16x128xbf16>
    %cst_25 = arith.constant dense<0.000000e+00> : vector<256x128xf32>
    %39 = tpu.matmul %36, %38, %cst_25 {dimension_numbers = #tpu.dot_dimension_numbers<[1], [0], [0], [1], [0, 0, 1, 1], [], []>} : vector<256x16xbf16>, vector<16x128xbf16>, vector<256x128xf32> -> vector<256x128xf32>
    %40 = arith.addf %34, %39 : vector<256x128xf32>
    %c0_26 = arith.constant 0 : index
    %c0_27 = arith.constant 0 : index
    %c2 = arith.constant 2 : index
    %c0_28 = arith.constant 0 : index
    %41 = vector.load %arg1[%c0_26, %c0_27, %c2, %c0_28] : memref<1x18x18x16xbf16, #tpu.memory_space<vmem>>, vector<1x18x16x16xbf16>
    %42 = vector.shape_cast %41 : vector<1x18x16x16xbf16> to vector<18x16x16xbf16>
    %43 = vector.extract_strided_slice %42 {offsets = [0, 0, 0], sizes = [16, 16, 16], strides = [1, 1, 1]} : vector<18x16x16xbf16> to vector<16x16x16xbf16>
    %44 = vector.shape_cast %43 : vector<16x16x16xbf16> to vector<256x16xbf16>
    %c2_29 = arith.constant 2 : index
    %c0_30 = arith.constant 0 : index
    %c0_31 = arith.constant 0 : index
    %45 = vector.load %arg2[%c2_29, %c0_30, %c0_31] : memref<9x16x128xbf16, #tpu.memory_space<vmem>>, vector<1x16x128xbf16>
    %46 = vector.shape_cast %45 : vector<1x16x128xbf16> to vector<16x128xbf16>
    %cst_32 = arith.constant dense<0.000000e+00> : vector<256x128xf32>
    %47 = tpu.matmul %44, %46, %cst_32 {dimension_numbers = #tpu.dot_dimension_numbers<[1], [0], [0], [1], [0, 0, 1, 1], [], []>} : vector<256x16xbf16>, vector<16x128xbf16>, vector<256x128xf32> -> vector<256x128xf32>
    %48 = arith.addf %40, %47 : vector<256x128xf32>
    %49 = vector.extract_strided_slice %42 {offsets = [1, 0, 0], sizes = [16, 16, 16], strides = [1, 1, 1]} : vector<18x16x16xbf16> to vector<16x16x16xbf16>
    %50 = vector.shape_cast %49 : vector<16x16x16xbf16> to vector<256x16xbf16>
    %c5 = arith.constant 5 : index
    %c0_33 = arith.constant 0 : index
    %c0_34 = arith.constant 0 : index
    %51 = vector.load %arg2[%c5, %c0_33, %c0_34] : memref<9x16x128xbf16, #tpu.memory_space<vmem>>, vector<1x16x128xbf16>
    %52 = vector.shape_cast %51 : vector<1x16x128xbf16> to vector<16x128xbf16>
    %cst_35 = arith.constant dense<0.000000e+00> : vector<256x128xf32>
    %53 = tpu.matmul %50, %52, %cst_35 {dimension_numbers = #tpu.dot_dimension_numbers<[1], [0], [0], [1], [0, 0, 1, 1], [], []>} : vector<256x16xbf16>, vector<16x128xbf16>, vector<256x128xf32> -> vector<256x128xf32>
    %54 = arith.addf %48, %53 : vector<256x128xf32>
    %55 = vector.extract_strided_slice %42 {offsets = [2, 0, 0], sizes = [16, 16, 16], strides = [1, 1, 1]} : vector<18x16x16xbf16> to vector<16x16x16xbf16>
    %56 = vector.shape_cast %55 : vector<16x16x16xbf16> to vector<256x16xbf16>
    %c8 = arith.constant 8 : index
    %c0_36 = arith.constant 0 : index
    %c0_37 = arith.constant 0 : index
    %57 = vector.load %arg2[%c8, %c0_36, %c0_37] : memref<9x16x128xbf16, #tpu.memory_space<vmem>>, vector<1x16x128xbf16>
    %58 = vector.shape_cast %57 : vector<1x16x128xbf16> to vector<16x128xbf16>
    %cst_38 = arith.constant dense<0.000000e+00> : vector<256x128xf32>
    %59 = tpu.matmul %56, %58, %cst_38 {dimension_numbers = #tpu.dot_dimension_numbers<[1], [0], [0], [1], [0, 0, 1, 1], [], []>} : vector<256x16xbf16>, vector<16x128xbf16>, vector<256x128xf32> -> vector<256x128xf32>
    %60 = arith.addf %54, %59 : vector<256x128xf32>
    %c0_39 = arith.constant 0 : index
    %c0_40 = arith.constant 0 : index
    %61 = vector.load %arg3[%c0_39, %c0_40] : memref<1x128xf32, #tpu.memory_space<vmem>>, vector<1x128xf32>
    %62 = vector.broadcast %61 : vector<1x128xf32> to vector<256x128xf32>
    %63 = arith.addf %60, %62 : vector<256x128xf32>
    %cst_41 = arith.constant 0.000000e+00 : f32
    %64 = vector.broadcast %cst_41 : f32 to vector<256x128xf32>
    %65 = arith.maximumf %63, %64 : vector<256x128xf32>
    %66 = arith.truncf %65 : vector<256x128xf32> to vector<256x128xbf16>
    %67 = vector.shape_cast %66 : vector<256x128xbf16> to vector<16x16x128xbf16>
    %c1_42 = arith.constant 1 : index
    %c1_43 = arith.constant 1 : index
    %c0_44 = arith.constant 0 : index
    %68 = vector.load %arg8[%c1_42, %c1_43, %c0_44] : memref<18x18x128xbf16, #tpu.memory_space<vmem>>, vector<16x16x128xbf16>
    tpu.vector_store %arg8[%c1_42, %c1_43, %c0_44], %67 {strides = array<i32>} : memref<18x18x128xbf16, #tpu.memory_space<vmem>>, vector<16x16x128xbf16>,
    %69 = vector.extract_strided_slice %67 {offsets = [1, 0, 0], sizes = [1, 16, 128], strides = [1, 1, 1]} : vector<16x16x128xbf16> to vector<1x16x128xbf16>
    %c0_45 = arith.constant 0 : index
    %c1_46 = arith.constant 1 : index
    %c0_47 = arith.constant 0 : index
    %70 = vector.load %arg8[%c0_45, %c1_46, %c0_47] : memref<18x18x128xbf16, #tpu.memory_space<vmem>>, vector<1x16x128xbf16>
    tpu.vector_store %arg8[%c0_45, %c1_46, %c0_47], %69 {strides = array<i32>} : memref<18x18x128xbf16, #tpu.memory_space<vmem>>, vector<1x16x128xbf16>,
    %71 = vector.extract_strided_slice %67 {offsets = [14, 0, 0], sizes = [1, 16, 128], strides = [1, 1, 1]} : vector<16x16x128xbf16> to vector<1x16x128xbf16>
    %c17 = arith.constant 17 : index
    %c1_48 = arith.constant 1 : index
    %c0_49 = arith.constant 0 : index
    %72 = vector.load %arg8[%c17, %c1_48, %c0_49] : memref<18x18x128xbf16, #tpu.memory_space<vmem>>, vector<1x16x128xbf16>
    tpu.vector_store %arg8[%c17, %c1_48, %c0_49], %71 {strides = array<i32>} : memref<18x18x128xbf16, #tpu.memory_space<vmem>>, vector<1x16x128xbf16>,
    %c0_50 = arith.constant 0 : index
    %c2_51 = arith.constant 2 : index
    %c0_52 = arith.constant 0 : index
    %73 = vector.load %arg8[%c0_50, %c2_51, %c0_52] : memref<18x18x128xbf16, #tpu.memory_space<vmem>>, vector<18x1x128xbf16>
    %c0_53 = arith.constant 0 : index
    %c0_54 = arith.constant 0 : index
    %c0_55 = arith.constant 0 : index
    %74 = vector.load %arg8[%c0_53, %c0_54, %c0_55] : memref<18x18x128xbf16, #tpu.memory_space<vmem>>, vector<18x1x128xbf16>
    tpu.vector_store %arg8[%c0_53, %c0_54, %c0_55], %73 {strides = array<i32>} : memref<18x18x128xbf16, #tpu.memory_space<vmem>>, vector<18x1x128xbf16>,
    %c0_56 = arith.constant 0 : index
    %c15 = arith.constant 15 : index
    %c0_57 = arith.constant 0 : index
    %75 = vector.load %arg8[%c0_56, %c15, %c0_57] : memref<18x18x128xbf16, #tpu.memory_space<vmem>>, vector<18x1x128xbf16>
    %c0_58 = arith.constant 0 : index
    %c17_59 = arith.constant 17 : index
    %c0_60 = arith.constant 0 : index
    %76 = vector.load %arg8[%c0_58, %c17_59, %c0_60] : memref<18x18x128xbf16, #tpu.memory_space<vmem>>, vector<18x1x128xbf16>
    tpu.vector_store %arg8[%c0_58, %c17_59, %c0_60], %75 {strides = array<i32>} : memref<18x18x128xbf16, #tpu.memory_space<vmem>>, vector<18x1x128xbf16>,
    %cst_61 = arith.constant 0.000000e+00 : f32
    %77 = vector.broadcast %cst_61 : f32 to vector<256x8xf32>
    %c0_62 = arith.constant 0 : index
    %c0_63 = arith.constant 0 : index
    %c0_64 = arith.constant 0 : index
    %78 = vector.load %arg8[%c0_62, %c0_63, %c0_64] : memref<18x18x128xbf16, #tpu.memory_space<vmem>>, vector<18x16x128xbf16>
    %79 = vector.extract_strided_slice %78 {offsets = [0, 0, 0], sizes = [16, 16, 128], strides = [1, 1, 1]} : vector<18x16x128xbf16> to vector<16x16x128xbf16>
    %80 = vector.shape_cast %79 : vector<16x16x128xbf16> to vector<256x128xbf16>
    %c0_65 = arith.constant 0 : index
    %c0_66 = arith.constant 0 : index
    %c0_67 = arith.constant 0 : index
    %81 = vector.load %arg4[%c0_65, %c0_66, %c0_67] : memref<9x128x8xbf16, #tpu.memory_space<vmem>>, vector<1x128x8xbf16>
    %82 = vector.shape_cast %81 : vector<1x128x8xbf16> to vector<128x8xbf16>
    %cst_68 = arith.constant dense<0.000000e+00> : vector<256x8xf32>
    %83 = tpu.matmul %80, %82, %cst_68 {dimension_numbers = #tpu.dot_dimension_numbers<[1], [0], [0], [1], [0, 0, 1, 1], [], []>} : vector<256x128xbf16>, vector<128x8xbf16>, vector<256x8xf32> -> vector<256x8xf32>
    %84 = arith.addf %77, %83 : vector<256x8xf32>
    %85 = vector.extract_strided_slice %78 {offsets = [1, 0, 0], sizes = [16, 16, 128], strides = [1, 1, 1]} : vector<18x16x128xbf16> to vector<16x16x128xbf16>
    %86 = vector.shape_cast %85 : vector<16x16x128xbf16> to vector<256x128xbf16>
    %c3_69 = arith.constant 3 : index
    %c0_70 = arith.constant 0 : index
    %c0_71 = arith.constant 0 : index
    %87 = vector.load %arg4[%c3_69, %c0_70, %c0_71] : memref<9x128x8xbf16, #tpu.memory_space<vmem>>, vector<1x128x8xbf16>
    %88 = vector.shape_cast %87 : vector<1x128x8xbf16> to vector<128x8xbf16>
    %cst_72 = arith.constant dense<0.000000e+00> : vector<256x8xf32>
    %89 = tpu.matmul %86, %88, %cst_72 {dimension_numbers = #tpu.dot_dimension_numbers<[1], [0], [0], [1], [0, 0, 1, 1], [], []>} : vector<256x128xbf16>, vector<128x8xbf16>, vector<256x8xf32> -> vector<256x8xf32>
    %90 = arith.addf %84, %89 : vector<256x8xf32>
    %91 = vector.extract_strided_slice %78 {offsets = [2, 0, 0], sizes = [16, 16, 128], strides = [1, 1, 1]} : vector<18x16x128xbf16> to vector<16x16x128xbf16>
    %92 = vector.shape_cast %91 : vector<16x16x128xbf16> to vector<256x128xbf16>
    %c6_73 = arith.constant 6 : index
    %c0_74 = arith.constant 0 : index
    %c0_75 = arith.constant 0 : index
    %93 = vector.load %arg4[%c6_73, %c0_74, %c0_75] : memref<9x128x8xbf16, #tpu.memory_space<vmem>>, vector<1x128x8xbf16>
    %94 = vector.shape_cast %93 : vector<1x128x8xbf16> to vector<128x8xbf16>
    %cst_76 = arith.constant dense<0.000000e+00> : vector<256x8xf32>
    %95 = tpu.matmul %92, %94, %cst_76 {dimension_numbers = #tpu.dot_dimension_numbers<[1], [0], [0], [1], [0, 0, 1, 1], [], []>} : vector<256x128xbf16>, vector<128x8xbf16>, vector<256x8xf32> -> vector<256x8xf32>
    %96 = arith.addf %90, %95 : vector<256x8xf32>
    %c0_77 = arith.constant 0 : index
    %c1_78 = arith.constant 1 : index
    %c0_79 = arith.constant 0 : index
    %97 = vector.load %arg8[%c0_77, %c1_78, %c0_79] : memref<18x18x128xbf16, #tpu.memory_space<vmem>>, vector<18x16x128xbf16>
    %98 = vector.extract_strided_slice %97 {offsets = [0, 0, 0], sizes = [16, 16, 128], strides = [1, 1, 1]} : vector<18x16x128xbf16> to vector<16x16x128xbf16>
    %99 = vector.shape_cast %98 : vector<16x16x128xbf16> to vector<256x128xbf16>
    %c1_80 = arith.constant 1 : index
    %c0_81 = arith.constant 0 : index
    %c0_82 = arith.constant 0 : index
    %100 = vector.load %arg4[%c1_80, %c0_81, %c0_82] : memref<9x128x8xbf16, #tpu.memory_space<vmem>>, vector<1x128x8xbf16>
    %101 = vector.shape_cast %100 : vector<1x128x8xbf16> to vector<128x8xbf16>
    %cst_83 = arith.constant dense<0.000000e+00> : vector<256x8xf32>
    %102 = tpu.matmul %99, %101, %cst_83 {dimension_numbers = #tpu.dot_dimension_numbers<[1], [0], [0], [1], [0, 0, 1, 1], [], []>} : vector<256x128xbf16>, vector<128x8xbf16>, vector<256x8xf32> -> vector<256x8xf32>
    %103 = arith.addf %96, %102 : vector<256x8xf32>
    %104 = vector.extract_strided_slice %97 {offsets = [1, 0, 0], sizes = [16, 16, 128], strides = [1, 1, 1]} : vector<18x16x128xbf16> to vector<16x16x128xbf16>
    %105 = vector.shape_cast %104 : vector<16x16x128xbf16> to vector<256x128xbf16>
    %c4_84 = arith.constant 4 : index
    %c0_85 = arith.constant 0 : index
    %c0_86 = arith.constant 0 : index
    %106 = vector.load %arg4[%c4_84, %c0_85, %c0_86] : memref<9x128x8xbf16, #tpu.memory_space<vmem>>, vector<1x128x8xbf16>
    %107 = vector.shape_cast %106 : vector<1x128x8xbf16> to vector<128x8xbf16>
    %cst_87 = arith.constant dense<0.000000e+00> : vector<256x8xf32>
    %108 = tpu.matmul %105, %107, %cst_87 {dimension_numbers = #tpu.dot_dimension_numbers<[1], [0], [0], [1], [0, 0, 1, 1], [], []>} : vector<256x128xbf16>, vector<128x8xbf16>, vector<256x8xf32> -> vector<256x8xf32>
    %109 = arith.addf %103, %108 : vector<256x8xf32>
    %110 = vector.extract_strided_slice %97 {offsets = [2, 0, 0], sizes = [16, 16, 128], strides = [1, 1, 1]} : vector<18x16x128xbf16> to vector<16x16x128xbf16>
    %111 = vector.shape_cast %110 : vector<16x16x128xbf16> to vector<256x128xbf16>
    %c7_88 = arith.constant 7 : index
    %c0_89 = arith.constant 0 : index
    %c0_90 = arith.constant 0 : index
    %112 = vector.load %arg4[%c7_88, %c0_89, %c0_90] : memref<9x128x8xbf16, #tpu.memory_space<vmem>>, vector<1x128x8xbf16>
    %113 = vector.shape_cast %112 : vector<1x128x8xbf16> to vector<128x8xbf16>
    %cst_91 = arith.constant dense<0.000000e+00> : vector<256x8xf32>
    %114 = tpu.matmul %111, %113, %cst_91 {dimension_numbers = #tpu.dot_dimension_numbers<[1], [0], [0], [1], [0, 0, 1, 1], [], []>} : vector<256x128xbf16>, vector<128x8xbf16>, vector<256x8xf32> -> vector<256x8xf32>
    %115 = arith.addf %109, %114 : vector<256x8xf32>
    %c0_92 = arith.constant 0 : index
    %c2_93 = arith.constant 2 : index
    %c0_94 = arith.constant 0 : index
    %116 = vector.load %arg8[%c0_92, %c2_93, %c0_94] : memref<18x18x128xbf16, #tpu.memory_space<vmem>>, vector<18x16x128xbf16>
    %117 = vector.extract_strided_slice %116 {offsets = [0, 0, 0], sizes = [16, 16, 128], strides = [1, 1, 1]} : vector<18x16x128xbf16> to vector<16x16x128xbf16>
    %118 = vector.shape_cast %117 : vector<16x16x128xbf16> to vector<256x128xbf16>
    %c2_95 = arith.constant 2 : index
    %c0_96 = arith.constant 0 : index
    %c0_97 = arith.constant 0 : index
    %119 = vector.load %arg4[%c2_95, %c0_96, %c0_97] : memref<9x128x8xbf16, #tpu.memory_space<vmem>>, vector<1x128x8xbf16>
    %120 = vector.shape_cast %119 : vector<1x128x8xbf16> to vector<128x8xbf16>
    %cst_98 = arith.constant dense<0.000000e+00> : vector<256x8xf32>
    %121 = tpu.matmul %118, %120, %cst_98 {dimension_numbers = #tpu.dot_dimension_numbers<[1], [0], [0], [1], [0, 0, 1, 1], [], []>} : vector<256x128xbf16>, vector<128x8xbf16>, vector<256x8xf32> -> vector<256x8xf32>
    %122 = arith.addf %115, %121 : vector<256x8xf32>
    %123 = vector.extract_strided_slice %116 {offsets = [1, 0, 0], sizes = [16, 16, 128], strides = [1, 1, 1]} : vector<18x16x128xbf16> to vector<16x16x128xbf16>
    %124 = vector.shape_cast %123 : vector<16x16x128xbf16> to vector<256x128xbf16>
    %c5_99 = arith.constant 5 : index
    %c0_100 = arith.constant 0 : index
    %c0_101 = arith.constant 0 : index
    %125 = vector.load %arg4[%c5_99, %c0_100, %c0_101] : memref<9x128x8xbf16, #tpu.memory_space<vmem>>, vector<1x128x8xbf16>
    %126 = vector.shape_cast %125 : vector<1x128x8xbf16> to vector<128x8xbf16>
    %cst_102 = arith.constant dense<0.000000e+00> : vector<256x8xf32>
    %127 = tpu.matmul %124, %126, %cst_102 {dimension_numbers = #tpu.dot_dimension_numbers<[1], [0], [0], [1], [0, 0, 1, 1], [], []>} : vector<256x128xbf16>, vector<128x8xbf16>, vector<256x8xf32> -> vector<256x8xf32>
    %128 = arith.addf %122, %127 : vector<256x8xf32>
    %129 = vector.extract_strided_slice %116 {offsets = [2, 0, 0], sizes = [16, 16, 128], strides = [1, 1, 1]} : vector<18x16x128xbf16> to vector<16x16x128xbf16>
    %130 = vector.shape_cast %129 : vector<16x16x128xbf16> to vector<256x128xbf16>
    %c8_103 = arith.constant 8 : index
    %c0_104 = arith.constant 0 : index
    %c0_105 = arith.constant 0 : index
    %131 = vector.load %arg4[%c8_103, %c0_104, %c0_105] : memref<9x128x8xbf16, #tpu.memory_space<vmem>>, vector<1x128x8xbf16>
    %132 = vector.shape_cast %131 : vector<1x128x8xbf16> to vector<128x8xbf16>
    %cst_106 = arith.constant dense<0.000000e+00> : vector<256x8xf32>
    %133 = tpu.matmul %130, %132, %cst_106 {dimension_numbers = #tpu.dot_dimension_numbers<[1], [0], [0], [1], [0, 0, 1, 1], [], []>} : vector<256x128xbf16>, vector<128x8xbf16>, vector<256x8xf32> -> vector<256x8xf32>
    %134 = arith.addf %128, %133 : vector<256x8xf32>
    %c0_107 = arith.constant 0 : index
    %c0_108 = arith.constant 0 : index
    %135 = vector.load %arg5[%c0_107, %c0_108] : memref<1x8xf32, #tpu.memory_space<vmem>>, vector<1x8xf32>
    %136 = vector.broadcast %135 : vector<1x8xf32> to vector<256x8xf32>
    %137 = arith.addf %134, %136 : vector<256x8xf32>
    %138 = tpu.transpose %137, [1, 0] : vector<256x8xf32> -> vector<8x256xf32>
    %139 = vector.extract_strided_slice %138 {offsets = [0, 0], sizes = [4, 256], strides = [1, 1]} : vector<8x256xf32> to vector<4x256xf32>
    %140 = vector.extract_strided_slice %138 {offsets = [4, 0], sizes = [4, 256], strides = [1, 1]} : vector<8x256xf32> to vector<4x256xf32>
    %c0_109 = arith.constant 0 : index
    %c0_110 = arith.constant 0 : index
    %c0_111 = arith.constant 0 : index
    %141 = vector.load %arg6[%c0_109, %c0_110, %c0_111] : memref<1x4x256xbf16, #tpu.memory_space<vmem>>, vector<1x4x256xbf16>
    %142 = vector.shape_cast %141 : vector<1x4x256xbf16> to vector<4x256xbf16>
    %143 = arith.extf %142 : vector<4x256xbf16> to vector<4x256xf32>
    %cst_112 = arith.constant dense<0.000000e+00> : vector<4xf32>
    %144 = vector.multi_reduction <add>, %143, %cst_112 [1] : vector<4x256xf32> to vector<4xf32>
    %145 = vector.shape_cast %144 : vector<4xf32> to vector<4x1xf32>
    %cst_113 = arith.constant 2.560000e+02 : f32
    %146 = vector.broadcast %cst_113 : f32 to vector<4x1xf32>
    %147 = arith.divf %145, %146 : vector<4x1xf32>
    %148 = vector.broadcast %147 : vector<4x1xf32> to vector<4x256xf32>
    %149 = arith.subf %143, %148 : vector<4x256xf32>
    %150 = arith.mulf %149, %149 : vector<4x256xf32>
    %cst_114 = arith.constant dense<0.000000e+00> : vector<4xf32>
    %151 = vector.multi_reduction <add>, %150, %cst_114 [1] : vector<4x256xf32> to vector<4xf32>
    %152 = vector.shape_cast %151 : vector<4xf32> to vector<4x1xf32>
    %cst_115 = arith.constant 2.560000e+02 : f32
    %153 = vector.broadcast %cst_115 : f32 to vector<4x1xf32>
    %154 = arith.divf %152, %153 : vector<4x1xf32>
    %155 = vector.broadcast %147 : vector<4x1xf32> to vector<4x256xf32>
    %156 = arith.subf %143, %155 : vector<4x256xf32>
    %cst_116 = arith.constant 9.99999974E-6 : f32
    %157 = vector.broadcast %cst_116 : f32 to vector<4x1xf32>
    %158 = arith.addf %154, %157 : vector<4x1xf32>
    %159 = math.rsqrt %158 : vector<4x1xf32>
    %160 = vector.broadcast %159 : vector<4x1xf32> to vector<4x256xf32>
    %161 = arith.mulf %156, %160 : vector<4x256xf32>
    %cst_117 = arith.constant 1.000000e+00 : f32
    %162 = vector.broadcast %cst_117 : f32 to vector<4x256xf32>
    %163 = arith.addf %162, %139 : vector<4x256xf32>
    %164 = arith.mulf %161, %163 : vector<4x256xf32>
    %165 = arith.addf %164, %140 : vector<4x256xf32>
    %c0_118 = arith.constant 0 : index
    %c0_119 = arith.constant 0 : index
    %c0_120 = arith.constant 0 : index
    %166 = vector.load %arg7[%c0_118, %c0_119, %c0_120] : memref<1x4x256xf32, #tpu.memory_space<vmem>>, vector<1x4x256xf32>
    %167 = vector.shape_cast %166 : vector<1x4x256xf32> to vector<4x256xf32>
    %168 = vector.shape_cast %165 : vector<4x256xf32> to vector<1x4x256xf32>
    tpu.vector_store %arg7[%c0_118, %c0_119, %c0_120], %168 {strides = array<i32>} : memref<1x4x256xf32, #tpu.memory_space<vmem>>, vector<1x4x256xf32>,
    return
  }
  func.func @transform_0(%arg0: i32) -> (i32, i32, i32, i32) {
    %c0_i32 = arith.constant 0 : i32
    %c0_i32_0 = arith.constant 0 : i32
    %c0_i32_1 = arith.constant 0 : i32
    %c0_i32_2 = arith.constant 0 : i32
    return %arg0, %c0_i32, %c0_i32_0, %c0_i32_1 : i32, i32, i32, i32
  }
  func.func @transform_1(%arg0: i32) -> (i32, i32, i32) {
    %c0_i32 = arith.constant 0 : i32
    %c0_i32_0 = arith.constant 0 : i32
    %c0_i32_1 = arith.constant 0 : i32
    %c0_i32_2 = arith.constant 0 : i32
    return %c0_i32, %c0_i32_0, %c0_i32_1 : i32, i32, i32
  }
  func.func @transform_2(%arg0: i32) -> (i32, i32) {
    %c0_i32 = arith.constant 0 : i32
    %c0_i32_0 = arith.constant 0 : i32
    %c0_i32_1 = arith.constant 0 : i32
    return %c0_i32, %c0_i32_0 : i32, i32
  }
  func.func @transform_3(%arg0: i32) -> (i32, i32, i32) {
    %c0_i32 = arith.constant 0 : i32
    %c0_i32_0 = arith.constant 0 : i32
    %c0_i32_1 = arith.constant 0 : i32
    %c0_i32_2 = arith.constant 0 : i32
    return %c0_i32, %c0_i32_0, %c0_i32_1 : i32, i32, i32
  }
  func.func @transform_4(%arg0: i32) -> (i32, i32) {
    %c0_i32 = arith.constant 0 : i32
    %c0_i32_0 = arith.constant 0 : i32
    %c0_i32_1 = arith.constant 0 : i32
    return %c0_i32, %c0_i32_0 : i32, i32
  }
  func.func @transform_5(%arg0: i32) -> (i32, i32, i32) {
    %c0_i32 = arith.constant 0 : i32
    %c0_i32_0 = arith.constant 0 : i32
    %c0_i32_1 = arith.constant 0 : i32
    return %arg0, %c0_i32, %c0_i32_0 : i32, i32, i32
  }
  func.func @transform_6(%arg0: i32) -> (i32, i32, i32) {
    %c0_i32 = arith.constant 0 : i32
    %c0_i32_0 = arith.constant 0 : i32
    %c0_i32_1 = arith.constant 0 : i32
    return %arg0, %c0_i32, %c0_i32_0 : i32, i32, i32
  }
}

</mosaic_0001>

<bundles_post_ra>
// kernel: spade_forward.1
= control target key start
LH: loop header
LB: loop body
LE: loop exit
PB: predicated region body
PF: predicated region fallthrough
CT: control target
= control target key end

     0   :  { %s9922_s21 = smov 0   ;;  %s11978_s0 = inlined_call_operand.vmem [shape: bf16[2,18,18,16], index: 0, kind: input, shape index: {}]   ;;  %s11979_s1 = inlined_call_operand.vmem [shape: bf16[9,16,128], index: 1, kind: input, shape index: {}]   ;;  %s11980_s2 = inlined_call_operand.vmem [shape: f32[1,128], index: 2, kind: input, shape index: {}]   ;;  %s11981_s3 = inlined_call_operand.vmem [shape: bf16[9,128,8], index: 3, kind: input, shape index: {}]   ;;  %s11982_s4 = inlined_call_operand.vmem [shape: f32[1,8], index: 4, kind: input, shape index: {}]   ;;  %s11983_s5 = inlined_call_operand.vmem [shape: bf16[2,4,256], index: 5, kind: input, shape index: {}]   ;;  %s11984_s6 = inlined_call_operand.vmem [shape: f32[2,4,256], index: 6, kind: output, shape index: {}]  }
   0x1 LB: > { %s7482_s22 = sadd.s32 4294967295, %s9884_s21   ;;  %p7486_p0 = scmp.ge.s32.totalorder %s9884_s21, 1  ;;  %s9884_s21 = sphi %s9922_s21, %s16_s21  }
   0x2   : > { %p222_p1 = scmp.lt.s32.totalorder %s9884_s21, 3 }
   0x4   : > { %p223_p2 = pnand %p7486_p0, %p222_p1 }
   0x6   : > { %226 = sbr.rel (%p223_p2) target bundleno = 1710 (0x6ae), region = 44 }
   0xd   : > { %v9756_v0 = vld [vmem:[%s11979_s1 + $0x18] sm:$0xff]   ;;  %p257_p3 = scmp.lt.s32.totalorder %s7482_s22, 1  ;;  %v9758_v1 = vld [vmem:[%s11979_s1] sm:$0xff]   ;;  %vm400_vm0 = vcmask 130048   ;;  %v9775_v2 = vld [vmem:[%s11979_s1 + $0x30] sm:$0xff]   ;;  %vm2264_vm4 = vcmask 1042432  }
   0xe   : > { %8480 = vmatprep.subr.bf16.mxu0 %v9756_v0  ;;  %v9776_v20 = vld [vmem:[%s11979_s1 + $0x8] sm:$0xff]   ;;  %v10018_v21 = vld [vmem:[%s11979_s1 + $0x20] sm:$0xff]   ;;  %vm1049_vm1 = vsmask.f32 3328  ;;  %vm1050_vm2 = vsmask.f32 7440 }
   0xf   : > { %s12097_s22 = smov (!%p257_p3, %s7482_s22), 1  ;;  %8481 = vmatpush3.bf16.msra.mxu0 %v9756_v0  ;;  %vm10068_vm3 = vmor %vm1049_vm1, %vm1050_vm2  ;;  %vm2265_vm5 = vcmask 1046532   ;;  %vm3280_vm7 = vsmask.f32 256  ;;  %vm3604_vm8 = vcmask 1043456   ;;  %vm3611_vm10 = vcmask 1040384  }
  0x10   : > { %s9746_s27 = smul.u32 216, %s12097_s22  ;;  %8514 = vmatprep.subr.bf16.mxu0 %v9758_v1  ;;  %vm10509_vm6 = vmor %vm2264_vm4, %vm2265_vm5  ;;  %vm3605_vm9 = vsmask.f32 7938  ;;  %vm3281_vm11 = vsmask.f32 4368  ;;  %s8078_s23 = sshll.u32 %s12097_s22, 3 }
  0x11   : > { %vm10791_vm12 = vmand %vm3604_vm8, %vm3605_vm9  ;;  %s271_s26 = scalar_lea.vmem %s11984_s6, %s8078_s23 }
  0x12   : > { %s9942_s30 = scalar_lea.vmem %s11978_s0, %s9746_s27  ;;  %vm10798_vm13 = vmand %vm3611_vm10, %vm3280_vm7  ;;  %s8077_s27 = sshll.u32 %s12097_s22, 2 }
  0x13   : > { %v9757_v3 = vld [vmem:[%s9942_s30 + $0xc] sm:$0xff]   ;;  %v9759_v4 = vld [vmem:[%s9942_s30 + $0x18] sm:$0xff]   ;;  %v9760_v5 = vld [vmem:[%s9942_s30 + $0x24] sm:$0xff]  }
  0x14   : > { %8482 = vmatprep.mubr.msk.bf16.mxu0 %vm400_vm0, %v9757_v3  ;;  %v9761_v6 = vld [vmem:[%s9942_s30 + $0x30] sm:$0xff]   ;;  %v9762_v7 = vld [vmem:[%s9942_s30 + $0x3c] sm:$0xff]   ;;  %v9763_v8 = vld [vmem:[%s9942_s30 + $0x48] sm:$0xff]  }
  0x15   : > { %8483 = vmatmul.mubr.msk.bf16.vlgmr.msra.gmra.mrb[0].mxu0 %vm400_vm0, %v9759_v4  ;;  %v9764_v9 = vld [vmem:[%s9942_s30 + $0x54] sm:$0xff]   ;;  %v9765_v10 = vld [vmem:[%s9942_s30 + $0x60] sm:$0xff]   ;;  %v9766_v11 = vld [vmem:[%s9942_s30 + $0x6c] sm:$0xff]  }
  0x16   : > { %8515 = vmatpush3.bf16.msra.mxu0 %v9758_v1  ;;  %8486 = vmatprep.mubr.msk.bf16.mxu0 %vm400_vm0, %v9760_v5  ;;  %v9767_v12 = vld [vmem:[%s9942_s30 + $0x78] sm:$0xff]   ;;  %v9768_v13 = vld [vmem:[%s9942_s30 + $0x84] sm:$0xff]   ;;  %v9769_v14 = vld [vmem:[%s9942_s30 + $0x90] sm:$0xff]  }
  0x17   : > { %8548 = vmatprep.subr.bf16.mxu0 %v9775_v2  ;;  %v9971_v15 = vld [vmem:[%s9942_s30 + $0x9c] sm:$0xff]   ;;  %v9977_v16 = vld [vmem:[%s9942_s30 + $0xa8] sm:$0xff]   ;;  %v9980_v17 = vld [vmem:[%s9942_s30 + $0xb4] sm:$0xff]  }
  0x18   : > { %v9987_v18 = vld [vmem:[%s9942_s30 + $0xc0] sm:$0xff]   ;;  %v998_v28 = vld [vmem:[%s9942_s30 + $0xc] sm:$0xf]  ;;  %v10037_v29 = vld [vmem:[%s9942_s30 + $0x10] sm:$0xf] }
  0x19   : > { %v9774_v19 = vld [vmem:[%s9942_s30] sm:$0xff]   ;;  %v1077_v32 = vshrl.u32 %v998_v28, 16  ;;  %v1080_v33 = vshll.u32 %v998_v28, 16  ;;  %v1001_v34 = vld [vmem:[%s9942_s30 + $0x18] sm:$0xf]  ;;  %v1086_v37 = vshll.u32 %v10037_v29, 16  ;;  %vm10804_vm14 = vmor %vm3280_vm7, %vm3281_vm11 }
  0x1a   : > { %v995_v22 = vld [vmem:[%s9942_s30] sm:$0xf]  ;;  %v10031_v23 = vld [vmem:[%s9942_s30 + $0x4] sm:$0xf]  ;;  %v1090_v38 = vshrl.u32 %v10037_v29, 16  ;;  %v1101_v41 = vshrl.u32 %v1001_v34, 16  ;;  %vm10842_vm15 = vmand %vm3611_vm10, %vm3605_vm9 }
  0x1b   : > { %v1053_v24 = vshrl.u32 %v995_v22, 16  ;;  %v1056_v25 = vshll.u32 %v995_v22, 16  ;;  %v1062_v26 = vshll.u32 %v10031_v23, 16  ;;  %v1066_v27 = vshrl.u32 %v10031_v23, 16  ;;  %v10047_v39 = vld [vmem:[%s9942_s30 + $0x8] sm:$0x1] }
  0x1c   : > { %v10050_v40 = vld [vmem:[%s9942_s30 + $0x1c] sm:$0xf]  ;;  %v1104_v42 = vshll.u32 %v1001_v34, 16  ;;  %v1079_v44 = vrot.slane %v1077_v32, 4  ;;  %v1082_v45 = vrot.slane %v1080_v33, 5  ;;  %v1072_v47 = vshll.u32 %v10047_v39, 16 }
  0x1d   : > { %8487 = vmatmul.mubr.msk.bf16.gmra.mrb[4].mxu0 %vm400_vm0, %v9761_v6  ;;  %v1055_v30 = vrot.slane %v1053_v24, 4  ;;  %v1058_v31 = vrot.slane %v1056_v25, 5  ;;  %v10042_v35 = vrot.slane %v1062_v26, 5  ;;  %v1068_v36 = vrot.slane %v1066_v27, 4  ;;  %v10055_v48 = vld [vmem:[%s9942_s30 + $0x14] sm:$0x1] }
  0x1e   : > { %8490 = vmatprep.mubr.msk.bf16.mxu0 %vm400_vm0, %v9762_v7  ;;  %v10057_v49 = vrot.slane %v1086_v37, 5  ;;  %v1092_v50 = vrot.slane %v1090_v38, 4  ;;  %v1110_v51 = vshll.u32 %v10050_v40, 16  ;;  %v1103_v52 = vrot.slane %v1101_v41, 4  ;;  %v1004_v57 = vld [vmem:[%s9942_s30 + $0x24] sm:$0xf] }
  0x1f   : > { %v1059_v43 = vor.u32 %v1058_v31, %v1055_v30  ;;  %v1069_v46 = vor.u32 %v1068_v36, %v10042_v35  ;;  %v1106_v53 = vrot.slane %v1104_v42, 5  ;;  %v1114_v54 = vshrl.u32 %v10050_v40, 16  ;;  %v10074_v61 = vld [vmem:[%s9942_s30 + $0x28] sm:$0xf]  ;;  %v1007_v1 = vld [vmem:[%s9942_s30 + $0x30] sm:$0xf] }
  0x20   : > { %v1083_v56 = vor.u32 %v1082_v45, %v1079_v44  ;;  %v1096_v60 = vshll.u32 %v10055_v48, 16  ;;  %v1074_v62 = vrot.slane %v1072_v47, 5  ;;  %v1093_v63 = vor.u32 %v1092_v50, %v10057_v49  ;;  %v10107_v30 = vld [vmem:[%s9942_s30 + $0x40] sm:$0xf]  ;;  %v10112_v31 = vld [vmem:[%s9942_s30 + $0x2c] sm:$0x1] }
  0x21   : > { %v1060_v55 = vrot.slane %v1059_v43, 4  ;;  %v1070_v59 = vrot.slane %v1069_v46, 4  ;;  %v10077_v0 = vrot.slane %v1110_v51, 5  ;;  %v10119_v36 = vld [vmem:[%s9942_s30 + $0x38] sm:$0x1]  ;;  %v1182_v44 = vshll.u32 %v10107_v30, 16 }
  0x22   : > { %v10100_v22 = vrot.slane %v1096_v60, 5  ;;  %v1186_v45 = vshrl.u32 %v10107_v30, 16  ;;  %v10131_v46 = vld [vmem:[%s9942_s30 + $0x4c] sm:$0xf] }
  0x25   : > { %8491 = vmatmul.mubr.msk.bf16.gmra.mrb[8].mxu0 %vm400_vm0, %v9763_v8 }
  0x26   : > { %8494 = vmatprep.mubr.msk.bf16.mxu0 %vm400_vm0, %v9764_v9 }
  0x2d   : > { %8495 = vmatmul.mubr.msk.bf16.gmra.mrb[12].mxu0 %vm400_vm0, %v9765_v10 }
  0x2e   : > { %8498 = vmatprep.mubr.msk.bf16.mxu0 %vm400_vm0, %v9766_v11 }
  0x35   : > { %8499 = vmatmul.mubr.msk.bf16.gmra.mrb[16].mxu0 %vm400_vm0, %v9767_v12 }
  0x36   : > { %8502 = vmatprep.mubr.msk.bf16.mxu0 %vm400_vm0, %v9768_v13 }
  0x3d   : > { %8503 = vmatmul.mubr.msk.bf16.gmra.mrb[20].mxu0 %vm400_vm0, %v9769_v14 }
  0x3e   : > { %8506 = vmatprep.mubr.msk.bf16.mxu0 %vm400_vm0, %v9971_v15 }
  0x45   : > { %8507 = vmatmul.mubr.msk.bf16.gmra.mrb[24].mxu0 %vm400_vm0, %v9977_v16 }
  0x46   : > { %8510 = vmatprep.mubr.msk.bf16.mxu0 %vm400_vm0, %v9980_v17 }
  0x4d   : > { %8511 = vmatmul.mubr.msk.bf16.gmra.mrb[28].mxu0 %vm400_vm0, %v9987_v18 }
  0x4e   : > { %8516 = vmatprep.mubr.msk.bf16.mxu0 %vm400_vm0, %v9774_v19  ;;  %v1075_v19 = vsel %vm10068_vm3, %v1070_v59, %v1074_v62  ;;  %v1206_v62 = vshll.u32 %v10131_v46, 16 }
  0x55   : > { %8517 = vmatmul.mubr.msk.bf16.vlgmr.msra.gmra.mrb[0].mxu0 %vm400_vm0, %v9757_v3  ;;  %v10084_v3 = vld [vmem:[%s9942_s30 + $0x20] sm:$0x1] }
  0x56   : > { %8549 = vmatpush3.bf16.msra.mxu0 %v9775_v2  ;;  %8520 = vmatprep.mubr.msk.bf16.mxu0 %vm400_vm0, %v9759_v4  ;;  %v10081_v2 = vld [vmem:[%s9942_s30 + $0x34] sm:$0xf]  ;;  %v1120_v24 = vshll.u32 %v10084_v3, 16 }
  0x57   : > { %8582 = vmatprep.subr.bf16.mxu0 %v9776_v20 }
  0x58   : > { %v1122_v50 = vrot.slane %v1120_v24, 5 }
  0x5d   : > { %8521 = vmatmul.mubr.msk.bf16.gmra.mrb[4].mxu0 %vm400_vm0, %v9760_v5 }
  0x5e   : > { %8524 = vmatprep.mubr.msk.bf16.mxu0 %vm400_vm0, %v9761_v6 }
  0x65   : > { %8525 = vmatmul.mubr.msk.bf16.gmra.mrb[8].mxu0 %vm400_vm0, %v9762_v7 }
  0x66   : > { %8528 = vmatprep.mubr.msk.bf16.mxu0 %vm400_vm0, %v9763_v8 }
  0x6d   : > { %8529 = vmatmul.mubr.msk.bf16.gmra.mrb[12].mxu0 %vm400_vm0, %v9764_v9 }
  0x6e   : > { %8532 = vmatprep.mubr.msk.bf16.mxu0 %vm400_vm0, %v9765_v10 }
  0x75   : > { %8533 = vmatmul.mubr.msk.bf16.gmra.mrb[16].mxu0 %vm400_vm0, %v9766_v11 }
  0x76   : > { %8536 = vmatprep.mubr.msk.bf16.mxu0 %vm400_vm0, %v9767_v12 }
  0x7d   : > { %8537 = vmatmul.mubr.msk.bf16.gmra.mrb[20].mxu0 %vm400_vm0, %v9768_v13 }
  0x7e   : > { %8540 = vmatprep.mubr.msk.bf16.mxu0 %vm400_vm0, %v9769_v14 }
  0x85   : > { %8541 = vmatmul.mubr.msk.bf16.gmra.mrb[24].mxu0 %vm400_vm0, %v9971_v15 }
  0x86   : > { %8544 = vmatprep.mubr.msk.bf16.mxu0 %vm400_vm0, %v9977_v16 }
  0x8d   : > { %8545 = vmatmul.mubr.msk.bf16.gmra.mrb[28].mxu0 %vm400_vm0, %v9980_v17 }
  0x8e   : > { %8550 = vmatprep.mubr.msk.bf16.mxu0 %vm400_vm0, %v9759_v4  ;;  %v1107_v4 = vor.u32 %v1106_v53, %v1103_v52  ;;  %v1144_v52 = vshll.u32 %v10112_v31, 16  ;;  %v9777_v53 = vld [vmem:[%s9942_s30 + $0xcc] sm:$0xff]  }
  0x90   : > { %v10103_v25 = vrot.slane %v1107_v4, 4 }
  0x95   : > { %8551 = vmatmul.mubr.msk.bf16.vlgmr.msra.gmra.mrb[0].mxu0 %vm400_vm0, %v9760_v5  ;;  %v1116_v5 = vrot.slane %v1114_v54, 4 }
  0x96   : > { %8583 = vmatpush3.bf16.msra.mxu0 %v9776_v20  ;;  %8554 = vmatprep.mubr.msk.bf16.mxu0 %vm400_vm0, %v9761_v6  ;;  %v1125_v6 = vshrl.u32 %v1004_v57, 16  ;;  %v10098_v20 = vrot.slane %v1093_v63, 4  ;;  %v1210_v63 = vshrl.u32 %v10131_v46, 16 }
  0x97   : > { %8616 = vmatprep.subr.bf16.mxu0 %v10018_v21  ;;  %v1117_v26 = vor.u32 %v1116_v5, %v10077_v0  ;;  %v10143_v5 = vrot.slane %v1182_v44, 5 }
  0x98   : > { %v1127_v27 = vrot.slane %v1125_v6, 4  ;;  %v1188_v6 = vrot.slane %v1186_v45, 4  ;;  %v1019_v45 = vld [vmem:[%s9942_s30 + $0x60] sm:$0xf] }
  0x99   : > { %v1118_v47 = vrot.slane %v1117_v26, 4 }
  0x9d   : > { %8555 = vmatmul.mubr.msk.bf16.gmra.mrb[4].mxu0 %vm400_vm0, %v9762_v7  ;;  %v1128_v7 = vshll.u32 %v1004_v57, 16 }
  0x9e   : > { %8558 = vmatprep.mubr.msk.bf16.mxu0 %vm400_vm0, %v9763_v8  ;;  %v1065_v8 = vsel %vm10068_vm3, %v1060_v55, %v10042_v35  ;;  %v1168_v55 = vshll.u32 %v10119_v36, 16 }
  0x9f   : > { %v1130_v28 = vrot.slane %v1128_v7, 5  ;;  %v7567_v42 = vcombine.low %v1065_v8, %v1075_v19  ;;  %v1099_v7 = vsel %vm10068_vm3, %v10098_v20, %v10100_v22  ;;  %v1113_v8 = vsel %vm10068_vm3, %v10103_v25, %v10077_v0  ;;  %v10164_v22 = vld [vmem:[%s9942_s30 + $0x58] sm:$0xf] }
  0xa0   : > { %v10161_v20 = vrot.slane %v1206_v62, 5  ;;  %v1212_v0 = vrot.slane %v1210_v63, 4  ;;  %v1170_v26 = vrot.slane %v1168_v55, 5  ;;  %v1234_v44 = vshrl.u32 %v10164_v22, 16  ;;  %v10198_v55 = vld [vmem:[%s9942_s30 + $0x5c] sm:$0x1] }
  0xa1   : > { %v1131_v51 = vor.u32 %v1130_v28, %v1127_v27  ;;  %v1189_v27 = vor.u32 %v1188_v6, %v10143_v5  ;;  %v10168_v28 = vld [vmem:[%s9942_s30 + $0x50] sm:$0x1] }
  0xa5   : > { %8559 = vmatmul.mubr.msk.bf16.gmra.mrb[8].mxu0 %vm400_vm0, %v9764_v9  ;;  %v10089_v9 = vrot.slane %v1083_v56, 4  ;;  %v10138_v56 = vld [vmem:[%s9942_s30 + $0x44] sm:$0x1] }
  0xa6   : > { %8562 = vmatprep.mubr.msk.bf16.mxu0 %vm400_vm0, %v9765_v10  ;;  %v1134_v10 = vshll.u32 %v10074_v61, 16 }
  0xa7   : > { %v1089_v43 = vsel %vm10068_vm3, %v10089_v9, %v10057_v49  ;;  %v10153_v9 = vrot.slane %v1144_v52, 5 }
  0xa8   : > { %v10114_v32 = vrot.slane %v1134_v10, 5  ;;  %v1192_v10 = vshll.u32 %v10138_v56, 16 }
  0xad   : > { %8563 = vmatmul.mubr.msk.bf16.gmra.mrb[12].mxu0 %vm400_vm0, %v9766_v11  ;;  %v1138_v11 = vshrl.u32 %v10074_v61, 16 }
  0xae   : > { %8566 = vmatprep.mubr.msk.bf16.mxu0 %vm400_vm0, %v9767_v12  ;;  %v1149_v12 = vshrl.u32 %v1007_v1, 16 }
  0xaf   : > { %v1140_v33 = vrot.slane %v1138_v11, 4  ;;  %v1123_v11 = vsel %vm10068_vm3, %v1118_v47, %v1122_v50  ;;  %v1213_v50 = vor.u32 %v1212_v0, %v10161_v20 }
  0xb0   : > { %v1151_v37 = vrot.slane %v1149_v12, 4  ;;  %v1132_v12 = vrot.slane %v1131_v51, 4  ;;  %v1216_v51 = vshll.u32 %v10168_v28, 16 }
  0xb1   : > { %v1141_v54 = vor.u32 %v1140_v33, %v10114_v32  ;;  %v10170_v33 = vcombine.low %v1089_v43, %v1099_v7  ;;  %v1236_v7 = vrot.slane %v1234_v44, 4 }
  0xb5   : > { %8567 = vmatmul.mubr.msk.bf16.gmra.mrb[16].mxu0 %vm400_vm0, %v9768_v13  ;;  %v1152_v13 = vshll.u32 %v1007_v1, 16 }
  0xb6   : > { %8570 = vmatprep.mubr.msk.bf16.mxu0 %vm400_vm0, %v9769_v14  ;;  %v1158_v14 = vshll.u32 %v10081_v2, 16 }
  0xb7   : > { %v1154_v38 = vrot.slane %v1152_v13, 5  ;;  %v1142_v13 = vrot.slane %v1141_v54, 4  ;;  %v1190_v54 = vrot.slane %v1189_v27, 4 }
  0xb8   : > { %v10121_v41 = vrot.slane %v1158_v14, 5 }
  0xb9   : > { %v1155_v1 = vor.u32 %v1154_v38, %v1151_v37  ;;  %v10174_v38 = vcombine.low %v1113_v8, %v1123_v11  ;;  %v1147_v52 = vsel %vm10068_vm3, %v1142_v13, %v10153_v9  ;;  %v1214_v9 = vrot.slane %v1213_v50, 4 }
  0xba   : > { %v1240_v11 = vshll.u32 %v10198_v55, 16 }
  0xbb   : > { %v1156_v24 = vrot.slane %v1155_v1, 4  ;;  %v10209_v1 = vld [vmem:[%s9942_s30 + $0x70] sm:$0xf] }
  0xbc   : > { %v10242_v44 = vrot.slane %v1240_v11, 5 }
  0xbd   : > { %8571 = vmatmul.mubr.msk.bf16.gmra.mrb[20].mxu0 %vm400_vm0, %v9971_v15  ;;  %v1162_v15 = vshrl.u32 %v10081_v2, 16 }
  0xbe   : > { %8574 = vmatprep.mubr.msk.bf16.mxu0 %vm400_vm0, %v9977_v16  ;;  %v1010_v16 = vld [vmem:[%s9942_s30 + $0x3c] sm:$0xf] }
  0xbf   : > { %v1173_v34 = vshrl.u32 %v1010_v16, 16  ;;  %v1176_v35 = vshll.u32 %v1010_v16, 16 }
  0xc1   : > { %v1175_v49 = vrot.slane %v1173_v34, 4  ;;  %v1178_v57 = vrot.slane %v1176_v35, 5  ;;  %v10172_v34 = vrot.slane %v1192_v10, 5  ;;  %v1218_v10 = vrot.slane %v1216_v51, 5 }
  0xc3   : > { %v1179_v14 = vor.u32 %v1178_v57, %v1175_v49  ;;  %v1022_v49 = vld [vmem:[%s9942_s30 + $0x6c] sm:$0xf]  ;;  %v10204_v57 = vld [vmem:[%s11979_s1 + $0x38] sm:$0xff]  }
  0xc4   : > { %v1272_v13 = vshll.u32 %v1022_v49, 16 }
  0xc5   : > { %8575 = vmatmul.mubr.msk.bf16.gmra.mrb[24].mxu0 %vm400_vm0, %v9980_v17  ;;  %v1164_v17 = vrot.slane %v1162_v15, 4  ;;  %v1016_v15 = vld [vmem:[%s9942_s30 + $0x54] sm:$0xf]  ;;  %v10185_v43 = vrot.slane %v1179_v14, 4  ;;  %v1278_v14 = vshll.u32 %v10209_v1, 16 }
  0xc6   : > { %8578 = vmatprep.mubr.msk.bf16.mxu0 %vm400_vm0, %v9987_v18  ;;  %v1013_v18 = vld [vmem:[%s9942_s30 + $0x48] sm:$0xf]  ;;  %v1221_v35 = vshrl.u32 %v1016_v15, 16  ;;  %v1224_v37 = vshll.u32 %v1016_v15, 16  ;;  %v1282_v15 = vshrl.u32 %v10209_v1, 16  ;;  %v1274_v50 = vrot.slane %v1272_v13, 5 }
  0xc7   : > { %v1197_v59 = vshrl.u32 %v1013_v18, 16  ;;  %v1200_v60 = vshll.u32 %v1013_v18, 16  ;;  %v1165_v4 = vor.u32 %v1164_v17, %v10121_v41  ;;  %v1137_v17 = vsel %vm10068_vm3, %v1132_v12, %v10114_v32  ;;  %v10183_v18 = vld [vmem:[%s9942_s30 + $0x64] sm:$0xf] }
  0xc8   : > { %v1161_v32 = vsel %vm10068_vm3, %v1156_v24, %v10121_v41  ;;  %v1254_v62 = vshll.u32 %v10183_v18, 16  ;;  %v1258_v63 = vshrl.u32 %v10183_v18, 16  ;;  %v1223_v41 = vrot.slane %v1221_v35, 4  ;;  %v10230_v35 = vld [vmem:[%s9942_s30 + $0x68] sm:$0x1] }
  0xc9   : > { %v1199_v16 = vrot.slane %v1197_v59, 4  ;;  %v1202_v19 = vrot.slane %v1200_v60, 5  ;;  %v1166_v25 = vrot.slane %v1165_v4, 4  ;;  %v1245_v59 = vshrl.u32 %v1019_v45, 16 }
  0xca   : > { %v1248_v60 = vshll.u32 %v1019_v45, 16  ;;  %v1226_v4 = vrot.slane %v1224_v37, 5  ;;  %v1269_v12 = vshrl.u32 %v1022_v49, 16  ;;  %v1260_v0 = vrot.slane %v1258_v63, 4  ;;  %v1025_v45 = vld [vmem:[%s9942_s30 + $0x78] sm:$0xf] }
  0xcb   : > { %v1203_v47 = vor.u32 %v1202_v19, %v1199_v16  ;;  %v1247_v16 = vrot.slane %v1245_v59, 4  ;;  %v10222_v19 = vrot.slane %v1254_v62, 5  ;;  %v10224_v24 = vcombine.low %v1137_v17, %v1147_v52 }
  0xcc   : > { %v1185_v37 = vsel %vm10068_vm3, %v10185_v43, %v10143_v5  ;;  %v10245_v51 = vrot.slane %v1278_v14, 5  ;;  %v1284_v52 = vrot.slane %v1282_v15, 4  ;;  %v1219_v5 = vsel %vm10068_vm3, %v1214_v9, %v1218_v10  ;;  %v1028_v9 = vld [vmem:[%s9942_s30 + $0x84] sm:$0xf]  ;;  %v10271_v14 = vld [vmem:[%s9942_s30 + $0x80] sm:$0x1] }
  0xcd   : > { %8579 = vmatmul.mubr.msk.bf16.gmra.mrb[28].mxu0 %vm400_vm0, %v9777_v53  ;;  %v1171_v53 = vsel %vm10068_vm3, %v1166_v25, %v1170_v26  ;;  %v1204_v8 = vrot.slane %v1203_v47, 4  ;;  %v1227_v26 = vor.u32 %v1226_v4, %v1223_v41  ;;  %v1271_v47 = vrot.slane %v1269_v12, 4  ;;  %12021 = vst [vmem:[#allocation5_spill] sm:$0xff] %v10271_v14 }
  0xce   : > { %8584 = vmatprep.mubr.msk.bf16.mxu0 %vm400_vm0, %v7567_v42  ;;  %v1230_v42 = vshll.u32 %v10164_v22, 16  ;;  %v10226_v25 = vcombine.low %v1161_v32, %v1171_v53  ;;  %v10248_v32 = vld [vmem:[%s9942_s30 + $0x7c] sm:$0xf]  ;;  %v1264_v53 = vshll.u32 %v10230_v35, 16  ;;  %v1293_v59 = vshrl.u32 %v1025_v45, 16 }
  0xcf   : > { %v1209_v17 = vsel %vm10068_vm3, %v1204_v8, %v10161_v20  ;;  %12019 = vst [vmem:[#allocation3_spill] sm:$0xff] %v10248_v32  ;;  %v10255_v20 = vld [vmem:[%s9942_s30 + $0x74] sm:$0x1]  ;;  %v1302_v62 = vshll.u32 %v10248_v32, 16  ;;  %v1306_v63 = vshrl.u32 %v10248_v32, 16  ;;  %v1275_v4 = vor.u32 %v1274_v50, %v1271_v47 }
  0xd0   : > { %v10213_v6 = vrot.slane %v1230_v42, 5  ;;  %v1195_v42 = vsel %vm10068_vm3, %v1190_v54, %v10172_v34  ;;  %v1261_v34 = vor.u32 %v1260_v0, %v10222_v19  ;;  %12020 = vst [vmem:[#allocation4_spill] sm:$0xff] %v10255_v20  ;;  %v1228_v54 = vrot.slane %v1227_v26, 4  ;;  %v10280_v26 = vld [vmem:[%s9942_s30 + $0x88] sm:$0xf] }
  0xd1   : > { %v10263_v41 = vcombine.low %v1185_v37, %v1195_v42  ;;  %v1288_v8 = vshll.u32 %v10255_v20, 16  ;;  %v10268_v10 = vcombine.low %v1209_v17, %v1219_v5  ;;  %v1266_v13 = vrot.slane %v1264_v53, 5  ;;  %12022 = vst [vmem:[#allocation6_spill] sm:$0xff] %v10280_v26  ;;  %v10286_v47 = vld [vmem:[%s9942_s30 + $0x94] sm:$0xf] }
  0xd2   : > { %v1237_v27 = vor.u32 %v1236_v7, %v10213_v6  ;;  %v1285_v7 = vor.u32 %v1284_v52, %v10245_v51  ;;  %v1262_v12 = vrot.slane %v1261_v34, 4  ;;  %v1233_v15 = vsel %vm10068_vm3, %v1228_v54, %v10213_v6  ;;  %12023 = vst [vmem:[#allocation7_spill] sm:$0xff] %v10286_v47 }
  0xd3   : > { %v10283_v37 = vrot.slane %v1302_v62, 5  ;;  %v1308_v42 = vrot.slane %v1306_v63, 4  ;;  %v1317_v17 = vshrl.u32 %v1028_v9, 16  ;;  %v1276_v50 = vrot.slane %v1275_v4, 4 }
  0xd4   : > { %v1238_v49 = vrot.slane %v1237_v27, 4  ;;  %v1031_v27 = vld [vmem:[%s9942_s30 + $0x90] sm:$0xf]  ;;  %v1286_v52 = vrot.slane %v1285_v7, 4  ;;  %v1290_v5 = vrot.slane %v1288_v8, 5  ;;  %v1312_v6 = vshll.u32 %v10271_v14, 16 }
  0xd5   : > { %8585 = vmatmul.mubr.msk.bf16.vlgmr.msra.gmra.mrb[0].mxu0 %vm400_vm0, %v10170_v33  ;;  %v1341_v34 = vshrl.u32 %v1031_v27, 16  ;;  %v1344_v53 = vshll.u32 %v1031_v27, 16  ;;  %v1309_v63 = vor.u32 %v1308_v42, %v10283_v37  ;;  %v1319_v4 = vrot.slane %v1317_v17, 4  ;;  %v10318_v17 = vld [vmem:[%s9942_s30 + $0x98] sm:$0x1] }
  0xd6   : > { %8617 = vmatpush3.bf16.msra.mxu0 %v10018_v21  ;;  %8588 = vmatprep.mubr.msk.bf16.mxu0 %vm400_vm0, %v10174_v38  ;;  %v1250_v21 = vrot.slane %v1248_v60, 5  ;;  %v1296_v60 = vshll.u32 %v1025_v45, 16  ;;  %v1320_v45 = vshll.u32 %v1028_v9, 16  ;;  %v1291_v8 = vsel %vm10068_vm3, %v1286_v52, %v1290_v5  ;;  %12025 = vst [vmem:[#allocation9_spill] sm:$0xff] %v10318_v17 }
  0xd7   : > { %8650 = vmatprep.subr.bf16.mxu0 %v10204_v57  ;;  %v1314_v9 = vrot.slane %v1312_v6, 5  ;;  %v1310_v5 = vrot.slane %v1309_v63, 4 }
  0xd8   : > { %v1251_v43 = vor.u32 %v1250_v21, %v1247_v16  ;;  %v1243_v16 = vsel %vm10068_vm3, %v1238_v49, %v10242_v44  ;;  %v1295_v21 = vrot.slane %v1293_v59, 4  ;;  %v1298_v0 = vrot.slane %v1296_v60, 5 }
  0xd9   : > { %v1330_v44 = vshrl.u32 %v10280_v26, 16  ;;  %v1267_v49 = vsel %vm10068_vm3, %v1262_v12, %v1266_v13  ;;  %v1350_v59 = vshll.u32 %v10286_v47, 16  ;;  %v1354_v60 = vshrl.u32 %v10286_v47, 16 }
  0xda   : > { %v1252_v11 = vrot.slane %v1251_v43, 4  ;;  %v1326_v43 = vshll.u32 %v10280_v26, 16  ;;  %v1299_v62 = vor.u32 %v1298_v0, %v1295_v21  ;;  %v1322_v7 = vrot.slane %v1320_v45, 5 }
  0xdb   : > { %v1332_v13 = vrot.slane %v1330_v44, 4  ;;  %v1343_v21 = vrot.slane %v1341_v34, 4  ;;  %v1346_v0 = vrot.slane %v1344_v53, 5  ;;  %v10313_v27 = vcombine.low %v1233_v15, %v1243_v16  ;;  %v10325_v44 = vld [vmem:[%s9942_s30 + $0xa0] sm:$0xf] }
  0xdc   : > { %v1257_v54 = vsel %vm10068_vm3, %v1252_v11, %v10222_v19  ;;  %v1281_v19 = vsel %vm10068_vm3, %v1276_v50, %v10245_v51  ;;  %v10309_v11 = vld [vmem:[%s9942_s30 + $0x8c] sm:$0x1]  ;;  %v10311_v12 = vrot.slane %v1326_v43, 5  ;;  %v10320_v51 = vrot.slane %v1350_v59, 5  ;;  %v1034_v50 = vld [vmem:[%s9942_s30 + $0x9c] sm:$0xf] }
  0xdd   : > { %8589 = vmatmul.mubr.msk.bf16.gmra.mrb[4].mxu0 %vm400_vm0, %v10224_v24  ;;  %12024 = vst [vmem:[#allocation8_spill] sm:$0xff] %v10309_v11  ;;  %v10315_v42 = vcombine.low %v1257_v54, %v1267_v49  ;;  %v1356_v45 = vrot.slane %v1354_v60, 4  ;;  %v1300_v52 = vrot.slane %v1299_v62, 4  ;;  %v1323_v6 = vor.u32 %v1322_v7, %v1319_v4  ;;  %12026 = vst [vmem:[#allocation10_spill] sm:$0xff] %v10325_v44  ;;  %v1037_v49 = vld [vmem:[%s9942_s30 + $0xa8] sm:$0xf] }
  0xde   : > { %8592 = vmatprep.mubr.msk.bf16.mxu0 %vm400_vm0, %v10226_v25  ;;  %v1336_v43 = vshll.u32 %v10309_v11, 16  ;;  %v10327_v34 = vcombine.low %v1281_v19, %v1291_v8  ;;  %v1333_v15 = vor.u32 %v1332_v13, %v10311_v12  ;;  %v1347_v16 = vor.u32 %v1346_v0, %v1343_v21  ;;  %v10333_v59 = vld [vmem:[%s9942_s30 + $0xac] sm:$0xf] }
  0xdf   : > { %v1360_v53 = vshll.u32 %v10318_v17, 16  ;;  %v1365_v54 = vshrl.u32 %v1034_v50, 16  ;;  %12027 = vst [vmem:[#allocation11_spill] sm:$0xff] %v10333_v59  ;;  %v1357_v60 = vor.u32 %v1356_v45, %v10320_v51  ;;  %v1368_v62 = vshll.u32 %v1034_v50, 16 }
  0xe0   : > { %v1374_v63 = vshll.u32 %v10325_v44, 16  ;;  %v1378_v4 = vshrl.u32 %v10325_v44, 16  ;;  %v1305_v7 = vsel %vm10068_vm3, %v1300_v52, %v10283_v37  ;;  %v1315_v19 = vsel %vm10068_vm3, %v1310_v5, %v1314_v9  ;;  %v10350_v37 = vld [vmem:[%s9942_s30 + $0xa4] sm:$0x1] }
  0xe1   : > { %v1324_v8 = vrot.slane %v1323_v6, 4  ;;  %v1338_v13 = vrot.slane %v1336_v43, 5  ;;  %v1389_v21 = vshrl.u32 %v1037_v49, 16  ;;  %v1392_v0 = vshll.u32 %v1037_v49, 16  ;;  %12028 = vst [vmem:[#allocation12_spill] sm:$0xff] %v10350_v37 }
  0xe2   : > { %v1398_v45 = vshll.u32 %v10333_v59, 16  ;;  %v1402_v50 = vshrl.u32 %v10333_v59, 16  ;;  %v1334_v44 = vrot.slane %v1333_v15, 4  ;;  %v1348_v17 = vrot.slane %v1347_v16, 4  ;;  %v1040_v43 = vld [vmem:[%s9942_s30 + $0xb4] sm:$0xf] }
  0xe3   : > { %v1362_v11 = vrot.slane %v1360_v53, 5  ;;  %v1367_v47 = vrot.slane %v1365_v54, 4  ;;  %v1358_v26 = vrot.slane %v1357_v60, 4  ;;  %v1370_v52 = vrot.slane %v1368_v62, 5  ;;  %v10356_v59 = vld [vmem:[%s9942_s30 + $0xb8] sm:$0xf] }
  0xe4   : > { %v1376_v9 = vrot.slane %v1374_v63, 5  ;;  %v1380_v5 = vrot.slane %v1378_v4, 4  ;;  %v10352_v6 = vcombine.low %v1305_v7, %v1315_v19  ;;  %v1391_v49 = vrot.slane %v1389_v21, 4  ;;  %12029 = vst [vmem:[#allocation13_spill] sm:$0xff] %v10356_v59  ;;  %v10365_v54 = vld [vmem:[%s9942_s30 + $0xb0] sm:$0x1] }
  0xe5   : > { %8593 = vmatmul.mubr.msk.bf16.gmra.mrb[8].mxu0 %vm400_vm0, %v10263_v41  ;;  %v1394_v14 = vrot.slane %v1392_v0, 5  ;;  %v1400_v20 = vrot.slane %v1398_v45, 5  ;;  %v1404_v32 = vrot.slane %v1402_v50, 4  ;;  %v1329_v15 = vsel %vm10068_vm3, %v1324_v8, %v10311_v12 }
  0xe6   : > { %8596 = vmatprep.mubr.msk.bf16.mxu0 %vm400_vm0, %v10268_v10  ;;  %v1339_v16 = vsel %vm10068_vm3, %v1334_v44, %v1338_v13  ;;  %v1384_v53 = vshll.u32 %v10350_v37, 16  ;;  %v1353_v60 = vsel %vm10068_vm3, %v1348_v17, %v10320_v51  ;;  %v1363_v62 = vsel %vm10068_vm3, %v1358_v26, %v1362_v11 }
  0xe7   : > { %v1371_v63 = vor.u32 %v1370_v52, %v1367_v47  ;;  %v1381_v4 = vor.u32 %v1380_v5, %v1376_v9  ;;  %v1413_v12 = vshrl.u32 %v1040_v43, 16  ;;  %v1416_v44 = vshll.u32 %v1040_v43, 16 }
  0xe8   : > { %v1422_v7 = vshll.u32 %v10356_v59, 16  ;;  %v1426_v19 = vshrl.u32 %v10356_v59, 16  ;;  %v1395_v8 = vor.u32 %v1394_v14, %v1391_v49  ;;  %v1405_v13 = vor.u32 %v1404_v32, %v1400_v20  ;;  %v10384_v59 = vld [vmem:[%s9942_s30 + $0xbc] sm:$0x1] }
  0xe9   : > { %v1408_v21 = vshll.u32 %v10365_v54, 16  ;;  %v10379_v17 = vcombine.low %v1329_v15, %v1339_v16  ;;  %v10381_v51 = vcombine.low %v1353_v60, %v1363_v62  ;;  %v1372_v26 = vrot.slane %v1371_v63, 4 }
  0xea   : > { %v1382_v47 = vrot.slane %v1381_v4, 4  ;;  %v1386_v11 = vrot.slane %v1384_v53, 5  ;;  %v1415_v0 = vrot.slane %v1413_v12, 4  ;;  %v1418_v45 = vrot.slane %v1416_v44, 5 }
  0xeb   : > { %v1424_v50 = vrot.slane %v1422_v7, 5  ;;  %v1428_v52 = vrot.slane %v1426_v19, 4  ;;  %v1396_v5 = vrot.slane %v1395_v8, 4  ;;  %v1406_v43 = vrot.slane %v1405_v13, 4  ;;  %v9780_v7 = vld [vmem:[%s11979_s1 + $0x10] sm:$0xff]  }
  0xec   : > { %v1410_v37 = vrot.slane %v1408_v21, 5  ;;  %v1377_v32 = vsel %vm10068_vm3, %v1372_v26, %v1376_v9  ;;  %v1387_v14 = vsel %vm10068_vm3, %v1382_v47, %v1386_v11  ;;  %v1419_v49 = vor.u32 %v1418_v45, %v1415_v0  ;;  %v10448_v45 = vld [vmem:[%s9942_s30 + $0xc8] sm:$0x1] }
  0xed   : > { %8597 = vmatmul.mubr.msk.bf16.gmra.mrb[12].mxu0 %vm400_vm0, %v10313_v27  ;;  %v1429_v15 = vor.u32 %v1428_v52, %v1424_v50  ;;  %v1432_v16 = vshll.u32 %v10384_v59, 16  ;;  %v1401_v53 = vsel %vm10068_vm3, %v1396_v5, %v1400_v20  ;;  %v10399_v62 = vcombine.low %v1377_v32, %v1387_v14 }
  0xee   : > { %8600 = vmatprep.mubr.msk.bf16.mxu0 %vm400_vm0, %v10315_v42  ;;  %v1411_v60 = vsel %vm10068_vm3, %v1406_v43, %v1410_v37  ;;  %v1420_v9 = vrot.slane %v1419_v49, 4  ;;  %v1754_v5 = vshll.u32 %v10448_v45, 16 }
  0xef   : > { %v10401_v63 = vcombine.low %v1401_v53, %v1411_v60  ;;  %v1430_v4 = vrot.slane %v1429_v15, 4  ;;  %v1434_v12 = vrot.slane %v1432_v16, 5  ;;  %v10469_v53 = vld [vmem:[%s11979_s1 + $0x28] sm:$0xff]  }
  0xf0   : > { %v1425_v44 = vsel %vm10068_vm3, %v1420_v9, %v1424_v50  ;;  %v1756_v14 = vrot.slane %v1754_v5, 5  ;;  %v10499_v9 = vld [vmem:[%s9942_s30 + $0xd4] sm:$0x1] }
  0xf1   : > { %v1435_v20 = vsel %vm10068_vm3, %v1430_v4, %v1434_v12  ;;  %v1986_v4 = vshll.u32 %v10499_v9, 16  ;;  %v2269_v12 = vrot.slane %v10031_v23, 5 }
  0xf2   : > { %v10411_v37 = vcombine.low %v1425_v44, %v1435_v20  ;;  %v2198_v44 = vld [vmem:[%s9942_s30] sm:$0xe] }
  0xf5   : > { %8601 = vmatmul.mubr.msk.bf16.gmra.mrb[16].mxu0 %vm400_vm0, %v10327_v34 }
  0xf6   : > { %8604 = vmatprep.mubr.msk.bf16.mxu0 %vm400_vm0, %v10352_v6 }
  0xfd   : > { %8605 = vmatmul.mubr.msk.bf16.gmra.mrb[20].mxu0 %vm400_vm0, %v10379_v17 }
  0xfe   : > { %8608 = vmatprep.mubr.msk.bf16.mxu0 %vm400_vm0, %v10381_v51 }
 0x105   : > { %8609 = vmatmul.mubr.msk.bf16.gmra.mrb[24].mxu0 %vm400_vm0, %v10399_v62 }
 0x106   : > { %8612 = vmatprep.mubr.msk.bf16.mxu0 %vm400_vm0, %v10401_v63 }
 0x10d   : > { %8613 = vmatmul.mubr.msk.bf16.gmra.mrb[28].mxu0 %vm400_vm0, %v10411_v37 }
 0x10e   : > { %8618 = vmatprep.mubr.msk.bf16.mxu0 %vm400_vm0, %v10170_v33  ;;  %v1043_v33 = vld [vmem:[%s9942_s30 + $0xc0] sm:$0xf] }
 0x10f   : > { %v1735_v19 = vshrl.u32 %v1043_v33, 16  ;;  %v1738_v8 = vshll.u32 %v1043_v33, 16  ;;  %v1988_v33 = vrot.slane %v1986_v4, 5 }
 0x111   : > { %v1737_v26 = vrot.slane %v1735_v19, 4  ;;  %v1740_v47 = vrot.slane %v1738_v8, 5  ;;  %v7640_v19 = vrot.slane %v2198_v44, 9  ;;  %v2271_v8 = vrot.slane %v2269_v12, 4  ;;  %v2204_v44 = vld [vmem:[%s9942_s30 + $0x48] sm:$0xe] }
 0x113   : > { %v1741_v50 = vor.u32 %v1740_v47, %v1737_v26  ;;  %v2199_v47 = vld [vmem:[%s9942_s30 + $0xc] sm:$0xe] }
 0x115   : > { %8619 = vmatmul.mubr.msk.bf16.vlgmr.msra.gmra.mrb[0].mxu0 %vm400_vm0, %v10174_v38  ;;  %v1742_v43 = vrot.slane %v1741_v50, 4 }
 0x116   : > { %8651 = vmatpush3.bf16.msra.mxu0 %v10204_v57  ;;  %8622 = vmatprep.mubr.msk.bf16.mxu0 %vm400_vm0, %v10224_v24  ;;  %v10439_v57 = vld [vmem:[%s9942_s30 + $0xc4] sm:$0xf] }
 0x117   : > { %8684 = vmatprep.subr.bf16.mxu0 %v9780_v7  ;;  %v1744_v13 = vshll.u32 %v10439_v57, 16  ;;  %v1748_v21 = vshrl.u32 %v10439_v57, 16 }
 0x119   : > { %v1746_v11 = vrot.slane %v1744_v13, 5  ;;  %v1750_v0 = vrot.slane %v1748_v21, 4  ;;  %v2276_v21 = vrot.slane %v10037_v29, 5 }
 0x11b   : > { %v1751_v52 = vor.u32 %v1750_v0, %v1746_v11  ;;  %v1747_v49 = vsel %vm10068_vm3, %v1742_v43, %v1746_v11  ;;  %v2283_v11 = vrot.slane %v10050_v40, 5  ;;  %v2278_v5 = vrot.slane %v2276_v21, 4 }
 0x11c   : > { %v2279_v43 = vrot.slane %v10055_v48, 5 }
 0x11d   : > { %8623 = vmatmul.mubr.msk.bf16.gmra.mrb[4].mxu0 %vm400_vm0, %v10226_v25  ;;  %v1752_v32 = vrot.slane %v1751_v52, 4  ;;  %v7641_v52 = vrot.slane %v2199_v47, 9  ;;  %v2285_v29 = vrot.slane %v2283_v11, 4  ;;  %v2206_v47 = vld [vmem:[%s9942_s30 + $0x60] sm:$0xe] }
 0x11e   : > { %8626 = vmatprep.mubr.msk.bf16.mxu0 %vm400_vm0, %v10263_v41 }
 0x11f   : > { %v1757_v15 = vsel %vm10068_vm3, %v1752_v32, %v1756_v14  ;;  %v2286_v14 = vrot.slane %v10084_v3, 5  ;;  %v2277_v40 = vsel %vm10509_vm6, %v7641_v52, %v2276_v21  ;;  %v2297_v3 = vrot.slane %v10081_v2, 5 }
 0x120   : > { %v7602_v16 = vcombine.low %v1747_v49, %v1757_v15  ;;  %v2280_v49 = vsel %vm10509_vm6, %v2278_v5, %v2279_v43  ;;  %v2290_v15 = vrot.slane %v10074_v61, 5  ;;  %v2318_v21 = vrot.slane %v10164_v22, 5 }
 0x121   : > { %v2287_v48 = vsel %vm10509_vm6, %v2285_v29, %v2286_v14  ;;  %v2321_v22 = vrot.slane %v10198_v55, 5  ;;  %v7648_v52 = vrot.slane %v2206_v47, 9  ;;  %v2328_v43 = vrot.slane %v10230_v35, 5  ;;  %v2207_v14 = vld [vmem:[%s9942_s30 + $0x6c] sm:$0xe] }
 0x122   : > { %v2332_v29 = vrot.slane %v10209_v1, 5 }
 0x125   : > { %8627 = vmatmul.mubr.msk.bf16.gmra.mrb[8].mxu0 %vm400_vm0, %v10268_v10 }
 0x126   : > { %8630 = vmatprep.mubr.msk.bf16.mxu0 %vm400_vm0, %v10313_v27 }
 0x12d   : > { %8631 = vmatmul.mubr.msk.bf16.gmra.mrb[12].mxu0 %vm400_vm0, %v10315_v42 }
 0x12e   : > { %8634 = vmatprep.mubr.msk.bf16.mxu0 %vm400_vm0, %v10327_v34 }
 0x135   : > { %8635 = vmatmul.mubr.msk.bf16.gmra.mrb[16].mxu0 %vm400_vm0, %v10352_v6 }
 0x136   : > { %8638 = vmatprep.mubr.msk.bf16.mxu0 %vm400_vm0, %v10379_v17 }
 0x13d   : > { %8639 = vmatmul.mubr.msk.bf16.gmra.mrb[20].mxu0 %vm400_vm0, %v10381_v51 }
 0x13e   : > { %8642 = vmatprep.mubr.msk.bf16.mxu0 %vm400_vm0, %v10399_v62 }
 0x145   : > { %8643 = vmatmul.mubr.msk.bf16.gmra.mrb[24].mxu0 %vm400_vm0, %v10401_v63 }
 0x146   : > { %8646 = vmatprep.mubr.msk.bf16.mxu0 %vm400_vm0, %v10411_v37 }
 0x14d   : > { %8647 = vmatmul.mubr.msk.bf16.gmra.mrb[28].mxu0 %vm400_vm0, %v7602_v16 }
 0x14e   : > { %8652 = vmatprep.mubr.msk.bf16.mxu0 %vm400_vm0, %v10174_v38  ;;  %v1046_v38 = vld [vmem:[%s9942_s30 + $0xcc] sm:$0xf] }
 0x155   : > { %8653 = vmatmul.mubr.msk.bf16.vlgmr.msra.gmra.mrb[0].mxu0 %vm400_vm0, %v10224_v24  ;;  %v10490_v24 = vld [vmem:[%s9942_s30 + $0xd0] sm:$0xf] }
 0x156   : > { %8685 = vmatpush3.bf16.msra.mxu0 %v9780_v7  ;;  %8656 = vmatprep.mubr.msk.bf16.mxu0 %vm400_vm0, %v10226_v25  ;;  %v1967_v25 = vshrl.u32 %v1046_v38, 16 }
 0x157   : > { %8718 = vmatprep.subr.bf16.mxu0 %v10469_v53 }
 0x15d   : > { %8657 = vmatmul.mubr.msk.bf16.gmra.mrb[4].mxu0 %vm400_vm0, %v10263_v41  ;;  %v1970_v41 = vshll.u32 %v1046_v38, 16  ;;  %v2201_v38 = vld [vmem:[%s9942_s30 + $0x24] sm:$0xe] }
 0x15e   : > { %8660 = vmatprep.mubr.msk.bf16.mxu0 %vm400_vm0, %v10268_v10  ;;  %v1976_v10 = vshll.u32 %v10490_v24, 16 }
 0x160   : > { %v1978_v60 = vrot.slane %v1976_v10, 5 }
 0x165   : > { %8661 = vmatmul.mubr.msk.bf16.gmra.mrb[8].mxu0 %vm400_vm0, %v10313_v27  ;;  %v1980_v27 = vshrl.u32 %v10490_v24, 16 }
 0x166   : > { %8664 = vmatprep.mubr.msk.bf16.mxu0 %vm400_vm0, %v10315_v42  ;;  %v1969_v42 = vrot.slane %v1967_v25, 4  ;;  %v2202_v25 = vld [vmem:[%s9942_s30 + $0x30] sm:$0xe] }
 0x167   : > { %v7644_v61 = vrot.slane %v2202_v25, 9  ;;  %v12033_v25 = vld [vmem:[#allocation4_spill] sm:$0xff] }
 0x168   : > { %v2335_v1 = vrot.slane %v12033_v25, 5  ;;  %v12042_v25 = vld [vmem:[#allocation13_spill] sm:$0xff] }
 0x16d   : > { %8665 = vmatmul.mubr.msk.bf16.gmra.mrb[12].mxu0 %vm400_vm0, %v10327_v34  ;;  %v1972_v34 = vrot.slane %v1970_v41, 5  ;;  %v10544_v41 = vcombine.low %v2277_v40, %v2280_v49  ;;  %v12032_v40 = vld [vmem:[#allocation3_spill] sm:$0xff] }
 0x16e   : > { %8668 = vmatprep.mubr.msk.bf16.mxu0 %vm400_vm0, %v10352_v6  ;;  %v1982_v6 = vrot.slane %v1980_v27, 4  ;;  %v7643_v27 = vrot.slane %v2201_v38, 9  ;;  %v2339_v49 = vrot.slane %v12032_v40, 5  ;;  %v7649_v38 = vrot.slane %v2207_v14, 9 }
 0x170   : > { %v2291_v2 = vsel %vm10509_vm6, %v7643_v27, %v2290_v15 }
 0x175   : > { %8669 = vmatmul.mubr.msk.bf16.gmra.mrb[16].mxu0 %vm400_vm0, %v10379_v17  ;;  %v1973_v17 = vor.u32 %v1972_v34, %v1969_v42  ;;  %v2292_v42 = vrot.slane %v2290_v15, 4  ;;  %v2293_v34 = vrot.slane %v10112_v31, 5  ;;  %v2208_v15 = vld [vmem:[%s9942_s30 + $0x78] sm:$0xe] }
 0x176   : > { %8672 = vmatprep.mubr.msk.bf16.mxu0 %vm400_vm0, %v10381_v51  ;;  %v1983_v51 = vor.u32 %v1982_v6, %v1978_v60  ;;  %v2300_v6 = vrot.slane %v10119_v36, 5  ;;  %v2304_v36 = vrot.slane %v10107_v30, 5  ;;  %v7650_v27 = vrot.slane %v2208_v15, 9 }
 0x177   : > { %v1974_v20 = vrot.slane %v1973_v17, 4  ;;  %v10553_v17 = vld [vmem:[%s11979_s1 + $0x40] sm:$0xff]   ;;  %v2294_v31 = vsel %vm10509_vm6, %v2292_v42, %v2293_v34  ;;  %v2341_v42 = vrot.slane %v2339_v49, 4  ;;  %v12034_v34 = vld [vmem:[#allocation5_spill] sm:$0xff]  ;;  %v2370_v15 = vrot.slane %v10365_v54, 5 }
 0x178   : > { %v1984_v7 = vrot.slane %v1983_v51, 4  ;;  %v2298_v51 = vsel %vm10509_vm6, %v7644_v61, %v2297_v3  ;;  %v2306_v30 = vrot.slane %v2304_v36, 4  ;;  %v2342_v61 = vrot.slane %v12034_v34, 5  ;;  %v2213_v34 = vld [vmem:[%s9942_s30 + $0xb4] sm:$0xe] }
 0x179   : > { %v1979_v23 = vsel %vm10068_vm3, %v1974_v20, %v1978_v60  ;;  %v2299_v60 = vrot.slane %v2297_v3, 4  ;;  %v10573_v20 = vcombine.low %v2291_v2, %v2294_v31  ;;  %v2334_v3 = vrot.slane %v2332_v29, 4  ;;  %v12035_v2 = vld [vmem:[#allocation6_spill] sm:$0xff] }
 0x17a   : > { %v1989_v13 = vsel %vm10068_vm3, %v1984_v7, %v1988_v33  ;;  %v2346_v31 = vrot.slane %v12035_v2, 5  ;;  %v2377_v2 = vrot.slane %v10384_v59, 5  ;;  %v2682_v59 = vrot.slane %v10439_v57, 5 }
 0x17b   : > { %v7622_v0 = vcombine.low %v1979_v23, %v1989_v13  ;;  %v2301_v4 = vsel %vm10509_vm6, %v2299_v60, %v2300_v6  ;;  %v2314_v23 = vrot.slane %v10168_v28, 5  ;;  %v2333_v60 = vsel %vm10509_vm6, %v7649_v38, %v2332_v29 }
 0x17c   : > { %v10575_v7 = vcombine.low %v2298_v51, %v2301_v4  ;;  %v2336_v6 = vsel %vm10509_vm6, %v2334_v3, %v2335_v1  ;;  %v2343_v51 = vsel %vm10509_vm6, %v2341_v42, %v2342_v61  ;;  %v2209_v4 = vld [vmem:[%s9942_s30 + $0x84] sm:$0xe]  ;;  %v2374_v1 = vrot.slane %v12042_v25, 5  ;;  %v3721_v25 = vld [vmem:[#allocation2] sm:$0xf] }
 0x17d   : > { %8673 = vmatmul.mubr.msk.bf16.gmra.mrb[20].mxu0 %vm400_vm0, %v10399_v62  ;;  %v2272_v62 = vrot.slane %v10047_v39, 5  ;;  %v2270_v39 = vsel %vm10509_vm6, %v7640_v19, %v2269_v12  ;;  %v2203_v12 = vld [vmem:[%s9942_s30 + $0x3c] sm:$0xe]  ;;  %v2307_v19 = vrot.slane %v10138_v56, 5  ;;  %v2900_v57 = vrot.slane %v10490_v24, 5  ;;  %v9783_v24 = vld [vmem:[%s11981_s3 + $0xc0] sm:$0xff]  }
 0x17e   : > { %8676 = vmatprep.mubr.msk.bf16.mxu0 %vm400_vm0, %v10401_v63  ;;  %v7645_v33 = vrot.slane %v2203_v12, 9  ;;  %v12036_v12 = vld [vmem:[#allocation7_spill] sm:$0xff]  ;;  %9218 = vmatprep.subr.bf16.mxu1 %v9783_v24  ;;  %v9862_v63 = vld [vmem:[%s11981_s3 + $0x168] sm:$0xff]  }
 0x17f   : > { %v2273_v26 = vsel %vm10509_vm6, %v2271_v8, %v2272_v62  ;;  %v7646_v8 = vrot.slane %v2204_v44, 9  ;;  %v2308_v13 = vsel %vm10509_vm6, %v2306_v30, %v2307_v19  ;;  %v2210_v44 = vld [vmem:[%s9942_s30 + $0x90] sm:$0xe]  ;;  %v7651_v19 = vrot.slane %v2209_v4, 9  ;;  %9226 = vmatpush3.bf16.msra.mxu1 %v9783_v24 }
 0x180   : > { %v7658_v50 = vcombine.low %v2270_v39, %v2273_v26  ;;  %v2205_v39 = vld [vmem:[%s9942_s30 + $0x54] sm:$0xe]  ;;  %v2325_v26 = vrot.slane %v10183_v18, 5  ;;  %v2684_v4 = vrot.slane %v2682_v59, 4 }
 0x182   : > { %v2327_v5 = vrot.slane %v2325_v26, 4  ;;  %v2326_v55 = vsel %vm10509_vm6, %v7648_v52, %v2325_v26  ;;  %v12039_v26 = vld [vmem:[#allocation10_spill] sm:$0xff]  ;;  %v12040_v52 = vld [vmem:[#allocation11_spill] sm:$0xff] }
 0x183   : > { %v2360_v47 = vrot.slane %v12039_v26, 5 }
 0x184   : > { %v2329_v35 = vsel %vm10509_vm6, %v2327_v5, %v2328_v43  ;;  %v2367_v5 = vrot.slane %v12040_v52, 5  ;;  %v2212_v43 = vld [vmem:[%s9942_s30 + $0xa8] sm:$0xe] }
 0x185   : > { %8677 = vmatmul.mubr.msk.bf16.gmra.mrb[24].mxu0 %vm400_vm0, %v10411_v37  ;;  %v2200_v37 = vld [vmem:[%s9942_s30 + $0x18] sm:$0xe]  ;;  %v7654_v40 = vrot.slane %v2212_v43, 9 }
 0x186   : > { %8680 = vmatprep.mubr.msk.bf16.mxu0 %vm400_vm0, %v7602_v16  ;;  %v7642_v32 = vrot.slane %v2200_v37, 9 }
 0x188   : > { %v2284_v16 = vsel %vm10509_vm6, %v7642_v32, %v2283_v11 }
 0x189   : > { %v10546_v10 = vcombine.low %v2284_v16, %v2287_v48  ;;  %v10619_v48 = vcombine.low %v2326_v55, %v2329_v35  ;;  %v2362_v55 = vrot.slane %v2360_v47, 4  ;;  %v12041_v35 = vld [vmem:[#allocation12_spill] sm:$0xff] }
 0x18a   : > { %v2363_v14 = vrot.slane %v12041_v35, 5 }
 0x18c   : > { %v2364_v3 = vsel %vm10509_vm6, %v2362_v55, %v2363_v14  ;;  %v3616_v14 = vld [vmem:[#allocation2 + $0x18] sm:$0xf] }
 0x18d   : > { %8681 = vmatmul.mubr.msk.bf16.gmra.mrb[28].mxu0 %vm400_vm0, %v7622_v0  ;;  %v7647_v0 = vrot.slane %v2205_v39, 9 }
 0x18e   : > { %8686 = vmatprep.mubr.msk.bf16.mxu0 %vm400_vm0, %v7658_v50  ;;  %v2320_v50 = vrot.slane %v2318_v21, 4 }
 0x18f   : > { %v2319_v18 = vsel %vm10509_vm6, %v7647_v0, %v2318_v21  ;;  %v12038_v21 = vld [vmem:[#allocation9_spill] sm:$0xff] }
 0x190   : > { %v2322_v32 = vsel %vm10509_vm6, %v2320_v50, %v2321_v22  ;;  %v2211_v22 = vld [vmem:[%s9942_s30 + $0x9c] sm:$0xe] }
 0x191   : > { %v10617_v16 = vcombine.low %v2319_v18, %v2322_v32  ;;  %v7653_v29 = vrot.slane %v2211_v22, 9 }
 0x193   : > { %v2361_v38 = vsel %vm10509_vm6, %v7653_v29, %v2360_v47 }
 0x194   : > { %v7671_v54 = vcombine.low %v2361_v38, %v2364_v3 }
 0x195   : > { %8687 = vmatmul.mubr.msk.bf16.vlgmr.msra.gmra.mrb[0].mxu0 %vm400_vm0, %v10544_v41 }
 0x196   : > { %8719 = vmatpush3.bf16.msra.mxu0 %v10469_v53  ;;  %8690 = vmatprep.mubr.msk.bf16.mxu0 %vm400_vm0, %v10546_v10  ;;  %v2311_v53 = vrot.slane %v10131_v46, 5  ;;  %v2305_v46 = vsel %vm10509_vm6, %v7645_v33, %v2304_v36  ;;  %v2340_v36 = vsel %vm10509_vm6, %v7650_v27, %v2339_v49  ;;  %v10639_v33 = vcombine.low %v2333_v60, %v2336_v6 }
 0x197   : > { %8752 = vmatprep.subr.bf16.mxu0 %v10553_v17  ;;  %v10595_v11 = vcombine.low %v2305_v46, %v2308_v13  ;;  %v10641_v30 = vcombine.low %v2340_v36, %v2343_v51  ;;  %v7652_v46 = vrot.slane %v2210_v44, 9  ;;  %v2369_v49 = vrot.slane %v2367_v5, 4 }
 0x198   : > { %v2313_v62 = vrot.slane %v2311_v53, 4  ;;  %v2312_v56 = vsel %vm10509_vm6, %v7646_v8, %v2311_v53  ;;  %v2353_v53 = vrot.slane %v12036_v12, 5  ;;  %v2348_v8 = vrot.slane %v2346_v31, 4 }
 0x199   : > { %v2368_v27 = vsel %vm10509_vm6, %v7654_v40, %v2367_v5  ;;  %v2371_v42 = vsel %vm10509_vm6, %v2369_v49, %v2370_v15  ;;  %v7655_v60 = vrot.slane %v2213_v34, 9  ;;  %v2376_v6 = vrot.slane %v2374_v1, 4 }
 0x19a   : > { %v2315_v28 = vsel %vm10509_vm6, %v2313_v62, %v2314_v23  ;;  %v12037_v62 = vld [vmem:[#allocation8_spill] sm:$0xff]  ;;  %v2355_v13 = vrot.slane %v2353_v53, 4  ;;  %v2354_v0 = vsel %vm10509_vm6, %v7652_v46, %v2353_v53  ;;  %v7672_v61 = vcombine.low %v2368_v27, %v2371_v42 }
 0x19b   : > { %v10597_v37 = vcombine.low %v2312_v56, %v2315_v28  ;;  %v2349_v23 = vrot.slane %v12037_v62, 5  ;;  %v2356_v56 = vrot.slane %v12038_v21, 5  ;;  %v2347_v28 = vsel %vm10509_vm6, %v7651_v19, %v2346_v31  ;;  %v9789_v62 = vld [vmem:[%s11981_s3 + $0xf0] sm:$0xff]   ;;  %v10776_v46 = vld [vmem:[%s11981_s3] sm:$0xff]  }
 0x19c   : > { %v2375_v31 = vsel %vm10509_vm6, %v7655_v60, %v2374_v1  ;;  %v2378_v36 = vsel %vm10509_vm6, %v2376_v6, %v2377_v2  ;;  %v2685_v12 = vrot.slane %v10448_v45, 5  ;;  %v2215_v45 = vld [vmem:[%s9942_s30 + $0xcc] sm:$0xe] }
 0x19d   : > { %8691 = vmatmul.mubr.msk.bf16.gmra.mrb[4].mxu0 %vm400_vm0, %v10573_v20  ;;  %v2350_v39 = vsel %vm10509_vm6, %v2348_v8, %v2349_v23  ;;  %v2357_v50 = vsel %vm10509_vm6, %v2355_v13, %v2356_v56  ;;  %v7673_v51 = vcombine.low %v2375_v31, %v2378_v36  ;;  %v9788_v8 = vld [vmem:[%s11981_s3 + $0xe8] sm:$0xff]   ;;  %v9790_v23 = vld [vmem:[%s11981_s3 + $0xf8] sm:$0xff]   ;;  %v10782_v13 = vld [vmem:[%s11980_s2] ss:$0 sm:$0xff] }
 0x19e   : > { %8694 = vmatprep.mubr.msk.bf16.mxu0 %vm400_vm0, %v10575_v7  ;;  %v7669_v18 = vcombine.low %v2347_v28, %v2350_v39  ;;  %v7670_v32 = vcombine.low %v2354_v0, %v2357_v50  ;;  %v2686_v44 = vsel %vm10509_vm6, %v2684_v4, %v2685_v12  ;;  %v3607_v60 = vld [vmem:[#allocation2 + $0xc] sm:$0xf]  ;;  %v3620_v4 = vld [vmem:[#allocation2 + $0x20] sm:$0x1] }
 0x1a5   : > { %8695 = vmatmul.mubr.msk.bf16.gmra.mrb[8].mxu0 %vm400_vm0, %v10595_v11 }
 0x1a6   : > { %8698 = vmatprep.mubr.msk.bf16.mxu0 %vm400_vm0, %v10597_v37 }
 0x1ad   : > { %8699 = vmatmul.mubr.msk.bf16.gmra.mrb[12].mxu0 %vm400_vm0, %v10617_v16 }
 0x1ae   : > { %8702 = vmatprep.mubr.msk.bf16.mxu0 %vm400_vm0, %v10619_v48 }
 0x1b5   : > { %8703 = vmatmul.mubr.msk.bf16.gmra.mrb[16].mxu0 %vm400_vm0, %v10639_v33 }
 0x1b6   : > { %8706 = vmatprep.mubr.msk.bf16.mxu0 %vm400_vm0, %v10641_v30 }
 0x1bd   : > { %8707 = vmatmul.mubr.msk.bf16.gmra.mrb[20].mxu0 %vm400_vm0, %v7669_v18 }
 0x1be   : > { %8710 = vmatprep.mubr.msk.bf16.mxu0 %vm400_vm0, %v7670_v32 }
 0x1c5   : > { %8711 = vmatmul.mubr.msk.bf16.gmra.mrb[24].mxu0 %vm400_vm0, %v7671_v54 }
 0x1c6   : > { %8714 = vmatprep.mubr.msk.bf16.mxu0 %vm400_vm0, %v7672_v61 }
 0x1cd   : > { %8715 = vmatmul.mubr.msk.bf16.gmra.mrb[28].mxu0 %vm400_vm0, %v7673_v51 }
 0x1ce   : > { %8720 = vmatprep.mubr.msk.bf16.mxu0 %vm400_vm0, %v10544_v41  ;;  %v2214_v41 = vld [vmem:[%s9942_s30 + $0xc0] sm:$0xe]  ;;  %s266_s30 = scalar_lea.vmem %s11983_s5, %s8077_s27 }
 0x1d5   : > { %8721 = vmatmul.mubr.msk.bf16.vlgmr.msra.gmra.mrb[0].mxu0 %vm400_vm0, %v10546_v10 }
 0x1d6   : > { %8753 = vmatpush3.bf16.msra.mxu0 %v10553_v17  ;;  %8724 = vmatprep.mubr.msk.bf16.mxu0 %vm400_vm0, %v10573_v20  ;;  %v7691_v17 = vrot.slane %v2214_v41, 9 }
 0x1d7   : > { %8786 = vmatprep.subr.bf16.mxu0 %v9783_v24 }
 0x1d8   : > { %v2683_v53 = vsel %vm10509_vm6, %v7691_v17, %v2682_v59 }
 0x1d9   : > { %v7694_v19 = vcombine.low %v2683_v53, %v2686_v44 }
 0x1dd   : > { %8725 = vmatmul.mubr.msk.bf16.gmra.mrb[4].mxu0 %vm400_vm0, %v10575_v7 }
 0x1de   : > { %8728 = vmatprep.mubr.msk.bf16.mxu0 %vm400_vm0, %v10595_v11 }
 0x1e5   : > { %8729 = vmatmul.mubr.msk.bf16.gmra.mrb[8].mxu0 %vm400_vm0, %v10597_v37 }
 0x1e6   : > { %8732 = vmatprep.mubr.msk.bf16.mxu0 %vm400_vm0, %v10617_v16 }
 0x1ed   : > { %8733 = vmatmul.mubr.msk.bf16.gmra.mrb[12].mxu0 %vm400_vm0, %v10619_v48 }
 0x1ee   : > { %8736 = vmatprep.mubr.msk.bf16.mxu0 %vm400_vm0, %v10639_v33 }
 0x1f5   : > { %8737 = vmatmul.mubr.msk.bf16.gmra.mrb[16].mxu0 %vm400_vm0, %v10641_v30 }
 0x1f6   : > { %8740 = vmatprep.mubr.msk.bf16.mxu0 %vm400_vm0, %v7669_v18 }
 0x1fd   : > { %8741 = vmatmul.mubr.msk.bf16.gmra.mrb[20].mxu0 %vm400_vm0, %v7670_v32 }
 0x1fe   : > { %8744 = vmatprep.mubr.msk.bf16.mxu0 %vm400_vm0, %v7671_v54 }
 0x205   : > { %8745 = vmatmul.mubr.msk.bf16.gmra.mrb[24].mxu0 %vm400_vm0, %v7672_v61 }
 0x206   : > { %8748 = vmatprep.mubr.msk.bf16.mxu0 %vm400_vm0, %v7673_v51 }
 0x20d   : > { %8749 = vmatmul.mubr.msk.bf16.gmra.mrb[28].mxu0 %vm400_vm0, %v7694_v19 }
 0x20e   : > { %8754 = vmatprep.mubr.msk.bf16.mxu0 %vm400_vm0, %v10546_v10  ;;  %v7712_v10 = vrot.slane %v2215_v45, 9  ;;  %v3725_v45 = vld [vmem:[#allocation2 + $0x8] sm:$0x1] }
 0x215   : > { %8755 = vmatmul.mubr.msk.bf16.vlgmr.msra.gmra.mrb[0].mxu0 %vm400_vm0, %v10573_v20  ;;  %v2902_v20 = vrot.slane %v2900_v57, 4 }
 0x216   : > { %8758 = vmatprep.mubr.msk.bf16.mxu0 %vm400_vm0, %v10575_v7  ;;  %v2903_v7 = vrot.slane %v10499_v9, 5  ;;  %8787 = vmatpush3.bf16.msra.mxu0 %v9783_v24  ;;  %v9784_v9 = vld [vmem:[%s11981_s3 + $0xc8] sm:$0xff]   ;;  %v3613_v24 = vld [vmem:[#allocation2 + $0x14] sm:$0x1] }
 0x217   : > { %8788 = vmatprep.subr.bf16.mxu0 %v9784_v9  ;;  %9219 = vmatprep.subr.bf16.mxu1 %v9784_v9 }
 0x218   : > { %9227 = vmatpush3.bf16.msra.mxu1 %v9784_v9 }
 0x21a   : > { %8789 = vmatpush3.bf16.msra.mxu0 %v9784_v9 }
 0x21d   : > { %8759 = vmatmul.mubr.msk.bf16.gmra.mrb[4].mxu0 %vm400_vm0, %v10595_v11  ;;  %v2901_v11 = vsel %vm10509_vm6, %v7712_v10, %v2900_v57 }
 0x21e   : > { %8762 = vmatprep.mubr.msk.bf16.mxu0 %vm400_vm0, %v10597_v37  ;;  %v2904_v37 = vsel %vm10509_vm6, %v2902_v20, %v2903_v7 }
 0x225   : > { %8763 = vmatmul.mubr.msk.bf16.gmra.mrb[8].mxu0 %vm400_vm0, %v10617_v16  ;;  %v7715_v16 = vcombine.low %v2901_v11, %v2904_v37 }
 0x226   : > { %8766 = vmatprep.mubr.msk.bf16.mxu0 %vm400_vm0, %v10619_v48  ;;  %v9785_v48 = vld [vmem:[%s11981_s3 + $0xd0] sm:$0xff]  }
 0x227   : > { %8790 = vmatprep.subr.bf16.mxu0 %v9785_v48  ;;  %9220 = vmatprep.subr.bf16.mxu1 %v9785_v48 }
 0x228   : > { %8791 = vmatpush3.bf16.msra.mxu0 %v9785_v48  ;;  %9228 = vmatpush3.bf16.msra.mxu1 %v9785_v48 }
 0x22d   : > { %8767 = vmatmul.mubr.msk.bf16.gmra.mrb[12].mxu0 %vm400_vm0, %v10639_v33  ;;  %v9786_v33 = vld [vmem:[%s11981_s3 + $0xd8] sm:$0xff]  }
 0x22e   : > { %8770 = vmatprep.mubr.msk.bf16.mxu0 %vm400_vm0, %v10641_v30  ;;  %8792 = vmatprep.subr.bf16.mxu0 %v9786_v33  ;;  %v9787_v30 = vld [vmem:[%s11981_s3 + $0xe0] sm:$0xff]  }
 0x22f   : > { %9221 = vmatprep.subr.bf16.mxu1 %v9786_v33  ;;  %8793 = vmatpush3.bf16.msra.mxu0 %v9786_v33 }
 0x230   : > { %9229 = vmatpush3.bf16.msra.mxu1 %v9786_v33  ;;  %8794 = vmatprep.subr.bf16.mxu0 %v9787_v30 }
 0x231   : > { %9222 = vmatprep.subr.bf16.mxu1 %v9787_v30 }
 0x233   : > { %8795 = vmatpush3.bf16.msra.mxu0 %v9787_v30 }
 0x234   : > { %9230 = vmatpush3.bf16.msra.mxu1 %v9787_v30  ;;  %8796 = vmatprep.subr.bf16.mxu0 %v9788_v8 }
 0x235   : > { %8771 = vmatmul.mubr.msk.bf16.gmra.mrb[16].mxu0 %vm400_vm0, %v7669_v18  ;;  %9223 = vmatprep.subr.bf16.mxu1 %v9788_v8 }
 0x236   : > { %8774 = vmatprep.mubr.msk.bf16.mxu0 %vm400_vm0, %v7670_v32 }
 0x237   : > { %8797 = vmatpush3.bf16.msra.mxu0 %v9788_v8 }
 0x238   : > { %9231 = vmatpush3.bf16.msra.mxu1 %v9788_v8  ;;  %8798 = vmatprep.subr.bf16.mxu0 %v9789_v62 }
 0x239   : > { %9224 = vmatprep.subr.bf16.mxu1 %v9789_v62 }
 0x23b   : > { %8799 = vmatpush3.bf16.msra.mxu0 %v9789_v62 }
 0x23c   : > { %9232 = vmatpush3.bf16.msra.mxu1 %v9789_v62  ;;  %8800 = vmatprep.subr.bf16.mxu0 %v9790_v23 }
 0x23d   : > { %8775 = vmatmul.mubr.msk.bf16.gmra.mrb[20].mxu0 %vm400_vm0, %v7671_v54  ;;  %9225 = vmatprep.subr.bf16.mxu1 %v9790_v23 }
 0x23e   : > { %8778 = vmatprep.mubr.msk.bf16.mxu0 %vm400_vm0, %v7672_v61 }
 0x23f   : > { %8801 = vmatpush3.bf16.msra.mxu0 %v9790_v23 }
 0x240   : > { %9233 = vmatpush3.bf16.msra.mxu1 %v9790_v23 }
 0x241   : > { %8834 = vmatprep.subr.bf16.mxu1 %v10776_v46 }
 0x245   : > { %8779 = vmatmul.mubr.msk.bf16.gmra.mrb[24].mxu0 %vm400_vm0, %v7673_v51 }
 0x246   : > { %8782 = vmatprep.mubr.msk.bf16.mxu0 %vm400_vm0, %v7694_v19 }
 0x24d   : > { %8783 = vmatmul.mubr.msk.bf16.gmra.mrb[28].mxu0 %vm400_vm0, %v7715_v16 }
 0x2e8   : > { %v8756_v21 = vpop.f32.mrb[0].mxu0 }
 0x2e9   : > { %v3122_v56 = vadd.f32 %v8756_v21, %v10782_v13  ;;  %v2954_v28 = vpop.f32.mrb[1].mxu0 }
 0x2ea   : > { %v3120_v39 = vadd.f32 %v10782_v13, %v2954_v28  ;;  %v8757_v26 = vpop.f32.mrb[2].mxu0 }
 0x2eb   : > { %v3154_v47 = vmax.f32 %v3122_v56, 0.0  ;;  %v3123_v0 = vadd.f32 %v8757_v26, %v10782_v13  ;;  %v2957_v50 = vpop.f32.mrb[3].mxu0 }
 0x2ec   : > { %v3152_v22 = vmax.f32 %v3120_v39, 0.0  ;;  %v3121_v52 = vadd.f32 %v10782_v13, %v2957_v50 }
 0x2ed   : > { %v8081_v5 = vpack.c.bf16 %v3154_v47, %v3154_v47  ;;  %v3155_v43 = vmax.f32 %v3123_v0, 0.0 }
 0x2ee   : > { %v8079_v18 = vpack.c.bf16 %v3152_v22, %v3152_v22  ;;  %v3153_v32 = vmax.f32 %v3121_v52, 0.0 }
 0x2ef   : > { %v3301_v29 = vshrl.u32 %v8081_v5, 16  ;;  %v8082_v55 = vpack.c.bf16 %v3155_v43, %v3155_v43  ;;  %v3304_v35 = vshll.u32 %v8081_v5, 16  ;;  %v3630_v43 = vld [vmem:[#allocation2 + $0x30] sm:$0xf] }
 0x2f0   : > { %v3284_v40 = vshrl.u32 %v8079_v18, 16  ;;  %v3287_v49 = vshll.u32 %v8079_v18, 16  ;;  %v8080_v15 = vpack.c.bf16 %v3153_v32, %v3153_v32  ;;  %v8760_v38 = vpop.f32.mrb[4].mxu0 }
 0x2f1   : > { %v3303_v3 = vrot.slane %v3301_v29, 7  ;;  %v3309_v1 = vshrl.u32 %v8082_v55, 16  ;;  %v3312_v27 = vshll.u32 %v8082_v55, 16  ;;  %v3126_v42 = vadd.f32 %v8760_v38, %v10782_v13  ;;  %v2970_v34 = vpop.f32.mrb[5].mxu0 }
 0x2f2   : > { %v3286_v61 = vrot.slane %v3284_v40, 7  ;;  %v3292_v6 = vshrl.u32 %v8080_v15, 16  ;;  %v3295_v2 = vshll.u32 %v8080_v15, 16  ;;  %v3124_v31 = vadd.f32 %v10782_v13, %v2970_v34  ;;  %v8761_v36 = vpop.f32.mrb[6].mxu0 }
 0x2f3   : > { %v3306_v51 = vor.u32 %v3304_v35, %v3303_v3  ;;  %v3307_v59 = vrot.slane %v3303_v3, 4  ;;  %v3311_v17 = vrot.slane %v3309_v1, 7  ;;  %v3158_v12 = vmax.f32 %v3126_v42, 0.0  ;;  %v2973_v53 = vpop.f32.mrb[7].mxu0  ;;  %v3623_v3 = vld [vmem:[#allocation2 + $0x24] sm:$0xf] }
 0x2f4   : > { %v3289_v44 = vor.u32 %v3287_v49, %v3286_v61  ;;  %v3290_v19 = vrot.slane %v3286_v61, 4  ;;  %v3294_v10 = vrot.slane %v3292_v6, 7  ;;  %v3156_v20 = vmax.f32 %v3124_v31, 0.0 }
 0x2f5   : > { %v3617_v7 = vsel %vm10791_vm12, %v3306_v51, %v3616_v14  ;;  %v3722_v11 = vsel %vm10791_vm12, %v3306_v51, %v3721_v25  ;;  %v3314_v37 = vor.u32 %v3312_v27, %v3311_v17  ;;  %v3316_v16 = vrot.slane %v3311_v17, 4 }
 0x2f6   : > { %3618 = vst [vmem:[#allocation2 + $0x18] sm:$0xf] %v3617_v7  ;;  %3723 = vst [vmem:[#allocation2] sm:$0xf] %v3722_v11  ;;  %v3608_v9 = vsel %vm10791_vm12, %v3289_v44, %v3607_v60  ;;  %v3297_v48 = vor.u32 %v3295_v2, %v3294_v10  ;;  %v3299_v33 = vrot.slane %v3294_v10, 4  ;;  %v8085_v30 = vpack.c.bf16 %v3158_v12, %v3158_v12 }
 0x2f7   : > { %3609 = vst [vmem:[#allocation2 + $0xc] sm:$0xf] %v3608_v9  ;;  %v3315_v8 = vsel %vm10804_vm14, %v3307_v59, %v3314_v37  ;;  %v3621_v62 = vsel %vm10798_vm13, %v3316_v16, %v3620_v4  ;;  %v3726_v23 = vsel %vm10798_vm13, %v3316_v16, %v3725_v45  ;;  %v8083_v21 = vpack.c.bf16 %v3156_v20, %v3156_v20 }
 0x2f8   : > { %3619 = vst [vmem:[#allocation2 + $0x1c] sm:$0xf] %v3315_v8  ;;  %3622 = vst [vmem:[#allocation2 + $0x20] sm:$0x1] %v3621_v62  ;;  %v3298_v56 = vsel %vm10804_vm14, %v3290_v19, %v3297_v48  ;;  %v3614_v28 = vsel %vm10798_vm13, %v3299_v33, %v3613_v24  ;;  %v3335_v39 = vshrl.u32 %v8085_v30, 16  ;;  %v8764_v26 = vpop.f32.mrb[8].mxu0  ;;  %v3127_v0 = vadd.f32 %v8761_v36, %v10782_v13 }
 0x2f9   : > { %3724 = vst [vmem:[#allocation2 + $0x4] sm:$0xf] %v3315_v8  ;;  %3727 = vst [vmem:[#allocation2 + $0x8] sm:$0x1] %v3726_v23  ;;  %v3318_v47 = vshrl.u32 %v8083_v21, 16  ;;  %v3125_v50 = vadd.f32 %v10782_v13, %v2973_v53  ;;  %v2986_v22 = vpop.f32.mrb[9].mxu0  ;;  %v3130_v18 = vadd.f32 %v8764_v26, %v10782_v13 }
 0x2fa   : > { %3610 = vst [vmem:[#allocation2 + $0x10] sm:$0xf] %v3298_v56  ;;  %3615 = vst [vmem:[#allocation2 + $0x14] sm:$0x1] %v3614_v28  ;;  %v10826_v52 = vrot.slane %v3335_v39, 7  ;;  %v3338_v5 = vshll.u32 %v8085_v30, 16  ;;  %v3128_v32 = vadd.f32 %v10782_v13, %v2986_v22 }
 0x2fb   : > { %v8765_v29 = vpop.f32.mrb[10].mxu0  ;;  %v10830_v55 = vrot.slane %v3318_v47, 7  ;;  %v3321_v35 = vshll.u32 %v8083_v21, 16  ;;  %v3159_v14 = vmax.f32 %v3127_v0, 0.0  ;;  %v3157_v40 = vmax.f32 %v3125_v50, 0.0 }
 0x2fc   : > { %v2989_v49 = vpop.f32.mrb[11].mxu0  ;;  %v3340_v15 = vor.u32 %v3338_v5, %v10826_v52  ;;  %v3341_v38 = vrot.slane %v10826_v52, 4  ;;  %v3162_v25 = vmax.f32 %v3130_v18, 0.0  ;;  %v3160_v1 = vmax.f32 %v3128_v32, 0.0  ;;  %v3634_v62 = vld [vmem:[#allocation2 + $0x38] sm:$0x1] }
 0x2fd   : > { %v3736_v27 = vld [vmem:[#allocation2] sm:$0x2]  ;;  %v3738_v42 = vld [vmem:[#allocation2 + $0x18] sm:$0x2]  ;;  %v3826_v34 = vld [vmem:[#allocation2] sm:$0x1]  ;;  %v3323_v61 = vor.u32 %v3321_v35, %v10830_v55  ;;  %v8086_v60 = vpack.c.bf16 %v3159_v14, %v3159_v14  ;;  %v10836_v6 = vadd.f32 %v8765_v29, %v10782_v13  ;;  %v8084_v17 = vpack.c.bf16 %v3157_v40, %v3157_v40 }
 0x2fe   : > { %v7766_v2 = vrot.slane %v3736_v27, 9  ;;  %v7768_v31 = vrot.slane %v3738_v42, 9  ;;  %v3832_v36 = vld [vmem:[#allocation2 + $0x18] sm:$0x1]  ;;  %v3737_v51 = vld [vmem:[#allocation2 + $0xc] sm:$0x2]  ;;  %v3631_v59 = vsel %vm10791_vm12, %v3340_v15, %v3630_v43  ;;  %v8089_v45 = vpack.c.bf16 %v3162_v25, %v3162_v25 }
 0x2ff   : > { %v7767_v12 = vrot.slane %v3737_v51, 9  ;;  %v3829_v53 = vld [vmem:[#allocation2 + $0xc] sm:$0x1]  ;;  %3632 = vst [vmem:[#allocation2 + $0x30] sm:$0xf] %v3631_v59  ;;  %v3624_v19 = vsel %vm10791_vm12, %v3323_v61, %v3623_v3  ;;  %v10849_v10 = vadd.f32 %v10782_v13, %v2989_v49  ;;  %v3343_v24 = vshrl.u32 %v8086_v60, 16 }
 0x300   : > { %v3880_v44 = vld [vmem:[#allocation2 + $0x4] sm:$0x8]  ;;  %v3827_v20 = vsel %vm10798_vm13, %v7766_v2, %v3826_v34  ;;  %v3833_v7 = vsel %vm10798_vm13, %v7768_v31, %v3832_v36  ;;  %v3882_v11 = vld [vmem:[#allocation2 + $0x1c] sm:$0x8]  ;;  %v3971_v16 = vld [vmem:[#allocation2 + $0x8] sm:$0x1]  ;;  %v8087_v23 = vpack.c.bf16 %v3160_v1, %v3160_v1 }
 0x301   : > { %v7784_v37 = vrot.slane %v3880_v44, 11  ;;  %3625 = vst [vmem:[#allocation2 + $0x24] sm:$0xf] %v3624_v19  ;;  %3828 = vst [vmem:[#allocation2] sm:$0x1] %v3827_v20  ;;  %v3830_v9 = vsel %vm10798_vm13, %v7767_v12, %v3829_v53  ;;  %v7786_v48 = vrot.slane %v3882_v11, 11 }
 0x302   : > { %3834 = vst [vmem:[#allocation2 + $0x18] sm:$0x1] %v3833_v7  ;;  %v3977_v33 = vld [vmem:[#allocation2 + $0x20] sm:$0x1]  ;;  %v3881_v30 = vld [vmem:[#allocation2 + $0x10] sm:$0x8] }
 0x303   : > { %v3346_v8 = vshll.u32 %v8086_v60, 16  ;;  %3831 = vst [vmem:[#allocation2 + $0xc] sm:$0x1] %v3830_v9  ;;  %v3972_v21 = vsel %vm10842_vm15, %v7784_v37, %v3971_v16  ;;  %v7785_v56 = vrot.slane %v3881_v30, 11  ;;  %v3974_v28 = vld [vmem:[#allocation2 + $0x14] sm:$0x1]  ;;  %v3978_v0 = vsel %vm10842_vm15, %v7786_v48, %v3977_v33 }
 0x304   : > { %v3345_v39 = vrot.slane %v3343_v24, 7  ;;  %v3326_v26 = vshrl.u32 %v8084_v17, 16  ;;  %v8768_v47 = vpop.f32.mrb[12].mxu0  ;;  %3973 = vst [vmem:[#allocation2 + $0x8] sm:$0x1] %v3972_v21  ;;  %v3324_v50 = vrot.slane %v10830_v55, 4 }
 0x305   : > { %v3329_v22 = vshll.u32 %v8084_v17, 16  ;;  %v3627_v5 = vld [vmem:[#allocation2 + $0x2c] sm:$0x1]  ;;  %v3369_v43 = vshrl.u32 %v8089_v45, 16  ;;  %v3002_v18 = vpop.f32.mrb[13].mxu0  ;;  %v3975_v32 = vsel %vm10842_vm15, %v7785_v56, %v3974_v28  ;;  %v3372_v3 = vshll.u32 %v8089_v45, 16 }
 0x306   : > { %3979 = vst [vmem:[#allocation2 + $0x20] sm:$0x1] %v3978_v0  ;;  %v3348_v29 = vor.u32 %v3346_v8, %v3345_v39  ;;  %v3350_v35 = vrot.slane %v3345_v39, 4  ;;  %v3328_v14 = vrot.slane %v3326_v26, 7  ;;  %v3644_v40 = vld [vmem:[#allocation2 + $0x48] sm:$0xf]  ;;  %v3134_v21 = vadd.f32 %v8768_v47, %v10782_v13 }
 0x307   : > { %v8769_v49 = vpop.f32.mrb[14].mxu0  ;;  %3976 = vst [vmem:[#allocation2 + $0x14] sm:$0x1] %v3975_v32  ;;  %v10864_v15 = vrot.slane %v3369_v43, 7  ;;  %v3352_v25 = vshrl.u32 %v8087_v23, 16  ;;  %v3163_v55 = vmax.f32 %v10836_v6, 0.0  ;;  %v3132_v56 = vadd.f32 %v10782_v13, %v3002_v18 }
 0x308   : > { %v3005_v1 = vpop.f32.mrb[15].mxu0  ;;  %v3740_v27 = vld [vmem:[#allocation2 + $0x30] sm:$0x2]  ;;  %v3838_v42 = vld [vmem:[#allocation2 + $0x30] sm:$0x1]  ;;  %v3349_v34 = vsel %vm10804_vm14, %v3341_v38, %v3348_v29  ;;  %v3635_v61 = vsel %vm10798_vm13, %v3350_v35, %v3634_v62  ;;  %v3331_v60 = vor.u32 %v3329_v22, %v3328_v14  ;;  %v3333_v2 = vrot.slane %v3328_v14, 4 }
 0x309   : > { %v7770_v31 = vrot.slane %v3740_v27, 9  ;;  %v3739_v36 = vld [vmem:[#allocation2 + $0x24] sm:$0x2]  ;;  %v3835_v51 = vld [vmem:[#allocation2 + $0x24] sm:$0x1]  ;;  %v3374_v6 = vor.u32 %v3372_v3, %v10864_v15  ;;  %v3355_v59 = vshll.u32 %v8087_v23, 16  ;;  %v8090_v12 = vpack.c.bf16 %v3163_v55, %v3163_v55 }
 0x30a   : > { %3633 = vst [vmem:[#allocation2 + $0x34] sm:$0xf] %v3349_v34  ;;  %3636 = vst [vmem:[#allocation2 + $0x38] sm:$0x1] %v3635_v61  ;;  %v3637_v17 = vld [vmem:[#allocation2 + $0x3c] sm:$0xf]  ;;  %v3332_v52 = vsel %vm10804_vm14, %v3324_v50, %v3331_v60  ;;  %v3628_v38 = vsel %vm10798_vm13, %v3333_v2, %v3627_v5  ;;  %v3135_v50 = vadd.f32 %v8769_v49, %v10782_v13 }
 0x30b   : > { %v7769_v53 = vrot.slane %v3739_v36, 9  ;;  %v10878_v44 = vrot.slane %v3352_v25, 7  ;;  %v8772_v19 = vpop.f32.mrb[16].mxu0  ;;  %v3839_v45 = vsel %vm10798_vm13, %v7770_v31, %v3838_v42  ;;  %3626 = vst [vmem:[#allocation2 + $0x28] sm:$0xf] %v3332_v52  ;;  %v3375_v20 = vrot.slane %v10864_v15, 4 }
 0x30c   : > { %3629 = vst [vmem:[#allocation2 + $0x2c] sm:$0x1] %v3628_v38  ;;  %v3645_v7 = vsel %vm10791_vm12, %v3374_v6, %v3644_v40  ;;  %v3377_v11 = vshrl.u32 %v8090_v12, 16  ;;  %v3018_v37 = vpop.f32.mrb[17].mxu0  ;;  %v9791_v16 = vld [vmem:[#allocation2 + $0xc] sm:$0xff]   ;;  %v3380_v48 = vshll.u32 %v8090_v12, 16  ;;  %v10899_v35 = vadd.f32 %v8772_v19, %v10782_v13 }
 0x30d   : > { %3840 = vst [vmem:[#allocation2 + $0x30] sm:$0x1] %v3839_v45  ;;  %v3836_v24 = vsel %vm10798_vm13, %v7769_v53, %v3835_v51  ;;  %3646 = vst [vmem:[#allocation2 + $0x48] sm:$0xf] %v3645_v7  ;;  %v3357_v9 = vor.u32 %v3355_v59, %v10878_v44  ;;  %v3161_v33 = vmax.f32 %v10849_v10, 0.0  ;;  %v8773_v30 = vpop.f32.mrb[18].mxu0  ;;  %8802 = vmatprep.mubr.bf16.mxu0 %v9791_v16 }
 0x30e   : > { %v9792_v8 = vld [vmem:[#allocation2 + $0x18] sm:$0xff]   ;;  %3837 = vst [vmem:[#allocation2 + $0x24] sm:$0x1] %v3836_v24  ;;  %v3358_v62 = vrot.slane %v10878_v44, 4  ;;  %v3379_v23 = vrot.slane %v3377_v11, 7  ;;  %v3021_v28 = vpop.f32.mrb[19].mxu0  ;;  %v10896_v10 = vadd.f32 %v10782_v13, %v3005_v1  ;;  %v10902_v14 = vadd.f32 %v10782_v13, %v3018_v37 }
 0x30f   : > { %v3638_v39 = vsel %vm10791_vm12, %v3357_v9, %v3637_v17  ;;  %v3648_v26 = vld [vmem:[#allocation2 + $0x50] sm:$0x1]  ;;  %v8088_v0 = vpack.c.bf16 %v3161_v33, %v3161_v33  ;;  %8803 = vmatmul.mubr.bf16.vlgmr.msra.gmra.mrb[32].mxu0 %v9792_v8  ;;  %v3166_v43 = vmax.f32 %v3134_v21, 0.0  ;;  %v3164_v47 = vmax.f32 %v3132_v56, 0.0  ;;  %v3641_v25 = vld [vmem:[#allocation2 + $0x44] sm:$0x1] }
 0x310   : > { %3639 = vst [vmem:[#allocation2 + $0x3c] sm:$0xf] %v3638_v39  ;;  %v3382_v22 = vor.u32 %v3380_v48, %v3379_v23  ;;  %v3384_v5 = vrot.slane %v3379_v23, 4  ;;  %v3167_v61 = vmax.f32 %v3135_v50, 0.0  ;;  %v10909_v60 = vadd.f32 %v8773_v30, %v10782_v13  ;;  %v3658_v38 = vld [vmem:[#allocation2 + $0x60] sm:$0xf] }
 0x311   : > { %v3884_v32 = vld [vmem:[#allocation2 + $0x34] sm:$0x8]  ;;  %v3360_v18 = vshrl.u32 %v8088_v0, 16  ;;  %v3363_v29 = vshll.u32 %v8088_v0, 16  ;;  %v3983_v49 = vld [vmem:[#allocation2 + $0x38] sm:$0x1]  ;;  %v8093_v55 = vpack.c.bf16 %v3166_v43, %v3166_v43  ;;  %v8091_v34 = vpack.c.bf16 %v3164_v47, %v3164_v47 }
 0x312   : > { %v7788_v40 = vrot.slane %v3884_v32, 11  ;;  %v3383_v15 = vsel %vm10804_vm14, %v3375_v20, %v3382_v22  ;;  %v3649_v3 = vsel %vm10798_vm13, %v3384_v5, %v3648_v26  ;;  %v3883_v1 = vld [vmem:[#allocation2 + $0x28] sm:$0x8]  ;;  %v10914_v59 = vadd.f32 %v10782_v13, %v3021_v28  ;;  %v10916_v44 = vpop.f32.mrb[20].mxu0  ;;  %v3651_v33 = vld [vmem:[#allocation2 + $0x54] sm:$0xf] }
 0x313   : > { %v3980_v27 = vld [vmem:[#allocation2 + $0x2c] sm:$0x1]  ;;  %3647 = vst [vmem:[#allocation2 + $0x4c] sm:$0xf] %v3383_v15  ;;  %3650 = vst [vmem:[#allocation2 + $0x50] sm:$0x1] %v3649_v3  ;;  %v8094_v30 = vpack.c.bf16 %v3167_v61, %v3167_v61 }
 0x314   : > { %v3362_v42 = vrot.slane %v3360_v18, 7  ;;  %v3984_v2 = vsel %vm10842_vm15, %v7788_v40, %v3983_v49  ;;  %v7787_v31 = vrot.slane %v3883_v1, 11  ;;  %v3742_v36 = vld [vmem:[#allocation2 + $0x48] sm:$0x2]  ;;  %v3844_v51 = vld [vmem:[#allocation2 + $0x48] sm:$0x1] }
 0x315   : > { %v3403_v6 = vshrl.u32 %v8093_v55, 16  ;;  %3985 = vst [vmem:[#allocation2 + $0x38] sm:$0x1] %v3984_v2  ;;  %v7772_v17 = vrot.slane %v3742_v36, 9  ;;  %v3406_v52 = vshll.u32 %v8093_v55, 16  ;;  %v3386_v20 = vshrl.u32 %v8091_v34, 16 }
 0x316   : > { %v3365_v12 = vor.u32 %v3363_v29, %v3362_v42  ;;  %v3367_v53 = vrot.slane %v3362_v42, 4  ;;  %v3981_v19 = vsel %vm10842_vm15, %v7787_v31, %v3980_v27  ;;  %v3389_v7 = vshll.u32 %v8091_v34, 16  ;;  %v10922_v11 = vpop.f32.mrb[21].mxu0  ;;  %v10932_v23 = vld [vmem:[#allocation2 + $0x24] sm:$0xff]   ;;  %v10943_v5 = vld [vmem:[#allocation2 + $0x30] sm:$0xff]   ;;  %v9877_v4 = vld [vmem:[#allocation2 + $0x18] sm:$0xff]  }
 0x317   : > { %v10920_v45 = vrot.slane %v3403_v6, 7  ;;  %3982 = vst [vmem:[#allocation2 + $0x2c] sm:$0x1] %v3981_v19  ;;  %v3845_v37 = vsel %vm10798_vm13, %v7772_v17, %v3844_v51  ;;  %v3741_v16 = vld [vmem:[#allocation2 + $0x3c] sm:$0x2]  ;;  %v10930_v8 = vpop.f32.mrb[22].mxu0  ;;  %8806 = vmatprep.mubr.bf16.mxu1 %v10932_v23 }
 0x318   : > { %v3841_v24 = vld [vmem:[#allocation2 + $0x3c] sm:$0x1]  ;;  %v3366_v9 = vsel %vm10804_vm14, %v3358_v62, %v3365_v12  ;;  %v3642_v48 = vsel %vm10798_vm13, %v3367_v53, %v3641_v25  ;;  %3846 = vst [vmem:[#allocation2 + $0x48] sm:$0x1] %v3845_v37  ;;  %v7771_v21 = vrot.slane %v3741_v16, 9  ;;  %v10936_v39 = vrot.slane %v3386_v20, 7  ;;  %8807 = vmatmul.mubr.bf16.vlgmr.msra.gmra.mrb[0].mxu1 %v10943_v5 }
 0x319   : > { %3640 = vst [vmem:[#allocation2 + $0x40] sm:$0xf] %v3366_v9  ;;  %3643 = vst [vmem:[#allocation2 + $0x44] sm:$0x1] %v3642_v48  ;;  %v3408_v56 = vor.u32 %v3406_v52, %v10920_v45  ;;  %v3409_v28 = vrot.slane %v10920_v45, 4  ;;  %v10938_v62 = vpop.f32.mrb[23].mxu0  ;;  %8835 = vmatpush3.bf16.msra.mxu1 %v10776_v46 }
 0x31a   : > { %v3411_v26 = vshrl.u32 %v8094_v30, 16  ;;  %v3414_v0 = vshll.u32 %v8094_v30, 16  ;;  %v3165_v50 = vmax.f32 %v10896_v10, 0.0  ;;  %v3170_v22 = vmax.f32 %v10899_v35, 0.0  ;;  %v9796_v43 = vld [vmem:[%s11981_s3 + $0x8] sm:$0xff]   ;;  %v10955_v25 = vpop.f32.mrb[24].mxu0 }
 0x31b   : > { %v3842_v47 = vsel %vm10798_vm13, %v7771_v21, %v3841_v24  ;;  %v3886_v32 = vld [vmem:[#allocation2 + $0x4c] sm:$0x8]  ;;  %v3659_v18 = vsel %vm10791_vm12, %v3408_v56, %v3658_v38  ;;  %v3391_v29 = vor.u32 %v3389_v7, %v10936_v39  ;;  %v3392_v10 = vrot.slane %v10936_v39, 4  ;;  %v3662_v35 = vld [vmem:[#allocation2 + $0x68] sm:$0x1]  ;;  %v10963_v61 = vpop.f32.mrb[25].mxu0  ;;  %8836 = vmatprep.subr.bf16.mxu1 %v9796_v43 }
 0x31c   : > { %3843 = vst [vmem:[#allocation2 + $0x3c] sm:$0x1] %v3842_v47  ;;  %v7790_v40 = vrot.slane %v3886_v32, 11  ;;  %3660 = vst [vmem:[#allocation2 + $0x60] sm:$0xf] %v3659_v18  ;;  %v3413_v49 = vrot.slane %v3411_v26, 7  ;;  %v8092_v15 = vpack.c.bf16 %v3165_v50, %v3165_v50  ;;  %v8097_v3 = vpack.c.bf16 %v3170_v22, %v3170_v22 }
 0x31d   : > { %v3989_v55 = vld [vmem:[#allocation2 + $0x50] sm:$0x1]  ;;  %v3652_v1 = vsel %vm10791_vm12, %v3391_v29, %v3651_v33  ;;  %v3168_v27 = vmax.f32 %v10902_v14, 0.0  ;;  %v3171_v42 = vmax.f32 %v10909_v60, 0.0  ;;  %v3169_v34 = vmax.f32 %v10914_v59, 0.0  ;;  %v10967_v6 = vpop.f32.mrb[26].mxu0  ;;  %8837 = vmatpush3.bf16.msra.mxu1 %v9796_v43 }
 0x31e   : > { %v3990_v2 = vsel %vm10842_vm15, %v7790_v40, %v3989_v55  ;;  %3653 = vst [vmem:[#allocation2 + $0x54] sm:$0xf] %v3652_v1  ;;  %v3416_v31 = vor.u32 %v3414_v0, %v3413_v49  ;;  %v3418_v36 = vrot.slane %v3413_v49, 4  ;;  %v3394_v51 = vshrl.u32 %v8092_v15, 16  ;;  %v9799_v14 = vld [vmem:[%s11981_s3 + $0x10] sm:$0xff]   ;;  %v10972_v53 = vpop.f32.mrb[27].mxu0 }
 0x31f   : > { %3991 = vst [vmem:[#allocation2 + $0x50] sm:$0x1] %v3990_v2  ;;  %v3397_v60 = vshll.u32 %v8092_v15, 16  ;;  %v3655_v59 = vld [vmem:[#allocation2 + $0x5c] sm:$0x1]  ;;  %v3437_v46 = vshrl.u32 %v8097_v3, 16  ;;  %v8095_v12 = vpack.c.bf16 %v3168_v27, %v3168_v27  ;;  %v8098_v37 = vpack.c.bf16 %v3171_v42, %v3171_v42  ;;  %8838 = vmatprep.subr.bf16.mxu1 %v9799_v14 }
 0x320   : > { %v3440_v17 = vshll.u32 %v8097_v3, 16  ;;  %v3885_v52 = vld [vmem:[#allocation2 + $0x40] sm:$0x8]  ;;  %v3986_v38 = vld [vmem:[#allocation2 + $0x44] sm:$0x1]  ;;  %v3417_v19 = vsel %vm10804_vm14, %v3409_v28, %v3416_v31  ;;  %v3663_v45 = vsel %vm10798_vm13, %v3418_v36, %v3662_v35  ;;  %v3396_v20 = vrot.slane %v3394_v51, 7 }
 0x321   : > { %v3672_v7 = vld [vmem:[#allocation2 + $0x78] sm:$0xf]  ;;  %v7789_v16 = vrot.slane %v3885_v52, 11  ;;  %3661 = vst [vmem:[#allocation2 + $0x64] sm:$0xf] %v3417_v19  ;;  %v3439_v24 = vrot.slane %v3437_v46, 7  ;;  %8839 = vmatpush3.bf16.msra.mxu1 %v9799_v14  ;;  %v3142_v52 = vadd.f32 %v10916_v44, %v10782_v13 }
 0x322   : > { %3664 = vst [vmem:[#allocation2 + $0x68] sm:$0x1] %v3663_v45  ;;  %v3420_v9 = vshrl.u32 %v8095_v12, 16  ;;  %v3423_v48 = vshll.u32 %v8095_v12, 16  ;;  %v3399_v33 = vor.u32 %v3397_v60, %v3396_v20  ;;  %v3401_v30 = vrot.slane %v3396_v20, 4  ;;  %v9802_v28 = vld [vmem:[%s11981_s3 + $0x18] sm:$0xff]  }
 0x323   : > { %v3665_v21 = vld [vmem:[#allocation2 + $0x6c] sm:$0xf]  ;;  %v3445_v56 = vshrl.u32 %v8098_v37, 16  ;;  %v3448_v26 = vshll.u32 %v8098_v37, 16  ;;  %v3987_v0 = vsel %vm10842_vm15, %v7789_v16, %v3986_v38  ;;  %v3744_v50 = vld [vmem:[#allocation2 + $0x60] sm:$0x2]  ;;  %v3442_v22 = vor.u32 %v3440_v17, %v3439_v24  ;;  %8840 = vmatprep.subr.bf16.mxu1 %v9802_v28 }
 0x324   : > { %v3443_v47 = vrot.slane %v3439_v24, 4  ;;  %v10983_v32 = vrot.slane %v3420_v9, 7  ;;  %v3676_v18 = vld [vmem:[#allocation2 + $0x80] sm:$0x1]  ;;  %v10985_v43 = vld [vmem:[#allocation2 + $0x48] sm:$0xff]   ;;  %v7774_v29 = vrot.slane %v3744_v50, 9  ;;  %v3400_v35 = vsel %vm10804_vm14, %v3392_v10, %v3399_v33 }
 0x325   : > { %3988 = vst [vmem:[#allocation2 + $0x44] sm:$0x1] %v3987_v0  ;;  %v3656_v40 = vsel %vm10798_vm13, %v3401_v30, %v3655_v59  ;;  %v3447_v49 = vrot.slane %v3445_v56, 7  ;;  %v10993_v15 = vld [vmem:[#allocation2 + $0x3c] sm:$0xff]   ;;  %v10995_v3 = vpop.f32.mrb[28].mxu0  ;;  %v3673_v27 = vsel %vm10791_vm12, %v3442_v22, %v3672_v7  ;;  %v8096_v10 = vpack.c.bf16 %v3169_v34, %v3169_v34  ;;  %8841 = vmatpush3.bf16.msra.mxu1 %v9802_v28 }
 0x326   : > { %v3850_v55 = vld [vmem:[#allocation2 + $0x60] sm:$0x1]  ;;  %v3743_v1 = vld [vmem:[#allocation2 + $0x54] sm:$0x2]  ;;  %3654 = vst [vmem:[#allocation2 + $0x58] sm:$0xf] %v3400_v35  ;;  %v3425_v39 = vor.u32 %v3423_v48, %v10983_v32  ;;  %8810 = vmatprep.mubr.bf16.mxu1 %v10993_v15  ;;  %v3140_v37 = vadd.f32 %v10782_v13, %v10922_v11  ;;  %v3143_v9 = vadd.f32 %v10930_v8, %v10782_v13 }
 0x327   : > { %3657 = vst [vmem:[#allocation2 + $0x5c] sm:$0x1] %v3656_v40  ;;  %v3426_v42 = vrot.slane %v10983_v32, 4  ;;  %v11001_v2 = vpop.f32.mrb[29].mxu0  ;;  %v3851_v31 = vsel %vm10798_vm13, %v7774_v29, %v3850_v55  ;;  %v7773_v36 = vrot.slane %v3743_v1, 9  ;;  %v3450_v51 = vor.u32 %v3448_v26, %v3447_v49  ;;  %v9805_v46 = vld [vmem:[%s11981_s3 + $0x20] sm:$0xff]   ;;  %8811 = vmatmul.mubr.bf16.gmra.mrb[4].mxu1 %v10985_v43 }
 0x328   : > { %3674 = vst [vmem:[#allocation2 + $0x78] sm:$0xf] %v3673_v27  ;;  %v3452_v60 = vrot.slane %v3447_v49, 4  ;;  %v11006_v59 = vpop.f32.mrb[30].mxu0  ;;  %3852 = vst [vmem:[#allocation2 + $0x60] sm:$0x1] %v3851_v31  ;;  %v3666_v14 = vsel %vm10791_vm12, %v3425_v39, %v3665_v21  ;;  %v3141_v21 = vadd.f32 %v10782_v13, %v10938_v62  ;;  %v11032_v56 = vadd.f32 %v10955_v25, %v10782_v13 }
 0x329   : > { %v3847_v34 = vld [vmem:[#allocation2 + $0x54] sm:$0x1]  ;;  %v3428_v17 = vshrl.u32 %v8096_v10, 16  ;;  %v3431_v12 = vshll.u32 %v8096_v10, 16  ;;  %v11016_v38 = vpop.f32.mrb[31].mxu0  ;;  %v3451_v20 = vsel %vm10804_vm14, %v3443_v47, %v3450_v51  ;;  %v3174_v24 = vmax.f32 %v3142_v52, 0.0  ;;  %8842 = vmatprep.subr.bf16.mxu1 %v9805_v46 }
 0x32a   : > { %v3848_v19 = vsel %vm10798_vm13, %v7773_v36, %v3847_v34  ;;  %v3888_v45 = vld [vmem:[#allocation2 + $0x64] sm:$0x8]  ;;  %3667 = vst [vmem:[#allocation2 + $0x6c] sm:$0xf] %v3666_v14  ;;  %v3677_v7 = vsel %vm10798_vm13, %v3452_v60, %v3676_v18  ;;  %3675 = vst [vmem:[#allocation2 + $0x7c] sm:$0xf] %v3451_v20  ;;  %v11036_v11 = vadd.f32 %v10782_v13, %v10963_v61  ;;  %8843 = vmatpush3.bf16.msra.mxu1 %v9805_v46 }
 0x32b   : > { %3849 = vst [vmem:[#allocation2 + $0x54] sm:$0x1] %v3848_v19  ;;  %v7792_v44 = vrot.slane %v3888_v45, 11  ;;  %3678 = vst [vmem:[#allocation2 + $0x80] sm:$0x1] %v3677_v7  ;;  %v3430_v16 = vrot.slane %v3428_v17, 7  ;;  %v8101_v50 = vpack.c.bf16 %v3174_v24, %v3174_v24  ;;  %v11045_v61 = vadd.f32 %v10967_v6, %v10782_v13 }
 0x32c   : > { %v3995_v48 = vld [vmem:[#allocation2 + $0x68] sm:$0x1]  ;;  %v3669_v33 = vld [vmem:[#allocation2 + $0x74] sm:$0x1]  ;;  %v3172_v30 = vmax.f32 %v3140_v37, 0.0  ;;  %v3175_v47 = vmax.f32 %v3143_v9, 0.0  ;;  %v11062_v20 = vadd.f32 %v10782_v13, %v10972_v53 }
 0x32d   : > { %v9808_v8 = vld [vmem:[%s11981_s3 + $0x28] sm:$0xff]   ;;  %v3996_v26 = vsel %vm10842_vm15, %v7792_v44, %v3995_v48  ;;  %v3433_v28 = vor.u32 %v3431_v12, %v3430_v16  ;;  %v3435_v0 = vrot.slane %v3430_v16, 4  ;;  %v3887_v62 = vld [vmem:[#allocation2 + $0x58] sm:$0x8]  ;;  %v3173_v32 = vmax.f32 %v3141_v21, 0.0  ;;  %v11050_v18 = vld [vmem:[%s11981_s3 + $0x30] sm:$0xff]  }
 0x32e   : > { %3997 = vst [vmem:[#allocation2 + $0x68] sm:$0x1] %v3996_v26  ;;  %v3992_v22 = vld [vmem:[#allocation2 + $0x5c] sm:$0x1]  ;;  %v8099_v25 = vpack.c.bf16 %v3172_v30, %v3172_v30  ;;  %v7791_v29 = vrot.slane %v3887_v62, 11  ;;  %v3471_v1 = vshrl.u32 %v8101_v50, 16  ;;  %8844 = vmatprep.subr.bf16.mxu1 %v9808_v8  ;;  %v8102_v14 = vpack.c.bf16 %v3175_v47, %v3175_v47 }
 0x32f   : > { %v3746_v35 = vld [vmem:[#allocation2 + $0x78] sm:$0x2]  ;;  %v3856_v40 = vld [vmem:[#allocation2 + $0x78] sm:$0x1]  ;;  %v3434_v49 = vsel %vm10804_vm14, %v3426_v42, %v3433_v28  ;;  %v3670_v55 = vsel %vm10798_vm13, %v3435_v0, %v3669_v33  ;;  %v3474_v6 = vshll.u32 %v8101_v50, 16  ;;  %v8100_v17 = vpack.c.bf16 %v3173_v32, %v3173_v32  ;;  %v11064_v7 = vld [vmem:[#allocation2 + $0x60] sm:$0xff]   ;;  %8845 = vmatpush3.bf16.msra.mxu1 %v9808_v8 }
 0x330   : > { %v7776_v27 = vrot.slane %v3746_v35, 9  ;;  %3668 = vst [vmem:[#allocation2 + $0x70] sm:$0xf] %v3434_v49  ;;  %3671 = vst [vmem:[#allocation2 + $0x74] sm:$0x1] %v3670_v55  ;;  %v3454_v10 = vshrl.u32 %v8099_v25, 16  ;;  %v3993_v36 = vsel %vm10842_vm15, %v7791_v29, %v3992_v22  ;;  %8846 = vmatprep.subr.bf16.mxu1 %v11050_v18  ;;  %v3150_v55 = vadd.f32 %v10995_v3, %v10782_v13 }
 0x331   : > { %v3686_v39 = vld [vmem:[#allocation2 + $0x90] sm:$0xf]  ;;  %v3457_v31 = vshll.u32 %v8099_v25, 16  ;;  %v3745_v51 = vld [vmem:[#allocation2 + $0x6c] sm:$0x2]  ;;  %v3473_v34 = vrot.slane %v3471_v1, 7 }
 0x332   : > { %v3853_v60 = vld [vmem:[#allocation2 + $0x6c] sm:$0x1]  ;;  %v3679_v42 = vld [vmem:[#allocation2 + $0x84] sm:$0xf]  ;;  %3994 = vst [vmem:[#allocation2 + $0x5c] sm:$0x1] %v3993_v36  ;;  %v3857_v46 = vsel %vm10798_vm13, %v7776_v27, %v3856_v40 }
 0x333   : > { %v7775_v12 = vrot.slane %v3745_v51, 9  ;;  %v3890_v52 = vld [vmem:[#allocation2 + $0x7c] sm:$0x8]  ;;  %v4001_v19 = vld [vmem:[#allocation2 + $0x80] sm:$0x1]  ;;  %v3456_v45 = vrot.slane %v3454_v10, 7  ;;  %v3476_v16 = vor.u32 %v3474_v6, %v3473_v34  ;;  %8847 = vmatpush3.bf16.msra.mxu1 %v11050_v18 }
 0x334   : > { %v9814_v37 = vld [vmem:[%s11981_s3 + $0x38] sm:$0xff]   ;;  %3858 = vst [vmem:[#allocation2 + $0x78] sm:$0x1] %v3857_v46  ;;  %v7794_v44 = vrot.slane %v3890_v52, 11  ;;  %v3477_v24 = vrot.slane %v3473_v34, 4  ;;  %v3479_v9 = vshrl.u32 %v8102_v14, 16 }
 0x335   : > { %v11069_v48 = vld [vmem:[#allocation2 + $0x54] sm:$0xff]   ;;  %v3854_v33 = vsel %vm10798_vm13, %v7775_v12, %v3853_v60  ;;  %v3459_v30 = vor.u32 %v3457_v31, %v3456_v45  ;;  %v3460_v53 = vrot.slane %v3456_v45, 4  ;;  %v3482_v21 = vshll.u32 %v8102_v14, 16  ;;  %v3683_v49 = vld [vmem:[#allocation2 + $0x8c] sm:$0x1]  ;;  %8848 = vmatprep.subr.bf16.mxu1 %v9814_v37 }
 0x336   : > { %3855 = vst [vmem:[#allocation2 + $0x6c] sm:$0x1] %v3854_v33  ;;  %v4002_v26 = vsel %vm10842_vm15, %v7794_v44, %v4001_v19  ;;  %v3687_v28 = vsel %vm10791_vm12, %v3476_v16, %v3686_v39  ;;  %v3481_v0 = vrot.slane %v3479_v9, 7  ;;  %v3462_v50 = vshrl.u32 %v8100_v17, 16  ;;  %8814 = vmatprep.mubr.bf16.mxu1 %v11069_v48  ;;  %v3690_v62 = vld [vmem:[#allocation2 + $0x98] sm:$0x1] }
 0x337   : > { %4003 = vst [vmem:[#allocation2 + $0x80] sm:$0x1] %v4002_v26  ;;  %3688 = vst [vmem:[#allocation2 + $0x90] sm:$0xf] %v3687_v28  ;;  %v3680_v8 = vsel %vm10791_vm12, %v3459_v30, %v3679_v42  ;;  %v3465_v22 = vshll.u32 %v8100_v17, 16  ;;  %v3178_v25 = vmax.f32 %v11032_v56, 0.0  ;;  %8815 = vmatmul.mubr.bf16.gmra.mrb[8].mxu1 %v11064_v7 }
 0x338   : > { %v3176_v47 = vmax.f32 %v11036_v11, 0.0  ;;  %v3889_v32 = vld [vmem:[#allocation2 + $0x70] sm:$0x8]  ;;  %3681 = vst [vmem:[#allocation2 + $0x84] sm:$0xf] %v3680_v8  ;;  %v3484_v29 = vor.u32 %v3482_v21, %v3481_v0  ;;  %v3486_v35 = vrot.slane %v3481_v0, 4  ;;  %8849 = vmatpush3.bf16.msra.mxu1 %v9814_v37 }
 0x339   : > { %v3464_v40 = vrot.slane %v3462_v50, 7  ;;  %v7793_v1 = vrot.slane %v3889_v32, 11  ;;  %v8105_v27 = vpack.c.bf16 %v3178_v25, %v3178_v25  ;;  %v3179_v56 = vmax.f32 %v11045_v61, 0.0  ;;  %v11091_v11 = vld [vmem:[%s11981_s3 + $0x180] sm:$0xff]   ;;  %v3998_v39 = vld [vmem:[#allocation2 + $0x74] sm:$0x1] }
 0x33a   : > { %v8103_v6 = vpack.c.bf16 %v3176_v47, %v3176_v47  ;;  %v3485_v10 = vsel %vm10804_vm14, %v3477_v24, %v3484_v29  ;;  %v3691_v13 = vsel %vm10798_vm13, %v3486_v35, %v3690_v62  ;;  %v3700_v42 = vld [vmem:[#allocation2 + $0xa8] sm:$0xf]  ;;  %v3177_v52 = vmax.f32 %v11062_v20, 0.0  ;;  %8882 = vmatprep.subr.bf16.mxu1 %v11091_v11  ;;  %v3693_v44 = vld [vmem:[#allocation2 + $0x9c] sm:$0xf] }
 0x33b   : > { %v3467_v3 = vor.u32 %v3465_v22, %v3464_v40  ;;  %v3469_v18 = vrot.slane %v3464_v40, 4  ;;  %v3999_v31 = vsel %vm10842_vm15, %v7793_v1, %v3998_v39  ;;  %3689 = vst [vmem:[#allocation2 + $0x94] sm:$0xf] %v3485_v10  ;;  %3692 = vst [vmem:[#allocation2 + $0x98] sm:$0x1] %v3691_v13  ;;  %v3505_v61 = vshrl.u32 %v8105_v27, 16 }
 0x33c   : > { %v3508_v36 = vshll.u32 %v8105_v27, 16  ;;  %v3488_v51 = vshrl.u32 %v8103_v6, 16  ;;  %4000 = vst [vmem:[#allocation2 + $0x74] sm:$0x1] %v3999_v31  ;;  %v3491_v14 = vshll.u32 %v8103_v6, 16  ;;  %v8106_v17 = vpack.c.bf16 %v3179_v56, %v3179_v56 }
 0x33d   : > { %v3468_v60 = vsel %vm10804_vm14, %v3460_v53, %v3467_v3  ;;  %v3684_v34 = vsel %vm10798_vm13, %v3469_v18, %v3683_v49  ;;  %v3507_v46 = vrot.slane %v3505_v61, 7  ;;  %v3182_v19 = vmax.f32 %v3150_v55, 0.0  ;;  %v9875_v9 = vld [vmem:[%s11980_s2] ss:$0 sm:$0xff]  ;;  %v11113_v62 = vld [vmem:[#allocation2 + $0x6c] sm:$0xff]  }
 0x33e   : > { %3682 = vst [vmem:[#allocation2 + $0x88] sm:$0xf] %v3468_v60  ;;  %3685 = vst [vmem:[#allocation2 + $0x8c] sm:$0x1] %v3684_v34  ;;  %v11103_v12 = vrot.slane %v3488_v51, 7  ;;  %v3513_v16 = vshrl.u32 %v8106_v17, 16  ;;  %v3148_v37 = vadd.f32 %v9875_v9, %v11001_v2  ;;  %v3151_v20 = vadd.f32 %v9875_v9, %v11006_v59  ;;  %8818 = vmatprep.mubr.bf16.mxu1 %v11113_v62 }
 0x33f   : > { %v3748_v45 = vld [vmem:[#allocation2 + $0x90] sm:$0x2]  ;;  %v3516_v24 = vshll.u32 %v8106_v17, 16  ;;  %v3747_v30 = vld [vmem:[#allocation2 + $0x84] sm:$0x2]  ;;  %v3510_v53 = vor.u32 %v3508_v36, %v3507_v46  ;;  %v3511_v0 = vrot.slane %v3507_v46, 4  ;;  %v8104_v8 = vpack.c.bf16 %v3177_v52, %v3177_v52 }
 0x340   : > { %v7778_v33 = vrot.slane %v3748_v45, 9  ;;  %v3493_v21 = vor.u32 %v3491_v14, %v11103_v12  ;;  %v3862_v26 = vld [vmem:[#allocation2 + $0x90] sm:$0x1]  ;;  %v7777_v28 = vrot.slane %v3747_v30, 9  ;;  %v3515_v50 = vrot.slane %v3513_v16, 7  ;;  %v11121_v59 = vld [vmem:[#allocation2 + $0x78] sm:$0xff]  }
 0x341   : > { %v3859_v25 = vld [vmem:[#allocation2 + $0x84] sm:$0x1]  ;;  %v3701_v2 = vsel %vm10791_vm12, %v3510_v53, %v3700_v42  ;;  %v3704_v32 = vld [vmem:[#allocation2 + $0xb0] sm:$0x1]  ;;  %v8109_v29 = vpack.c.bf16 %v3182_v19, %v3182_v19  ;;  %v3496_v1 = vshrl.u32 %v8104_v8, 16  ;;  %v3499_v6 = vshll.u32 %v8104_v8, 16  ;;  %8819 = vmatmul.mubr.bf16.gmra.mrb[12].mxu1 %v11121_v59 }
 0x342   : > { %v3863_v22 = vsel %vm10798_vm13, %v7778_v33, %v3862_v26  ;;  %v3694_v47 = vsel %vm10791_vm12, %v3493_v21, %v3693_v44  ;;  %v3860_v35 = vsel %vm10798_vm13, %v7777_v28, %v3859_v25  ;;  %v3892_v40 = vld [vmem:[#allocation2 + $0x94] sm:$0x8]  ;;  %3702 = vst [vmem:[#allocation2 + $0xa8] sm:$0xf] %v3701_v2  ;;  %v3518_v49 = vor.u32 %v3516_v24, %v3515_v50  ;;  %v3697_v56 = vld [vmem:[#allocation2 + $0xa4] sm:$0x1] }
 0x343   : > { %3864 = vst [vmem:[#allocation2 + $0x90] sm:$0x1] %v3863_v22  ;;  %3695 = vst [vmem:[#allocation2 + $0x9c] sm:$0xf] %v3694_v47  ;;  %v3520_v55 = vrot.slane %v3515_v50, 4  ;;  %v7796_v27 = vrot.slane %v3892_v40, 11 }
 0x344   : > { %3861 = vst [vmem:[#allocation2 + $0x84] sm:$0x1] %v3860_v35  ;;  %v3539_v39 = vshrl.u32 %v8109_v29, 16  ;;  %v3542_v10 = vshll.u32 %v8109_v29, 16  ;;  %v4007_v13 = vld [vmem:[#allocation2 + $0x98] sm:$0x1]  ;;  %v3519_v18 = vsel %vm10804_vm14, %v3511_v0, %v3518_v49 }
 0x345   : > { %v3891_v3 = vld [vmem:[#allocation2 + $0x88] sm:$0x8]  ;;  %v3705_v31 = vsel %vm10798_vm13, %v3520_v55, %v3704_v32  ;;  %v3498_v61 = vrot.slane %v3496_v1, 7  ;;  %v3180_v36 = vmax.f32 %v3148_v37, 0.0  ;;  %v4008_v51 = vsel %vm10842_vm15, %v7796_v27, %v4007_v13  ;;  %3703 = vst [vmem:[#allocation2 + $0xac] sm:$0xf] %v3519_v18 }
 0x346   : > { %v7795_v60 = vrot.slane %v3891_v3, 11  ;;  %3706 = vst [vmem:[#allocation2 + $0xb0] sm:$0x1] %v3705_v31  ;;  %v11133_v34 = vrot.slane %v3539_v39, 7  ;;  %v3183_v42 = vmax.f32 %v3151_v20, 0.0  ;;  %v3494_v17 = vrot.slane %v11103_v12, 4 }
 0x347   : > { %4009 = vst [vmem:[#allocation2 + $0x98] sm:$0x1] %v4008_v51  ;;  %v4004_v14 = vld [vmem:[#allocation2 + $0x8c] sm:$0x1]  ;;  %v3501_v46 = vor.u32 %v3499_v6, %v3498_v61  ;;  %v3503_v52 = vrot.slane %v3498_v61, 4  ;;  %v8107_v45 = vpack.c.bf16 %v3180_v36, %v3180_v36  ;;  %v3149_v37 = vadd.f32 %v9875_v9, %v11016_v38 }
 0x348   : > { %v3714_v19 = vld [vmem:[#allocation2 + $0xc0] sm:$0xf]  ;;  %v4005_v44 = vsel %vm10842_vm15, %v7795_v60, %v4004_v14  ;;  %v3544_v16 = vor.u32 %v3542_v10, %v11133_v34  ;;  %v8110_v24 = vpack.c.bf16 %v3183_v42, %v3183_v42  ;;  %v3707_v28 = vld [vmem:[#allocation2 + $0xb4] sm:$0xf]  ;;  %v3729_v0 = vld [vmem:[#allocation2 + $0xcc] sm:$0xf] }
 0x349   : > { %4006 = vst [vmem:[#allocation2 + $0x8c] sm:$0x1] %v4005_v44  ;;  %v3502_v33 = vsel %vm10804_vm14, %v3494_v17, %v3501_v46  ;;  %v3698_v30 = vsel %vm10798_vm13, %v3503_v52, %v3697_v56  ;;  %v3522_v12 = vshrl.u32 %v8107_v45, 16  ;;  %v3750_v53 = vld [vmem:[#allocation2 + $0xa8] sm:$0x2]  ;;  %v3525_v26 = vshll.u32 %v8107_v45, 16 }
 0x34a   : > { %v3749_v21 = vld [vmem:[#allocation2 + $0x9c] sm:$0x2]  ;;  %3696 = vst [vmem:[#allocation2 + $0xa0] sm:$0xf] %v3502_v33  ;;  %3699 = vst [vmem:[#allocation2 + $0xa4] sm:$0x1] %v3698_v30  ;;  %v3715_v20 = vsel %vm10791_vm12, %v3544_v16, %v3714_v19 }
 0x34b   : > { %v7780_v50 = vrot.slane %v3750_v53, 9  ;;  %v3868_v38 = vld [vmem:[#allocation2 + $0xa8] sm:$0x1]  ;;  %v7779_v9 = vrot.slane %v3749_v21, 9  ;;  %3716 = vst [vmem:[#allocation2 + $0xc0] sm:$0xf] %v3715_v20 }
 0x34c   : > { %v3524_v8 = vrot.slane %v3522_v12, 7  ;;  %v3547_v22 = vshrl.u32 %v8110_v24, 16  ;;  %v3865_v25 = vld [vmem:[#allocation2 + $0x9c] sm:$0x1]  ;;  %v3181_v2 = vmax.f32 %v3149_v37, 0.0  ;;  %v11146_v47 = vld [vmem:[#allocation2 + $0x84] sm:$0xff]  }
 0x34d   : > { %v3869_v32 = vsel %vm10798_vm13, %v7780_v50, %v3868_v38  ;;  %v3866_v29 = vsel %vm10798_vm13, %v7779_v9, %v3865_v25  ;;  %v3894_v35 = vld [vmem:[#allocation2 + $0xac] sm:$0x8]  ;;  %v3550_v49 = vshll.u32 %v8110_v24, 16  ;;  %v11152_v55 = vld [vmem:[#allocation2 + $0x90] sm:$0xff]   ;;  %8822 = vmatprep.mubr.bf16.mxu1 %v11146_v47  ;;  %v3545_v39 = vrot.slane %v11133_v34, 4 }
 0x34e   : > { %v3527_v40 = vor.u32 %v3525_v26, %v3524_v8  ;;  %3870 = vst [vmem:[#allocation2 + $0xa8] sm:$0x1] %v3869_v32  ;;  %3867 = vst [vmem:[#allocation2 + $0x9c] sm:$0x1] %v3866_v29  ;;  %v7798_v1 = vrot.slane %v3894_v35, 11  ;;  %v3549_v27 = vrot.slane %v3547_v22, 7  ;;  %v8108_v6 = vpack.c.bf16 %v3181_v2, %v3181_v2  ;;  %8823 = vmatmul.mubr.bf16.gmra.mrb[16].mxu1 %v11152_v55 }
 0x34f   : > { %v4013_v56 = vld [vmem:[#allocation2 + $0xb0] sm:$0x1]  ;;  %v3718_v3 = vld [vmem:[#allocation2 + $0xc8] sm:$0x1]  ;;  %v3711_v34 = vld [vmem:[#allocation2 + $0xbc] sm:$0x1] }
 0x350   : > { %v3708_v10 = vsel %vm10791_vm12, %v3527_v40, %v3707_v28  ;;  %v3730_v13 = vsel %vm10791_vm12, %v3527_v40, %v3729_v0  ;;  %v4014_v18 = vsel %vm10842_vm15, %v7798_v1, %v4013_v56  ;;  %v3552_v31 = vor.u32 %v3550_v49, %v3549_v27  ;;  %v3733_v52 = vld [vmem:[#allocation2 + $0xd4] sm:$0x1] }
 0x351   : > { %3709 = vst [vmem:[#allocation2 + $0xb4] sm:$0xf] %v3708_v10  ;;  %3731 = vst [vmem:[#allocation2 + $0xcc] sm:$0xf] %v3730_v13  ;;  %v3554_v61 = vrot.slane %v3549_v27, 4  ;;  %v3530_v36 = vshrl.u32 %v8108_v6, 16 }
 0x352   : > { %4015 = vst [vmem:[#allocation2 + $0xb0] sm:$0x1] %v4014_v18  ;;  %v3893_v51 = vld [vmem:[#allocation2 + $0xa0] sm:$0x8]  ;;  %v3533_v60 = vshll.u32 %v8108_v6, 16  ;;  %v3553_v54 = vsel %vm10804_vm14, %v3545_v39, %v3552_v31  ;;  %v3528_v24 = vrot.slane %v3524_v8, 4 }
 0x353   : > { %v7797_v42 = vrot.slane %v3893_v51, 11  ;;  %v3752_v14 = vld [vmem:[#allocation2 + $0xc0] sm:$0x2]  ;;  %v3719_v17 = vsel %vm10798_vm13, %v3554_v61, %v3718_v3  ;;  %v3532_v46 = vrot.slane %v3530_v36, 7  ;;  %v4010_v19 = vld [vmem:[#allocation2 + $0xa4] sm:$0x1] }
 0x354   : > { %v7782_v45 = vrot.slane %v3752_v14, 9  ;;  %3717 = vst [vmem:[#allocation2 + $0xc4] sm:$0xf] %v3553_v54  ;;  %3720 = vst [vmem:[#allocation2 + $0xc8] sm:$0x1] %v3719_v17  ;;  %v9815_v13 = vld [vmem:[#allocation2] sm:$0xff]  }
 0x355   : > { %v4011_v44 = vsel %vm10842_vm15, %v7797_v42, %v4010_v19  ;;  %v3874_v16 = vld [vmem:[#allocation2 + $0xc0] sm:$0x1]  ;;  %v3535_v37 = vor.u32 %v3533_v60, %v3532_v46  ;;  %v3537_v33 = vrot.slane %v3532_v46, 4  ;;  %v11179_v26 = vld [vmem:[#allocation2 + $0xa8] sm:$0xff]   ;;  %v9818_v31 = vld [vmem:[%s11981_s3 + $0x190] sm:$0xff]  }
 0x356   : > { %4012 = vst [vmem:[#allocation2 + $0xa4] sm:$0x1] %v4011_v44  ;;  %v3875_v30 = vsel %vm10798_vm13, %v7782_v45, %v3874_v16  ;;  %v11171_v12 = vld [vmem:[#allocation2 + $0x9c] sm:$0xff]   ;;  %v9817_v3 = vld [vmem:[%s11981_s3 + $0x188] sm:$0xff]   ;;  %v9822_v51 = vld [vmem:[%s11981_s3 + $0x1b0] sm:$0xff]  }
 0x357   : > { %3876 = vst [vmem:[#allocation2 + $0xc0] sm:$0x1] %v3875_v30  ;;  %v3536_v53 = vsel %vm10804_vm14, %v3528_v24, %v3535_v37  ;;  %v3712_v21 = vsel %vm10798_vm13, %v3537_v33, %v3711_v34  ;;  %v3734_v20 = vsel %vm10798_vm13, %v3537_v33, %v3733_v52  ;;  %8826 = vmatprep.mubr.bf16.mxu1 %v11171_v12  ;;  %v9876_v18 = vld [vmem:[#allocation2 + $0xc] sm:$0xff]   ;;  %v9819_v61 = vld [vmem:[%s11981_s3 + $0x198] sm:$0xff]   ;;  %v9824_v34 = vld [vmem:[%s11981_s3 + $0x40] sm:$0xff]  }
 0x358   : > { %v3751_v28 = vld [vmem:[#allocation2 + $0xb4] sm:$0x2]  ;;  %v3753_v0 = vld [vmem:[#allocation2 + $0xcc] sm:$0x2]  ;;  %3710 = vst [vmem:[#allocation2 + $0xb8] sm:$0xf] %v3536_v53  ;;  %8827 = vmatmul.mubr.bf16.gmra.mrb[20].mxu1 %v11179_v26 }
 0x359   : > { %3713 = vst [vmem:[#allocation2 + $0xbc] sm:$0x1] %v3712_v21  ;;  %3732 = vst [vmem:[#allocation2 + $0xd0] sm:$0xf] %v3536_v53  ;;  %v7781_v50 = vrot.slane %v3751_v28, 9  ;;  %v7783_v38 = vrot.slane %v3753_v0, 9 }
 0x35a   : > { %3735 = vst [vmem:[#allocation2 + $0xd4] sm:$0x1] %v3734_v20  ;;  %v3871_v57 = vld [vmem:[#allocation2 + $0xb4] sm:$0x1]  ;;  %v3877_v9 = vld [vmem:[#allocation2 + $0xcc] sm:$0x1] }
 0x35b   : > { %v3872_v8 = vsel %vm10798_vm13, %v7781_v50, %v3871_v57  ;;  %v3878_v22 = vsel %vm10798_vm13, %v7783_v38, %v3877_v9  ;;  %v3896_v25 = vld [vmem:[#allocation2 + $0xc4] sm:$0x8]  ;;  %v4019_v32 = vld [vmem:[#allocation2 + $0xc8] sm:$0x1]  ;;  %v9823_v60 = vld [vmem:[%s11981_s3 + $0x1b8] sm:$0xff]  }
 0x35c   : > { %3873 = vst [vmem:[#allocation2 + $0xb4] sm:$0x1] %v3872_v8  ;;  %3879 = vst [vmem:[#allocation2 + $0xcc] sm:$0x1] %v3878_v22  ;;  %v7800_v2 = vrot.slane %v3896_v25, 11  ;;  %v9821_v36 = vld [vmem:[%s11981_s3 + $0x1a8] sm:$0xff]  }
 0x35d   : > { %v11237_v42 = vld [vmem:[#allocation2 + $0x40] sm:$0xf]  ;;  %v9825_v14 = vld [vmem:[%s11981_s3 + $0x48] sm:$0xff]   ;;  %v11242_v54 = vld [vmem:[#allocation2 + $0x44] sm:$0x1] }
 0x35e   : > { %v4020_v29 = vsel %vm10842_vm15, %v7800_v2, %v4019_v32  ;;  %v11195_v10 = vld [vmem:[#allocation2 + $0xc0] sm:$0xff]   ;;  %v11244_v17 = vld [vmem:[#allocation2 + $0x4c] sm:$0xf]  ;;  %v11246_v46 = vld [vmem:[#allocation2 + $0x50] sm:$0x1]  ;;  %v6313_v45 = vrot.slane %v11237_v42, 5 }
 0x35f   : > { %4021 = vst [vmem:[#allocation2 + $0xc8] sm:$0x1] %v4020_v29  ;;  %v3895_v35 = vld [vmem:[#allocation2 + $0xb8] sm:$0x8]  ;;  %v6215_v52 = vld [vmem:[#allocation2 + $0x3c] sm:$0xe] }
 0x360   : > { %v3897_v40 = vld [vmem:[#allocation2 + $0xd0] sm:$0x8]  ;;  %v7799_v49 = vrot.slane %v3895_v35, 11  ;;  %v4016_v27 = vld [vmem:[#allocation2 + $0xbc] sm:$0x1]  ;;  %v6316_v37 = vrot.slane %v11242_v54, 5 }
 0x361   : > { %v7801_v1 = vrot.slane %v3897_v40, 11  ;;  %v4022_v6 = vld [vmem:[#allocation2 + $0xd4] sm:$0x1]  ;;  %v11249_v19 = vld [vmem:[#allocation2 + $0x58] sm:$0xf]  ;;  %v7971_v53 = vrot.slane %v6215_v52, 9 }
 0x362   : > { %v4017_v56 = vsel %vm10842_vm15, %v7799_v49, %v4016_v27  ;;  %v6216_v44 = vld [vmem:[#allocation2 + $0x48] sm:$0xe]  ;;  %v9826_v16 = vld [vmem:[%s11981_s3 + $0x50] sm:$0xff]   ;;  %v11256_v24 = vld [vmem:[#allocation2 + $0x5c] sm:$0x1]  ;;  %v6315_v21 = vrot.slane %v6313_v45, 4 }
 0x363   : > { %v4023_v41 = vsel %vm10842_vm15, %v7801_v1, %v4022_v6  ;;  %4018 = vst [vmem:[#allocation2 + $0xbc] sm:$0x1] %v4017_v56  ;;  %v11193_v39 = vld [vmem:[#allocation2 + $0xb4] sm:$0xff]   ;;  %v11259_v30 = vld [vmem:[#allocation2 + $0x64] sm:$0xf]  ;;  %v7972_v20 = vrot.slane %v6216_v44, 9  ;;  %v6314_v38 = vsel %vm10509_vm6, %v7971_v53, %v6313_v45 }
 0x364   : > { %4024 = vst [vmem:[#allocation2 + $0xd4] sm:$0x1] %v4023_v41  ;;  %8830 = vmatprep.mubr.bf16.mxu1 %v11193_v39  ;;  %v6217_v33 = vld [vmem:[#allocation2 + $0x54] sm:$0xe]  ;;  %v6320_v28 = vrot.slane %v11244_v17, 5  ;;  %v6317_v57 = vsel %vm10509_vm6, %v6315_v21, %v6316_v37  ;;  %v6327_v8 = vrot.slane %v11249_v19, 5 }
 0x365   : > { %8831 = vmatmul.mubr.bf16.gmra.mrb[24].mxu1 %v11195_v10  ;;  %v6218_v0 = vld [vmem:[#allocation2 + $0x60] sm:$0xe]  ;;  %v11265_v50 = vld [vmem:[#allocation2 + $0x70] sm:$0xf]  ;;  %v7973_v9 = vrot.slane %v6217_v33, 9  ;;  %v11276_v32 = vcombine.low %v6314_v38, %v6317_v57  ;;  %v6330_v40 = vrot.slane %v11256_v24, 5 }
 0x366   : > { %8850 = vmatprep.mubr.bf16.mxu1 %v9815_v13  ;;  %v6219_v22 = vld [vmem:[#allocation2 + $0x6c] sm:$0xe]  ;;  %v11272_v25 = vld [vmem:[#allocation2 + $0x74] sm:$0x1]  ;;  %v11274_v2 = vld [vmem:[#allocation2 + $0x7c] sm:$0xf]  ;;  %v6321_v29 = vsel %vm10509_vm6, %v7972_v20, %v6320_v28 }
 0x367   : > { %12051 = vst [vmem:[#allocation3_spill] sm:$0xff] %v11276_v32  ;;  %v6322_v35 = vrot.slane %v6320_v28, 4  ;;  %v9827_v49 = vld [vmem:[%s11981_s3 + $0x58] sm:$0xff]   ;;  %v11284_v1 = vld [vmem:[#allocation2 + $0x80] sm:$0x1]  ;;  %v6328_v27 = vsel %vm10509_vm6, %v7973_v9, %v6327_v8  ;;  %v6329_v6 = vrot.slane %v6327_v8, 4 }
 0x368   : > { %v7974_v56 = vrot.slane %v6218_v0, 9  ;;  %v6334_v41 = vrot.slane %v11259_v30, 5  ;;  %v11305_v52 = vld [vmem:[#allocation2 + $0x94] sm:$0xf]  ;;  %v6344_v37 = vrot.slane %v11272_v25, 5  ;;  %v9828_v33 = vld [vmem:[%s11981_s3 + $0x60] sm:$0xff]  }
 0x369   : > { %v11315_v53 = vld [vmem:[#allocation2 + $0x98] sm:$0x1]  ;;  %v6348_v21 = vrot.slane %v11274_v2, 5  ;;  %v6351_v20 = vrot.slane %v11284_v1, 5  ;;  %v11321_v28 = vld [vmem:[#allocation2 + $0xa0] sm:$0xf] }
 0x36a   : > { %v6222_v9 = vld [vmem:[#allocation2 + $0x90] sm:$0xe] }
 0x36d   : > { %8851 = vmatmul.mubr.bf16.vlgmr.msra.gmra.mrb[28].mxu1 %v9876_v18  ;;  %v7975_v18 = vrot.slane %v6219_v22, 9  ;;  %v6350_v22 = vrot.slane %v6348_v21, 4 }
 0x36e   : > { %8883 = vmatpush3.bf16.msra.mxu1 %v11091_v11  ;;  %8854 = vmatprep.mubr.bf16.mxu1 %v9877_v4  ;;  %v9820_v11 = vld [vmem:[%s11981_s3 + $0x1a0] sm:$0xff]  }
 0x36f   : > { %8884 = vmatprep.subr.bf16.mxu1 %v9817_v3 }
 0x372   : > { %8885 = vmatpush3.bf16.msra.mxu1 %v9817_v3 }
 0x373   : > { %8886 = vmatprep.subr.bf16.mxu1 %v9818_v31 }
 0x375   : > { %8855 = vmatmul.mubr.bf16.gmra.mrb[0].mxu1 %v10932_v23 }
 0x376   : > { %8858 = vmatprep.mubr.bf16.mxu1 %v10943_v5  ;;  %8887 = vmatpush3.bf16.msra.mxu1 %v9818_v31  ;;  %v6220_v31 = vld [vmem:[#allocation2 + $0x78] sm:$0xe] }
 0x377   : > { %8888 = vmatprep.subr.bf16.mxu1 %v9819_v61 }
 0x37a   : > { %8889 = vmatpush3.bf16.msra.mxu1 %v9819_v61  ;;  %v11294_v61 = vld [vmem:[#allocation2 + $0x88] sm:$0xf] }
 0x37b   : > { %8890 = vmatprep.subr.bf16.mxu1 %v9820_v11  ;;  %v6355_v57 = vrot.slane %v11294_v61, 5 }
 0x37d   : > { %8859 = vmatmul.mubr.bf16.gmra.mrb[4].mxu1 %v10993_v15 }
 0x37e   : > { %8862 = vmatprep.mubr.bf16.mxu1 %v10985_v43  ;;  %8891 = vmatpush3.bf16.msra.mxu1 %v9820_v11 }
 0x37f   : > { %8892 = vmatprep.subr.bf16.mxu1 %v9821_v36 }
 0x382   : > { %8893 = vmatpush3.bf16.msra.mxu1 %v9821_v36  ;;  %v6331_v36 = vsel %vm10509_vm6, %v6329_v6, %v6330_v40  ;;  %v11331_v40 = vld [vmem:[#allocation2 + $0xa4] sm:$0x1] }
 0x383   : > { %8894 = vmatprep.subr.bf16.mxu1 %v9822_v51 }
 0x385   : > { %8863 = vmatmul.mubr.bf16.gmra.mrb[8].mxu1 %v11069_v48 }
 0x386   : > { %8866 = vmatprep.mubr.bf16.mxu1 %v11064_v7  ;;  %8895 = vmatpush3.bf16.msra.mxu1 %v9822_v51  ;;  %v6335_v51 = vsel %vm10509_vm6, %v7974_v56, %v6334_v41 }
 0x387   : > { %8896 = vmatprep.subr.bf16.mxu1 %v9823_v60 }
 0x38a   : > { %8897 = vmatpush3.bf16.msra.mxu1 %v9823_v60  ;;  %v6336_v60 = vrot.slane %v6334_v41, 4  ;;  %v6357_v41 = vrot.slane %v6355_v57, 4 }
 0x38b   : > { %8930 = vmatprep.subr.bf16.mxu1 %v9824_v34 }
 0x38d   : > { %8867 = vmatmul.mubr.bf16.gmra.mrb[12].mxu1 %v11113_v62 }
 0x38e   : > { %8870 = vmatprep.mubr.bf16.mxu1 %v11121_v59 }
 0x395   : > { %8871 = vmatmul.mubr.bf16.gmra.mrb[16].mxu1 %v11146_v47 }
 0x396   : > { %8874 = vmatprep.mubr.bf16.mxu1 %v11152_v55 }
 0x39d   : > { %8875 = vmatmul.mubr.bf16.gmra.mrb[20].mxu1 %v11171_v12 }
 0x39e   : > { %8878 = vmatprep.mubr.bf16.mxu1 %v11179_v26 }
 0x3a5   : > { %8879 = vmatmul.mubr.bf16.gmra.mrb[24].mxu1 %v11193_v39 }
 0x3a6   : > { %8898 = vmatprep.mubr.bf16.mxu1 %v9877_v4  ;;  %v6341_v4 = vrot.slane %v11265_v50, 5 }
 0x3a8   : > { %v6342_v45 = vsel %vm10509_vm6, %v7975_v18, %v6341_v4  ;;  %v6343_v44 = vrot.slane %v6341_v4, 4  ;;  %v11343_v18 = vld [vmem:[#allocation2 + $0xb0] sm:$0x1]  ;;  %v7978_v4 = vrot.slane %v6222_v9, 9  ;;  %v11367_v9 = vld [vmem:[#allocation2 + $0xc4] sm:$0xf] }
 0x3aa   : > { %v6345_v0 = vsel %vm10509_vm6, %v6343_v44, %v6344_v37  ;;  %v6224_v37 = vld [vmem:[#allocation2 + $0xa8] sm:$0xe] }
 0x3ab   : > { %v11328_v8 = vcombine.low %v6342_v45, %v6345_v0  ;;  %v6372_v0 = vrot.slane %v11331_v40, 5 }
 0x3ad   : > { %8899 = vmatmul.mubr.bf16.vlgmr.msra.gmra.mrb[28].mxu1 %v10932_v23  ;;  %v11261_v23 = vld [vmem:[#allocation2 + $0x68] sm:$0x1]  ;;  %12055 = vst [vmem:[#allocation7_spill] sm:$0xff] %v11328_v8 }
 0x3ae   : > { %8931 = vmatpush3.bf16.msra.mxu1 %v9824_v34  ;;  %8902 = vmatprep.mubr.bf16.mxu1 %v10943_v5  ;;  %v6323_v5 = vrot.slane %v11246_v46, 5  ;;  %v6337_v3 = vrot.slane %v11261_v23, 5  ;;  %v6221_v34 = vld [vmem:[#allocation2 + $0x84] sm:$0xe] }
 0x3af   : > { %8932 = vmatprep.subr.bf16.mxu1 %v9825_v14  ;;  %v7977_v38 = vrot.slane %v6221_v34, 9 }
 0x3b0   : > { %v6324_v13 = vsel %vm10509_vm6, %v6322_v35, %v6323_v5  ;;  %v6223_v35 = vld [vmem:[#allocation2 + $0x9c] sm:$0xe] }
 0x3b1   : > { %v11296_v11 = vcombine.low %v6321_v29, %v6324_v13  ;;  %v6356_v56 = vsel %vm10509_vm6, %v7977_v38, %v6355_v57  ;;  %v6362_v13 = vrot.slane %v11305_v52, 5  ;;  %v7979_v44 = vrot.slane %v6223_v35, 9  ;;  %v6225_v38 = vld [vmem:[#allocation2 + $0xb4] sm:$0xe] }
 0x3b2   : > { %8933 = vmatpush3.bf16.msra.mxu1 %v9825_v14  ;;  %v11303_v14 = vld [vmem:[#allocation2 + $0x8c] sm:$0x1]  ;;  %v9830_v57 = vld [vmem:[%s11981_s3 + $0x70] sm:$0xff]   ;;  %v6379_v35 = vrot.slane %v11343_v18, 5 }
 0x3b3   : > { %8934 = vmatprep.subr.bf16.mxu1 %v9826_v16  ;;  %12052 = vst [vmem:[#allocation4_spill] sm:$0xff] %v11296_v11  ;;  %v6358_v29 = vrot.slane %v11303_v14, 5  ;;  %v6364_v45 = vrot.slane %v6362_v13, 4 }
 0x3b5   : > { %8903 = vmatmul.mubr.bf16.gmra.mrb[0].mxu1 %v10993_v15  ;;  %v11307_v15 = vcombine.low %v6328_v27, %v6331_v36  ;;  %v11333_v27 = vld [vmem:[#allocation2 + $0xac] sm:$0xf]  ;;  %v6369_v36 = vrot.slane %v11321_v28, 5  ;;  %v6359_v34 = vsel %vm10509_vm6, %v6357_v41, %v6358_v29  ;;  %v7980_v41 = vrot.slane %v6224_v37, 9 }
 0x3b6   : > { %8906 = vmatprep.mubr.bf16.mxu1 %v10985_v43  ;;  %8935 = vmatpush3.bf16.msra.mxu1 %v9826_v16  ;;  %v6338_v43 = vsel %vm10509_vm6, %v6336_v60, %v6337_v3  ;;  %v7976_v16 = vrot.slane %v6220_v31, 9  ;;  %v9829_v3 = vld [vmem:[%s11981_s3 + $0x68] sm:$0xff]   ;;  %v6365_v31 = vrot.slane %v11315_v53, 5  ;;  %v6376_v29 = vrot.slane %v11333_v27, 5 }
 0x3b7   : > { %12053 = vst [vmem:[#allocation5_spill] sm:$0xff] %v11307_v15  ;;  %8936 = vmatprep.subr.bf16.mxu1 %v9827_v49  ;;  %v11323_v5 = vcombine.low %v6335_v51, %v6338_v43  ;;  %v11349_v51 = vld [vmem:[#allocation2 + $0xb8] sm:$0xf]  ;;  %v11356_v43 = vld [vmem:[#allocation2 + $0xbc] sm:$0x1] }
 0x3b8   : > { %v6349_v6 = vsel %vm10509_vm6, %v7976_v16, %v6348_v21  ;;  %v11358_v16 = vcombine.low %v6356_v56, %v6359_v34  ;;  %v6363_v21 = vsel %vm10509_vm6, %v7978_v4, %v6362_v13  ;;  %v6383_v13 = vrot.slane %v11349_v51, 5  ;;  %v6226_v34 = vld [vmem:[#allocation2 + $0xc0] sm:$0xe] }
 0x3b9   : > { %12054 = vst [vmem:[#allocation6_spill] sm:$0xff] %v11323_v5  ;;  %v6378_v4 = vrot.slane %v6376_v29, 4 }
 0x3ba   : > { %8937 = vmatpush3.bf16.msra.mxu1 %v9827_v49  ;;  %v6352_v49 = vsel %vm10509_vm6, %v6350_v22, %v6351_v20  ;;  %12057 = vst [vmem:[#allocation9_spill] sm:$0xff] %v11358_v16  ;;  %v6371_v20 = vrot.slane %v6369_v36, 4  ;;  %v6370_v22 = vsel %vm10509_vm6, %v7979_v44, %v6369_v36  ;;  %v6386_v36 = vrot.slane %v11356_v43, 5 }
 0x3bb   : > { %8938 = vmatprep.subr.bf16.mxu1 %v9828_v33  ;;  %v11351_v60 = vcombine.low %v6349_v6, %v6352_v49  ;;  %v11375_v6 = vld [vmem:[#allocation2 + $0xc8] sm:$0x1]  ;;  %v6377_v44 = vsel %vm10509_vm6, %v7980_v41, %v6376_v29  ;;  %v6380_v37 = vsel %vm10509_vm6, %v6378_v4, %v6379_v35 }
 0x3bc   : > { %v6373_v56 = vsel %vm10509_vm6, %v6371_v20, %v6372_v0  ;;  %v6718_v0 = vrot.slane %v11375_v6, 5  ;;  %v11401_v29 = vcombine.low %v6377_v44, %v6380_v37 }
 0x3bd   : > { %12056 = vst [vmem:[#allocation8_spill] sm:$0xff] %v11351_v60  ;;  %8907 = vmatmul.mubr.bf16.gmra.mrb[4].mxu1 %v11069_v48  ;;  %v6366_v48 = vsel %vm10509_vm6, %v6364_v45, %v6365_v31  ;;  %v11384_v49 = vcombine.low %v6370_v22, %v6373_v56  ;;  %v7981_v31 = vrot.slane %v6225_v38, 9  ;;  %v11387_v45 = vld [vmem:[#allocation2 + $0xd4] sm:$0x1]  ;;  %v9831_v22 = vld [vmem:[%s11981_s3 + $0x78] sm:$0xff]   ;;  %v8022_v56 = vrot.slane %v6226_v34, 9 }
 0x3be   : > { %8910 = vmatprep.mubr.bf16.mxu1 %v11064_v7  ;;  %8939 = vmatpush3.bf16.msra.mxu1 %v9828_v33  ;;  %v11377_v7 = vld [vmem:[#allocation2 + $0xd0] sm:$0xf]  ;;  %v11379_v33 = vcombine.low %v6363_v21, %v6366_v48  ;;  %v6385_v21 = vrot.slane %v6383_v13, 4  ;;  %v6715_v48 = vrot.slane %v11367_v9, 5  ;;  %12060 = vst [vmem:[#allocation12_spill] sm:$0xff] %v11401_v29 }
 0x3bf   : > { %8940 = vmatprep.subr.bf16.mxu1 %v9829_v3  ;;  %12059 = vst [vmem:[#allocation11_spill] sm:$0xff] %v11384_v49  ;;  %v6384_v20 = vsel %vm10509_vm6, %v7981_v31, %v6383_v13  ;;  %v6987_v38 = vrot.slane %v11377_v7, 5  ;;  %v6990_v31 = vrot.slane %v11387_v45, 5  ;;  %v11453_v29 = vld [vmem:[#allocation2 + $0x28] sm:$0xf] }
 0x3c0   : > { %12058 = vst [vmem:[#allocation10_spill] sm:$0xff] %v11379_v33  ;;  %v6227_v33 = vld [vmem:[#allocation2 + $0xcc] sm:$0xe]  ;;  %v6717_v41 = vrot.slane %v6715_v48, 4  ;;  %v6716_v49 = vsel %vm10509_vm6, %v8022_v56, %v6715_v48  ;;  %v11438_v56 = vld [vmem:[#allocation2 + $0x10] sm:$0xf] }
 0x3c1   : > { %v8048_v4 = vrot.slane %v6227_v33, 9  ;;  %v6989_v13 = vrot.slane %v6987_v38, 4  ;;  %12065 = vst [vmem:[#allocation17_spill] sm:$0xff] %v11438_v56  ;;  %12068 = vst [vmem:[#allocation20_spill] sm:$0xff] %v11453_v29 }
 0x3c2   : > { %8941 = vmatpush3.bf16.msra.mxu1 %v9829_v3  ;;  %v6387_v3 = vsel %vm10509_vm6, %v6385_v21, %v6386_v36  ;;  %v6719_v44 = vsel %vm10509_vm6, %v6717_v41, %v6718_v0  ;;  %v4881_v0 = vld [vmem:[#allocation2 + $0xc] sm:$0xf] }
 0x3c3   : > { %8942 = vmatprep.subr.bf16.mxu1 %v9830_v57  ;;  %v11405_v35 = vcombine.low %v6384_v20, %v6387_v3  ;;  %v11414_v36 = vcombine.low %v6716_v49, %v6719_v44  ;;  %v11418_v34 = vsel %vm10509_vm6, %v8048_v4, %v6987_v38  ;;  %v11422_v33 = vsel %vm10509_vm6, %v6989_v13, %v6990_v31  ;;  %v11433_v49 = vld [vmem:[#allocation2 + $0x4] sm:$0xf]  ;;  %v4884_v31 = vld [vmem:[#allocation2 + $0x18] sm:$0xf] }
 0x3c4   : > { %12063 = vst [vmem:[#allocation15_spill] sm:$0xff] %v11418_v34  ;;  %12064 = vst [vmem:[#allocation16_spill] sm:$0xff] %v11422_v33  ;;  %v4942_v37 = vshll.u32 %v11433_v49, 16  ;;  %v4946_v20 = vshrl.u32 %v11433_v49, 16  ;;  %v4957_v41 = vshrl.u32 %v4881_v0, 16  ;;  %v4960_v4 = vshll.u32 %v4881_v0, 16 }
 0x3c5   : > { %12061 = vst [vmem:[#allocation13_spill] sm:$0xff] %v11405_v35  ;;  %8911 = vmatmul.mubr.bf16.gmra.mrb[8].mxu1 %v11113_v62  ;;  %12062 = vst [vmem:[#allocation14_spill] sm:$0xff] %v11414_v36  ;;  %v11427_v62 = vld [vmem:[%s11981_s3 + $0x100] sm:$0xff]   ;;  %v4981_v33 = vshrl.u32 %v4884_v31, 16  ;;  %v4984_v34 = vshll.u32 %v4884_v31, 16 }
 0x3c6   : > { %8914 = vmatprep.mubr.bf16.mxu1 %v11121_v59  ;;  %8943 = vmatpush3.bf16.msra.mxu1 %v9830_v57  ;;  %v4878_v57 = vld [vmem:[#allocation2] sm:$0xf]  ;;  %v4948_v13 = vrot.slane %v4946_v20, 4  ;;  %v4962_v59 = vrot.slane %v4960_v4, 5  ;;  %v4887_v36 = vld [vmem:[#allocation2 + $0x24] sm:$0xf] }
 0x3c7   : > { %8944 = vmatprep.subr.bf16.mxu1 %v9831_v22  ;;  %v4933_v21 = vshrl.u32 %v4878_v57, 16  ;;  %v4936_v48 = vshll.u32 %v4878_v57, 16  ;;  %v4970_v57 = vshrl.u32 %v11438_v56, 16  ;;  %v5008_v16 = vshll.u32 %v4887_v36, 16 }
 0x3c8   : > { %v4983_v4 = vrot.slane %v4981_v33, 4  ;;  %v4986_v31 = vrot.slane %v4984_v34, 5 }
 0x3c9   : > { %v4935_v38 = vrot.slane %v4933_v21, 4  ;;  %v4938_v3 = vrot.slane %v4936_v48, 5  ;;  %v4959_v48 = vrot.slane %v4957_v41, 4 }
 0x3ca   : > { %8945 = vmatpush3.bf16.msra.mxu1 %v9831_v22  ;;  %v11440_v22 = vld [vmem:[#allocation2 + $0x8] sm:$0x1] }
 0x3cb   : > { %8978 = vmatprep.subr.bf16.mxu1 %v11427_v62  ;;  %v4939_v44 = vor.u32 %v4938_v3, %v4935_v38  ;;  %v4952_v21 = vshll.u32 %v11440_v22, 16  ;;  %v11451_v38 = vld [vmem:[#allocation2 + $0x1c] sm:$0xf]  ;;  %v4963_v60 = vor.u32 %v4962_v59, %v4959_v48  ;;  %v4890_v59 = vld [vmem:[#allocation2 + $0x30] sm:$0xf]  ;;  %v5010_v48 = vrot.slane %v5008_v16, 5 }
 0x3cc   : > { %12067 = vst [vmem:[#allocation19_spill] sm:$0xff] %v11451_v38  ;;  %v5029_v32 = vshrl.u32 %v4890_v59, 16 }
 0x3cd   : > { %8915 = vmatmul.mubr.bf16.gmra.mrb[12].mxu1 %v11146_v47  ;;  %v4944_v47 = vrot.slane %v4942_v37, 5  ;;  %v11447_v37 = vld [vmem:[#allocation2 + $0x14] sm:$0x1]  ;;  %v4940_v20 = vrot.slane %v4939_v44, 4  ;;  %v4954_v3 = vrot.slane %v4952_v21, 5  ;;  %v4990_v44 = vshll.u32 %v11451_v38, 16 }
 0x3ce   : > { %8918 = vmatprep.mubr.bf16.mxu1 %v11152_v55  ;;  %v4966_v55 = vshll.u32 %v11438_v56, 16  ;;  %12066 = vst [vmem:[#allocation18_spill] sm:$0xff] %v11447_v37  ;;  %v4976_v41 = vshll.u32 %v11447_v37, 16  ;;  %v4964_v5 = vrot.slane %v4963_v60, 4  ;;  %v5032_v37 = vshll.u32 %v4890_v59, 16 }
 0x3cf   : > { %v4949_v0 = vor.u32 %v4948_v13, %v4944_v47  ;;  %v11456_v13 = vld [vmem:[#allocation2 + $0x20] sm:$0x1]  ;;  %v11472_v56 = vld [vmem:[#allocation2 + $0x2c] sm:$0x1]  ;;  %v5031_v59 = vrot.slane %v5029_v32, 4 }
 0x3d0   : > { %v11449_v35 = vrot.slane %v4966_v55, 5  ;;  %12069 = vst [vmem:[#allocation21_spill] sm:$0xff] %v11456_v13  ;;  %v4994_v55 = vshrl.u32 %v11451_v38, 16  ;;  %v4978_v15 = vrot.slane %v4976_v41, 5  ;;  %v5000_v11 = vshll.u32 %v11456_v13, 16  ;;  %12071 = vst [vmem:[#allocation23_spill] sm:$0xff] %v11472_v56 }
 0x3d1   : > { %v4950_v8 = vrot.slane %v4949_v0, 4  ;;  %v5018_v0 = vshrl.u32 %v11453_v29, 16  ;;  %v4893_v41 = vld [vmem:[#allocation2 + $0x3c] sm:$0xf] }
 0x3d3   : > { %v4955_v34 = vsel %vm10068_vm3, %v4950_v8, %v4954_v3  ;;  %v5020_v16 = vrot.slane %v5018_v0, 4  ;;  %v5053_v0 = vshrl.u32 %v4893_v41, 16 }
 0x3d5   : > { %8919 = vmatmul.mubr.bf16.gmra.mrb[16].mxu1 %v11171_v12  ;;  %v4972_v12 = vrot.slane %v4970_v57, 4  ;;  %v4945_v57 = vsel %vm10068_vm3, %v4940_v20, %v4944_v47  ;;  %v11470_v47 = vld [vmem:[#allocation2 + $0x34] sm:$0xf]  ;;  %v4992_v20 = vrot.slane %v4990_v44, 5 }
 0x3d6   : > { %8922 = vmatprep.mubr.bf16.mxu1 %v11179_v26  ;;  %v5005_v26 = vshrl.u32 %v4887_v36, 16  ;;  %v5014_v36 = vshll.u32 %v11453_v29, 16  ;;  %12070 = vst [vmem:[#allocation22_spill] sm:$0xff] %v11470_v47  ;;  %v7892_v38 = vcombine.low %v4945_v57, %v4955_v34  ;;  %v5042_v60 = vshrl.u32 %v11470_v47, 16 }
 0x3d7   : > { %v4973_v21 = vor.u32 %v4972_v12, %v11449_v35  ;;  %v4996_v12 = vrot.slane %v4994_v55, 4  ;;  %v5002_v57 = vrot.slane %v5000_v11, 5  ;;  %v5034_v34 = vrot.slane %v5032_v37, 5 }
 0x3d8   : > { %v5007_v33 = vrot.slane %v5005_v26, 4  ;;  %v5016_v8 = vrot.slane %v5014_v36, 5  ;;  %v5038_v26 = vshll.u32 %v11470_v47, 16  ;;  %v5024_v36 = vshll.u32 %v11472_v56, 16 }
 0x3d9   : > { %v5056_v47 = vshll.u32 %v4893_v41, 16  ;;  %v5062_v29 = vshll.u32 %v11237_v42, 16  ;;  %v5044_v11 = vrot.slane %v5042_v60, 4  ;;  %v5035_v13 = vor.u32 %v5034_v34, %v5031_v59 }
 0x3da   : > { %v5011_v3 = vor.u32 %v5010_v48, %v5007_v33  ;;  %v4896_v33 = vld [vmem:[#allocation2 + $0x48] sm:$0xf]  ;;  %v11482_v48 = vld [vmem:[#allocation2 + $0x38] sm:$0x1]  ;;  %v5026_v56 = vrot.slane %v5024_v36, 5 }
 0x3db   : > { %v5077_v37 = vshrl.u32 %v4896_v33, 16 }
 0x3dd   : > { %8923 = vmatmul.mubr.bf16.gmra.mrb[20].mxu1 %v11193_v39  ;;  %v4987_v39 = vor.u32 %v4986_v31, %v4983_v4  ;;  %v9832_v4 = vld [vmem:[#allocation2 + $0xcc] sm:$0xff]   ;;  %v4969_v31 = vsel %vm10068_vm3, %v4964_v5, %v11449_v35  ;;  %v5066_v5 = vshrl.u32 %v11237_v42, 16  ;;  %v5012_v35 = vrot.slane %v5011_v3, 4 }
 0x3de   : > { %8926 = vmatprep.mubr.bf16.mxu1 %v11195_v10  ;;  %v4974_v10 = vrot.slane %v4973_v21, 4  ;;  %v4997_v21 = vor.u32 %v4996_v12, %v4992_v20  ;;  %v5048_v42 = vshll.u32 %v11482_v48, 16  ;;  %v5055_v3 = vrot.slane %v5053_v0, 4  ;;  %v4899_v0 = vld [vmem:[#allocation2 + $0x54] sm:$0xf] }
 0x3df   : > { %v4988_v55 = vrot.slane %v4987_v39, 4  ;;  %v11486_v39 = vrot.slane %v5038_v26, 5  ;;  %v11497_v26 = vrot.slane %v5062_v29, 5  ;;  %v5068_v60 = vrot.slane %v5066_v5, 4  ;;  %v9834_v29 = vld [vmem:[%s11981_s3 + $0x108] sm:$0xff]  }
 0x3e0   : > { %v4979_v44 = vsel %vm10068_vm3, %v4974_v10, %v4978_v15  ;;  %v5021_v15 = vor.u32 %v5020_v16, %v5016_v8  ;;  %v5080_v10 = vshll.u32 %v4896_v33, 16  ;;  %v4998_v41 = vrot.slane %v4997_v21, 4 }
 0x3e1   : > { %v11488_v12 = vcombine.low %v4969_v31, %v4979_v44  ;;  %v4993_v32 = vsel %vm10068_vm3, %v4988_v55, %v4992_v20  ;;  %v5058_v16 = vrot.slane %v5056_v47, 5  ;;  %v5017_v20 = vsel %vm10068_vm3, %v5012_v35, %v5016_v8 }
 0x3e2   : > { %v5022_v44 = vrot.slane %v5021_v15, 4  ;;  %v5045_v55 = vor.u32 %v5044_v11, %v11486_v39  ;;  %v5086_v21 = vshll.u32 %v11244_v17, 16  ;;  %v5003_v59 = vsel %vm10068_vm3, %v4998_v41, %v5002_v57 }
 0x3e3   : > { %v5079_v47 = vrot.slane %v5077_v37, 4  ;;  %v5082_v34 = vrot.slane %v5080_v10, 5  ;;  %v5090_v33 = vshrl.u32 %v11244_v17, 16  ;;  %v11513_v8 = vcombine.low %v4993_v32, %v5003_v59  ;;  %v4902_v10 = vld [vmem:[#allocation2 + $0x60] sm:$0xf] }
 0x3e4   : > { %v5027_v5 = vsel %vm10068_vm3, %v5022_v44, %v5026_v56  ;;  %v5036_v35 = vrot.slane %v5035_v13, 4  ;;  %v5050_v15 = vrot.slane %v5048_v42, 5  ;;  %v5059_v57 = vor.u32 %v5058_v16, %v5055_v3  ;;  %v9835_v42 = vld [vmem:[%s11981_s3 + $0x110] sm:$0xff]  }
 0x3e5   : > { %8927 = vmatmul.mubr.bf16.gmra.mrb[24].mxu1 %v9832_v4  ;;  %v11492_v4 = vpop.f32.mrb[32].mxu0  ;;  %v11518_v11 = vcombine.low %v5017_v20, %v5027_v5  ;;  %v5069_v41 = vor.u32 %v5068_v60, %v11497_v26  ;;  %v5072_v37 = vshll.u32 %v11242_v54, 16  ;;  %v5046_v17 = vrot.slane %v5045_v55, 4 }
 0x3e6   : > { %8946 = vmatprep.mubr.bf16.mxu1 %v7892_v38  ;;  %v11495_v38 = vpop.f32.mrb[33].mxu0  ;;  %v11524_v32 = vrot.slane %v5086_v21, 5  ;;  %v5101_v56 = vshrl.u32 %v4899_v0, 16  ;;  %v5104_v13 = vshll.u32 %v4899_v0, 16  ;;  %v5083_v3 = vor.u32 %v5082_v34, %v5079_v47  ;;  %v4905_v47 = vld [vmem:[#allocation2 + $0x6c] sm:$0xf] }
 0x3e7   : > { %v11499_v31 = vpop.f32.mrb[34].mxu0  ;;  %v5092_v16 = vrot.slane %v5090_v33, 4  ;;  %v5110_v60 = vshll.u32 %v11249_v19, 16  ;;  %v5114_v54 = vshrl.u32 %v11249_v19, 16  ;;  %v5051_v20 = vsel %vm10068_vm3, %v5046_v17, %v5050_v15  ;;  %v9836_v15 = vld [vmem:[%s11981_s3 + $0x118] sm:$0xff]  }
 0x3e8   : > { %v11505_v36 = vpop.f32.mrb[35].mxu0  ;;  %v5125_v44 = vshrl.u32 %v4902_v10, 16  ;;  %v5128_v55 = vshll.u32 %v4902_v10, 16  ;;  %v5060_v21 = vrot.slane %v5059_v57, 4  ;;  %v5070_v59 = vrot.slane %v5069_v41, 4 }
 0x3e9   : > { %12072 = vst [vmem:[#allocation24_spill] sm:$0xff] %v11505_v36  ;;  %v5074_v0 = vrot.slane %v5072_v37, 5  ;;  %v5096_v5 = vshll.u32 %v11246_v46, 16  ;;  %v5103_v34 = vrot.slane %v5101_v56, 4  ;;  %v5106_v33 = vrot.slane %v5104_v13, 5 }
 0x3ea   : > { %v5134_v19 = vshll.u32 %v11259_v30, 16  ;;  %v5138_v36 = vshrl.u32 %v11259_v30, 16  ;;  %v11543_v57 = vrot.slane %v5110_v60, 5  ;;  %v5116_v41 = vrot.slane %v5114_v54, 4  ;;  %v4908_v54 = vld [vmem:[#allocation2 + $0x78] sm:$0xf] }
 0x3eb   : > { %v5130_v37 = vrot.slane %v5128_v55, 5  ;;  %v5149_v10 = vshrl.u32 %v4905_v47, 16  ;;  %v5065_v30 = vsel %vm10068_vm3, %v5060_v21, %v11497_v26  ;;  %v5075_v17 = vsel %vm10068_vm3, %v5070_v59, %v5074_v0 }
 0x3ec   : > { %v5152_v56 = vshll.u32 %v4905_v47, 16  ;;  %v5098_v13 = vrot.slane %v5096_v5, 5  ;;  %v5140_v60 = vrot.slane %v5138_v36, 4  ;;  %v5117_v26 = vor.u32 %v5116_v41, %v11543_v57 }
 0x3ed   : > { %8947 = vmatmul.mubr.bf16.vlgmr.msra.gmra.mrb[28].mxu1 %v11488_v12  ;;  %v5144_v21 = vshll.u32 %v11261_v23, 16  ;;  %v5151_v59 = vrot.slane %v5149_v10, 4  ;;  %v5158_v36 = vshll.u32 %v11265_v50, 16  ;;  %v5162_v5 = vshrl.u32 %v11265_v50, 16  ;;  %v9838_v50 = vld [vmem:[%s11981_s3 + $0x128] sm:$0xff]  }
 0x3ee   : > { %8979 = vmatpush3.bf16.msra.mxu1 %v11427_v62  ;;  %8950 = vmatprep.mubr.bf16.mxu1 %v11513_v8  ;;  %v5041_v62 = vsel %vm10068_vm3, %v5036_v35, %v11486_v39  ;;  %v5084_v39 = vrot.slane %v5083_v3, 4  ;;  %v5093_v35 = vor.u32 %v5092_v16, %v11524_v32  ;;  %v5107_v3 = vor.u32 %v5106_v33, %v5103_v34 }
 0x3ef   : > { %8980 = vmatprep.subr.bf16.mxu1 %v9834_v29  ;;  %v11545_v46 = vcombine.low %v5041_v62, %v5051_v20  ;;  %v11554_v16 = vrot.slane %v5134_v19, 5  ;;  %v5154_v0 = vrot.slane %v5152_v56, 5  ;;  %v5176_v47 = vshll.u32 %v4908_v54, 16 }
 0x3f0   : > { %v5089_v62 = vsel %vm10068_vm3, %v5084_v39, %v11524_v32  ;;  %v5094_v20 = vrot.slane %v5093_v35, 4  ;;  %v5173_v32 = vshrl.u32 %v4908_v54, 16  ;;  %v11567_v34 = vcombine.low %v5065_v30, %v5075_v17 }
 0x3f1   : > { %v5108_v33 = vrot.slane %v5107_v3, 4  ;;  %v5141_v19 = vor.u32 %v5140_v60, %v11554_v16  ;;  %v5182_v35 = vshll.u32 %v11274_v2, 16  ;;  %v5186_v41 = vshrl.u32 %v11274_v2, 16  ;;  %v4914_v60 = vld [vmem:[#allocation2 + $0x90] sm:$0xf] }
 0x3f2   : > { %8981 = vmatpush3.bf16.msra.mxu1 %v9834_v29  ;;  %v5127_v29 = vrot.slane %v5125_v44, 4  ;;  %v5120_v44 = vshll.u32 %v11256_v24, 16  ;;  %v5099_v24 = vsel %vm10068_vm3, %v5094_v20, %v5098_v13  ;;  %v5146_v30 = vrot.slane %v5144_v21, 5 }
 0x3f3   : > { %8982 = vmatprep.subr.bf16.mxu1 %v9835_v42  ;;  %v11572_v39 = vcombine.low %v5089_v62, %v5099_v24  ;;  %v11579_v17 = vrot.slane %v5158_v36, 5  ;;  %v5164_v56 = vrot.slane %v5162_v5, 4  ;;  %v5175_v13 = vrot.slane %v5173_v32, 4 }
 0x3f4   : > { %v5131_v55 = vor.u32 %v5130_v37, %v5127_v29  ;;  %v5122_v23 = vrot.slane %v5120_v44, 5  ;;  %v4911_v29 = vld [vmem:[#allocation2 + $0x84] sm:$0xf]  ;;  %v5118_v37 = vrot.slane %v5117_v26, 4  ;;  %v5178_v3 = vrot.slane %v5176_v47, 5 }
 0x3f5   : > { %8951 = vmatmul.mubr.bf16.gmra.mrb[0].mxu1 %v11518_v11  ;;  %v5113_v2 = vsel %vm10068_vm3, %v5108_v33, %v11543_v57  ;;  %v5142_v54 = vrot.slane %v5141_v19, 4  ;;  %v5197_v62 = vshrl.u32 %v4911_v29, 16  ;;  %v5200_v20 = vshll.u32 %v4911_v29, 16 }
 0x3f6   : > { %8954 = vmatprep.mubr.bf16.mxu1 %v11545_v46  ;;  %8983 = vmatpush3.bf16.msra.mxu1 %v9835_v42  ;;  %v9837_v42 = vld [vmem:[%s11981_s3 + $0x120] sm:$0xff]   ;;  %v5132_v10 = vrot.slane %v5131_v55, 4  ;;  %v5123_v26 = vsel %vm10068_vm3, %v5118_v37, %v5122_v23  ;;  %v5168_v44 = vshll.u32 %v11272_v25, 16  ;;  %v11589_v55 = vrot.slane %v5182_v35, 5  ;;  %v9840_v37 = vld [vmem:[%s11981_s3 + $0x138] sm:$0xff]  }
 0x3f7   : > { %8984 = vmatprep.subr.bf16.mxu1 %v9836_v15  ;;  %v5188_v21 = vrot.slane %v5186_v41, 4  ;;  %v5221_v36 = vshrl.u32 %v4914_v60, 16  ;;  %v5165_v25 = vor.u32 %v5164_v56, %v11579_v17  ;;  %v5179_v32 = vor.u32 %v5178_v3, %v5175_v13 }
 0x3f8   : > { %v5137_v57 = vsel %vm10068_vm3, %v5132_v10, %v11554_v16  ;;  %v5192_v47 = vshll.u32 %v11284_v1, 16  ;;  %v5199_v24 = vrot.slane %v5197_v62, 4  ;;  %v5202_v33 = vrot.slane %v5200_v20, 5  ;;  %v4920_v62 = vld [vmem:[#allocation2 + $0xa8] sm:$0xf] }
 0x3f9   : > { %v5206_v19 = vshll.u32 %v11294_v61, 16  ;;  %v5210_v23 = vshrl.u32 %v11294_v61, 16  ;;  %v11603_v35 = vcombine.low %v5113_v2, %v5123_v26  ;;  %v5170_v41 = vrot.slane %v5168_v44, 5  ;;  %v4917_v61 = vld [vmem:[#allocation2 + $0x9c] sm:$0xf] }
 0x3fa   : > { %8985 = vmatpush3.bf16.msra.mxu1 %v9836_v15  ;;  %v5155_v15 = vor.u32 %v5154_v0, %v5151_v59  ;;  %v9839_v59 = vld [vmem:[%s11981_s3 + $0x130] sm:$0xff]   ;;  %v5224_v0 = vshll.u32 %v4914_v60, 16  ;;  %v5189_v29 = vor.u32 %v5188_v21, %v11589_v55  ;;  %v5223_v1 = vrot.slane %v5221_v36, 4 }
 0x3fb   : > { %8986 = vmatprep.subr.bf16.mxu1 %v9837_v42  ;;  %v5166_v56 = vrot.slane %v5165_v25, 4  ;;  %v5180_v13 = vrot.slane %v5179_v32, 4  ;;  %v5194_v3 = vrot.slane %v5192_v47, 5  ;;  %v5203_v60 = vor.u32 %v5202_v33, %v5199_v24 }
 0x3fc   : > { %v5156_v5 = vrot.slane %v5155_v15, 4  ;;  %v5226_v10 = vrot.slane %v5224_v0, 5  ;;  %v5234_v15 = vshrl.u32 %v11305_v52, 16  ;;  %v5208_v2 = vrot.slane %v5206_v19, 5 }
 0x3fd   : > { %8955 = vmatmul.mubr.bf16.gmra.mrb[4].mxu1 %v11567_v34  ;;  %v5190_v20 = vrot.slane %v5189_v29, 4  ;;  %v5245_v26 = vshrl.u32 %v4917_v61, 16  ;;  %v5248_v44 = vshll.u32 %v4917_v61, 16  ;;  %v5216_v21 = vshll.u32 %v11303_v14, 16  ;;  %v4923_v61 = vld [vmem:[#allocation2 + $0xb4] sm:$0xf] }
 0x3fe   : > { %8958 = vmatprep.mubr.bf16.mxu1 %v11572_v39  ;;  %8987 = vmatpush3.bf16.msra.mxu1 %v9837_v42  ;;  %v5147_v42 = vsel %vm10068_vm3, %v5142_v54, %v5146_v30  ;;  %v5230_v30 = vshll.u32 %v11305_v52, 16  ;;  %v5212_v54 = vrot.slane %v5210_v23, 4  ;;  %v5171_v52 = vsel %vm10068_vm3, %v5166_v56, %v5170_v41 }
 0x3ff   : > { %8988 = vmatprep.subr.bf16.mxu1 %v9838_v50  ;;  %v11605_v16 = vcombine.low %v5137_v57, %v5147_v42  ;;  %v5227_v57 = vor.u32 %v5226_v10, %v5223_v1  ;;  %v5236_v36 = vrot.slane %v5234_v15, 4  ;;  %v5272_v25 = vshll.u32 %v4920_v62, 16 }
 0x400   : > { %v5232_v42 = vrot.slane %v5230_v30, 5  ;;  %v5195_v32 = vsel %vm10068_vm3, %v5190_v20, %v5194_v3  ;;  %v5204_v47 = vrot.slane %v5203_v60, 4  ;;  %v5213_v24 = vor.u32 %v5212_v54, %v5208_v2 }
 0x401   : > { %v5240_v33 = vshll.u32 %v11315_v53, 16  ;;  %v5247_v14 = vrot.slane %v5245_v26, 4  ;;  %v5250_v19 = vrot.slane %v5248_v44, 5  ;;  %v5254_v23 = vshll.u32 %v11321_v28, 16 }
 0x402   : > { %8989 = vmatpush3.bf16.msra.mxu1 %v9838_v50  ;;  %v5161_v50 = vsel %vm10068_vm3, %v5156_v5, %v11579_v17  ;;  %v11623_v17 = vld [vmem:[%s11981_s3 + $0x1c0] sm:$0xff]   ;;  %v5269_v5 = vshrl.u32 %v4920_v62, 16  ;;  %v5258_v41 = vshrl.u32 %v11321_v28, 16  ;;  %v5228_v1 = vrot.slane %v5227_v57, 4 }
 0x403   : > { %8990 = vmatprep.subr.bf16.mxu1 %v9839_v59  ;;  %v11626_v0 = vcombine.low %v5161_v50, %v5171_v52  ;;  %v5237_v10 = vor.u32 %v5236_v36, %v5232_v42  ;;  %v5274_v15 = vrot.slane %v5272_v25, 5  ;;  %v5278_v53 = vshll.u32 %v11333_v27, 16 }
 0x404   : > { %v5271_v30 = vrot.slane %v5269_v5, 4  ;;  %v5209_v28 = vsel %vm10068_vm3, %v5204_v47, %v5208_v2  ;;  %v5242_v50 = vrot.slane %v5240_v33, 5  ;;  %v5214_v56 = vrot.slane %v5213_v24, 4 }
 0x405   : > { %8959 = vmatmul.mubr.bf16.gmra.mrb[8].mxu1 %v11603_v35  ;;  %v5256_v3 = vrot.slane %v5254_v23, 5  ;;  %v5260_v60 = vrot.slane %v5258_v41, 4  ;;  %v5233_v54 = vsel %vm10068_vm3, %v5228_v1, %v5232_v42  ;;  %v5238_v62 = vrot.slane %v5237_v10, 4 }
 0x406   : > { %8962 = vmatprep.mubr.bf16.mxu1 %v11605_v16  ;;  %8991 = vmatpush3.bf16.msra.mxu1 %v9839_v59  ;;  %v5185_v59 = vsel %vm10068_vm3, %v5180_v13, %v11589_v55  ;;  %v5218_v55 = vrot.slane %v5216_v21, 5  ;;  %v5251_v13 = vor.u32 %v5250_v19, %v5247_v14  ;;  %v5293_v52 = vshrl.u32 %v4923_v61, 16 }
 0x407   : > { %8992 = vmatprep.subr.bf16.mxu1 %v9840_v37  ;;  %v11637_v29 = vcombine.low %v5185_v59, %v5195_v32  ;;  %v5296_v20 = vshll.u32 %v4923_v61, 16  ;;  %v5275_v26 = vor.u32 %v5274_v15, %v5271_v30  ;;  %v5280_v44 = vrot.slane %v5278_v53, 5 }
 0x408   : > { %v5243_v2 = vsel %vm10068_vm3, %v5238_v62, %v5242_v50  ;;  %v5264_v36 = vshll.u32 %v11331_v40, 16  ;;  %v5252_v5 = vrot.slane %v5251_v13, 4  ;;  %v5261_v42 = vor.u32 %v5260_v60, %v5256_v3  ;;  %v9842_v62 = vld [vmem:[%s11981_s3 + $0x1c8] sm:$0xff]  }
 0x409   : > { %v11654_v59 = vcombine.low %v5233_v54, %v5243_v2  ;;  %v5288_v25 = vshll.u32 %v11343_v18, 16  ;;  %v5295_v32 = vrot.slane %v5293_v52, 4  ;;  %v5298_v47 = vrot.slane %v5296_v20, 5  ;;  %v9843_v52 = vld [vmem:[%s11981_s3 + $0x1d0] sm:$0xff]   ;;  %v7357_v20 = vld [vmem:[%s266_s30] sm:$0xf] }
 0x40a   : > { %8993 = vmatpush3.bf16.msra.mxu1 %v9840_v37  ;;  %v5282_v37 = vshrl.u32 %v11333_v27, 16  ;;  %v5219_v27 = vsel %vm10068_vm3, %v5214_v56, %v5218_v55  ;;  %v5302_v24 = vshll.u32 %v11349_v51, 16  ;;  %v5306_v33 = vshrl.u32 %v11349_v51, 16 }
 0x40b   : > { %9026 = vmatprep.subr.bf16.mxu1 %v11623_v17  ;;  %v11649_v57 = vcombine.low %v5209_v28, %v5219_v27  ;;  %v5276_v14 = vrot.slane %v5275_v26, 4  ;;  %v5266_v23 = vrot.slane %v5264_v36, 5  ;;  %v5257_v40 = vsel %vm10068_vm3, %v5252_v5, %v5256_v3  ;;  %v9847_v5 = vld [vmem:[%s11981_s3 + $0x1f0] sm:$0xff]  }
 0x40c   : > { %v5284_v21 = vrot.slane %v5282_v37, 4  ;;  %v5290_v41 = vrot.slane %v5288_v25, 5  ;;  %v5262_v55 = vrot.slane %v5261_v42, 4  ;;  %v5299_v1 = vor.u32 %v5298_v47, %v5295_v32  ;;  %v9848_v42 = vld [vmem:[%s11981_s3 + $0x1f8] sm:$0xff]   ;;  %v9849_v25 = vld [vmem:[%s11981_s3 + $0x80] sm:$0xff]  }
 0x40d   : > { %8963 = vmatmul.mubr.bf16.gmra.mrb[12].mxu1 %v11626_v0  ;;  %v5304_v18 = vrot.slane %v5302_v24, 5  ;;  %v5308_v10 = vrot.slane %v5306_v33, 4  ;;  %v5281_v30 = vsel %vm10068_vm3, %v5276_v14, %v5280_v44  ;;  %v5312_v53 = vshll.u32 %v11356_v43, 16  ;;  %v4926_v32 = vld [vmem:[#allocation2 + $0xc0] sm:$0xf] }
 0x40e   : > { %8966 = vmatprep.mubr.bf16.mxu1 %v11637_v29  ;;  %v5285_v19 = vor.u32 %v5284_v21, %v5280_v44  ;;  %v5267_v51 = vsel %vm10068_vm3, %v5262_v55, %v5266_v23  ;;  %v5300_v50 = vrot.slane %v5299_v1, 4  ;;  %v11705_v27 = vunpack.c.l.bf16 %v7357_v20  ;;  %v9846_v21 = vld [vmem:[%s11981_s3 + $0x1e8] sm:$0xff]  }
 0x40f   : > { %v11668_v37 = vcombine.low %v5257_v40, %v5267_v51  ;;  %v5309_v56 = vor.u32 %v5308_v10, %v5304_v18  ;;  %v5314_v13 = vrot.slane %v5312_v53, 5  ;;  %v5639_v47 = vshrl.u32 %v4926_v32, 16 }
 0x410   : > { %v5286_v15 = vrot.slane %v5285_v19, 4  ;;  %v5305_v3 = vsel %vm10068_vm3, %v5300_v50, %v5304_v18  ;;  %v7360_v26 = vcombine.high %v11705_v27, %v11705_v27  ;;  %v7363_v44 = vsel %vm3604_vm8, %v11705_v27, 0.0 }
 0x411   : > { %v5310_v60 = vrot.slane %v5309_v56, 4  ;;  %v5642_v24 = vshll.u32 %v4926_v32, 16  ;;  %v5641_v33 = vrot.slane %v5639_v47, 4  ;;  %v5648_v19 = vshll.u32 %v11367_v9, 16  ;;  %v6211_v47 = vld [vmem:[#allocation2 + $0xc] sm:$0xe] }
 0x412   : > { %v5291_v61 = vsel %vm10068_vm3, %v5286_v15, %v5290_v41  ;;  %v7364_v2 = vsel %vm3604_vm8, %v7360_v26, 0.0  ;;  %v5652_v23 = vshrl.u32 %v11367_v9, 16  ;;  %v5658_v1 = vshll.u32 %v11375_v6, 16  ;;  %v9850_v6 = vld [vmem:[%s11981_s3 + $0x88] sm:$0xff]  }
 0x413   : > { %v11672_v28 = vcombine.low %v5281_v30, %v5291_v61  ;;  %v5315_v43 = vsel %vm10068_vm3, %v5310_v60, %v5314_v13  ;;  %v7365_v36 = vadd.f32 %v7364_v2, %v7363_v44  ;;  %v5644_v14 = vrot.slane %v5642_v24, 5  ;;  %v9851_v61 = vld [vmem:[%s11981_s3 + $0x90] sm:$0xff]   ;;  %v12076_v24 = vld [vmem:[#allocation21_spill] sm:$0xff] }
 0x414   : > { %v11680_v54 = vcombine.low %v5305_v3, %v5315_v43  ;;  %v5650_v41 = vrot.slane %v5648_v19, 5  ;;  %v5654_v55 = vrot.slane %v5652_v23, 4  ;;  %v5660_v30 = vrot.slane %v5658_v1, 5  ;;  %v6212_v19 = vld [vmem:[#allocation2 + $0x18] sm:$0xe] }
 0x415   : > { %8967 = vmatmul.mubr.bf16.gmra.mrb[16].mxu1 %v11649_v57  ;;  %7366 = vadd.xlane.f32.xlu0 %v7365_v36  ;;  %v5645_v40 = vor.u32 %v5644_v14, %v5641_v33  ;;  %v12074_v36 = vld [vmem:[#allocation19_spill] sm:$0xff]  ;;  %v6295_v33 = vrot.slane %v12076_v24, 5  ;;  %v7967_v23 = vrot.slane %v6211_v47, 9  ;;  %v12087_v24 = vld [vmem:[#allocation10_spill] sm:$0xff] }
 0x416   : > { %8970 = vmatprep.mubr.bf16.mxu1 %v11654_v59  ;;  %v5655_v10 = vor.u32 %v5654_v55, %v5650_v41 }
 0x417   : > { %v5646_v18 = vrot.slane %v5645_v40, 4 }
 0x418   : > { %v5656_v9 = vrot.slane %v5655_v10, 4 }
 0x419   : > { %v5651_v15 = vsel %vm10068_vm3, %v5646_v18, %v5650_v41  ;;  %v7968_v41 = vrot.slane %v6212_v19, 9  ;;  %v12077_v18 = vld [vmem:[#allocation20_spill] sm:$0xff]  ;;  %v12088_v19 = vld [vmem:[#allocation11_spill] sm:$0xff] }
 0x41a   : > { %v5661_v51 = vsel %vm10068_vm3, %v5656_v9, %v5660_v30  ;;  %v6299_v10 = vrot.slane %v12077_v18, 5  ;;  %v9858_v9 = vld [vmem:[%s11981_s3 + $0x148] sm:$0xff]   ;;  %v9871_v18 = vld [vmem:[%s11981_s3 + $0x230] sm:$0xff]  }
 0x41b   : > { %v7932_v53 = vcombine.low %v5651_v15, %v5661_v51  ;;  %v12078_v51 = vld [vmem:[#allocation22_spill] sm:$0xff] }
 0x41d   : > { %8971 = vmatmul.mubr.bf16.gmra.mrb[20].mxu1 %v11668_v37 }
 0x41e   : > { %8974 = vmatprep.mubr.bf16.mxu1 %v11672_v28 }
 0x425   : > { %8975 = vmatmul.mubr.bf16.gmra.mrb[24].mxu1 %v11680_v54 }
 0x426   : > { %8994 = vmatprep.mubr.bf16.mxu1 %v11488_v12  ;;  %v9844_v12 = vld [vmem:[%s11981_s3 + $0x1d8] sm:$0xff]  }
 0x42d   : > { %8995 = vmatmul.mubr.bf16.vlgmr.msra.gmra.mrb[28].mxu1 %v11513_v8 }
 0x42e   : > { %9027 = vmatpush3.bf16.msra.mxu1 %v11623_v17  ;;  %8998 = vmatprep.mubr.bf16.mxu1 %v11518_v11  ;;  %v9845_v17 = vld [vmem:[%s11981_s3 + $0x1e0] sm:$0xff]  }
 0x42f   : > { %9028 = vmatprep.subr.bf16.mxu1 %v9842_v62 }
 0x432   : > { %9029 = vmatpush3.bf16.msra.mxu1 %v9842_v62 }
 0x433   : > { %9030 = vmatprep.subr.bf16.mxu1 %v9843_v52 }
 0x435   : > { %8999 = vmatmul.mubr.bf16.gmra.mrb[0].mxu1 %v11545_v46 }
 0x436   : > { %9002 = vmatprep.mubr.bf16.mxu1 %v11567_v34  ;;  %9031 = vmatpush3.bf16.msra.mxu1 %v9843_v52  ;;  %v6278_v52 = vrot.slane %v11433_v49, 5 }
 0x437   : > { %9032 = vmatprep.subr.bf16.mxu1 %v9844_v12 }
 0x438   : > { %v6280_v26 = vrot.slane %v6278_v52, 4 }
 0x43a   : > { %9033 = vmatpush3.bf16.msra.mxu1 %v9844_v12 }
 0x43b   : > { %9034 = vmatprep.subr.bf16.mxu1 %v9845_v17 }
 0x43d   : > { %9003 = vmatmul.mubr.bf16.gmra.mrb[4].mxu1 %v11572_v39 }
 0x43e   : > { %9006 = vmatprep.mubr.bf16.mxu1 %v11603_v35  ;;  %9035 = vmatpush3.bf16.msra.mxu1 %v9845_v17  ;;  %v6281_v17 = vrot.slane %v11440_v22, 5 }
 0x43f   : > { %9036 = vmatprep.subr.bf16.mxu1 %v9846_v21 }
 0x442   : > { %9037 = vmatpush3.bf16.msra.mxu1 %v9846_v21  ;;  %v12073_v21 = vld [vmem:[#allocation17_spill] sm:$0xff] }
 0x443   : > { %9038 = vmatprep.subr.bf16.mxu1 %v9847_v5  ;;  %v6285_v2 = vrot.slane %v12073_v21, 5 }
 0x445   : > { %9007 = vmatmul.mubr.bf16.gmra.mrb[8].mxu1 %v11605_v16  ;;  %v6287_v14 = vrot.slane %v6285_v2, 4  ;;  %v6286_v1 = vsel %vm10509_vm6, %v7967_v23, %v6285_v2  ;;  %v12084_v2 = vld [vmem:[#allocation7_spill] sm:$0xff]  ;;  %v9866_v23 = vld [vmem:[%s11981_s3 + $0x208] sm:$0xff]  }
 0x446   : > { %9010 = vmatprep.mubr.bf16.mxu1 %v11626_v0  ;;  %9039 = vmatpush3.bf16.msra.mxu1 %v9847_v5  ;;  %v6292_v5 = vrot.slane %v12074_v36, 5 }
 0x447   : > { %9040 = vmatprep.subr.bf16.mxu1 %v9848_v42 }
 0x448   : > { %v6294_v58 = vrot.slane %v6292_v5, 4  ;;  %v6293_v15 = vsel %vm10509_vm6, %v7968_v41, %v6292_v5  ;;  %v9868_v41 = vld [vmem:[%s11981_s3 + $0x218] sm:$0xff]  }
 0x44a   : > { %9041 = vmatpush3.bf16.msra.mxu1 %v9848_v42  ;;  %v6296_v55 = vsel %vm10509_vm6, %v6294_v58, %v6295_v33  ;;  %v12089_v58 = vld [vmem:[#allocation12_spill] sm:$0xff] }
 0x44b   : > { %9074 = vmatprep.subr.bf16.mxu1 %v9849_v25 }
 0x44d   : > { %9011 = vmatmul.mubr.bf16.gmra.mrb[12].mxu1 %v11637_v29 }
 0x44e   : > { %9014 = vmatprep.mubr.bf16.mxu1 %v11649_v57 }
 0x455   : > { %9015 = vmatmul.mubr.bf16.gmra.mrb[16].mxu1 %v11654_v59 }
 0x456   : > { %9018 = vmatprep.mubr.bf16.mxu1 %v11668_v37 }
 0x45d   : > { %9019 = vmatmul.mubr.bf16.gmra.mrb[20].mxu1 %v11672_v28 }
 0x45e   : > { %9022 = vmatprep.mubr.bf16.mxu1 %v11680_v54 }
 0x465   : > { %9023 = vmatmul.mubr.bf16.gmra.mrb[24].mxu1 %v7932_v53 }
 0x466   : > { %9042 = vmatprep.mubr.bf16.mxu1 %v11513_v8  ;;  %v9852_v8 = vld [vmem:[%s11981_s3 + $0x98] sm:$0xff]  }
 0x46d   : > { %9043 = vmatmul.mubr.bf16.vlgmr.msra.gmra.mrb[28].mxu1 %v11518_v11  ;;  %v9853_v11 = vld [vmem:[%s11981_s3 + $0xa0] sm:$0xff]  }
 0x46e   : > { %9075 = vmatpush3.bf16.msra.mxu1 %v9849_v25  ;;  %9046 = vmatprep.mubr.bf16.mxu1 %v11545_v46  ;;  %v9854_v46 = vld [vmem:[%s11981_s3 + $0xa8] sm:$0xff]   ;;  %v12075_v25 = vld [vmem:[#allocation18_spill] sm:$0xff] }
 0x46f   : > { %9076 = vmatprep.subr.bf16.mxu1 %v9850_v6  ;;  %v6288_v32 = vrot.slane %v12075_v25, 5  ;;  %v12086_v25 = vld [vmem:[#allocation9_spill] sm:$0xff] }
 0x471   : > { %v6289_v40 = vsel %vm10509_vm6, %v6287_v14, %v6288_v32 }
 0x472   : > { %9077 = vmatpush3.bf16.msra.mxu1 %v9850_v6  ;;  %v11803_v30 = vcombine.low %v6286_v1, %v6289_v40  ;;  %v11811_v6 = vcombine.low %v6293_v15, %v6296_v55  ;;  %v9867_v40 = vld [vmem:[%s11981_s3 + $0x210] sm:$0xff]   ;;  %v9869_v55 = vld [vmem:[%s11981_s3 + $0x220] sm:$0xff]   ;;  %v9870_v1 = vld [vmem:[%s11981_s3 + $0x228] sm:$0xff]  }
 0x473   : > { %9078 = vmatprep.subr.bf16.mxu1 %v9851_v61  ;;  %v12092_v15 = vld [vmem:[#allocation15_spill] sm:$0xff] }
 0x475   : > { %9047 = vmatmul.mubr.bf16.gmra.mrb[0].mxu1 %v11567_v34  ;;  %v9855_v34 = vld [vmem:[%s11981_s3 + $0xb0] sm:$0xff]  }
 0x476   : > { %9050 = vmatprep.mubr.bf16.mxu1 %v11572_v39  ;;  %9079 = vmatpush3.bf16.msra.mxu1 %v9851_v61  ;;  %v9856_v39 = vld [vmem:[%s11981_s3 + $0xb8] sm:$0xff]  }
 0x477   : > { %9080 = vmatprep.subr.bf16.mxu1 %v9852_v8  ;;  %v12079_v61 = vld [vmem:[#allocation23_spill] sm:$0xff] }
 0x47a   : > { %9081 = vmatpush3.bf16.msra.mxu1 %v9852_v8  ;;  %v6302_v8 = vrot.slane %v12079_v61, 5 }
 0x47b   : > { %9082 = vmatprep.subr.bf16.mxu1 %v9853_v11 }
 0x47d   : > { %9051 = vmatmul.mubr.bf16.gmra.mrb[4].mxu1 %v11603_v35  ;;  %v9857_v35 = vld [vmem:[%s11981_s3 + $0x140] sm:$0xff]  }
 0x47e   : > { %9054 = vmatprep.mubr.bf16.mxu1 %v11605_v16  ;;  %9083 = vmatpush3.bf16.msra.mxu1 %v9853_v11  ;;  %v4929_v16 = vld [vmem:[#allocation2 + $0xcc] sm:$0xf]  ;;  %v6213_v11 = vld [vmem:[#allocation2 + $0x24] sm:$0xe] }
 0x47f   : > { %9084 = vmatprep.subr.bf16.mxu1 %v9854_v46  ;;  %v5925_v50 = vshrl.u32 %v4929_v16, 16  ;;  %v5928_v56 = vshll.u32 %v4929_v16, 16 }
 0x481   : > { %v5927_v13 = vrot.slane %v5925_v50, 4  ;;  %v5930_v3 = vrot.slane %v5928_v56, 5  ;;  %v9859_v50 = vld [vmem:[%s11981_s3 + $0x150] sm:$0xff]   ;;  %v7969_v56 = vrot.slane %v6213_v11, 9 }
 0x482   : > { %9085 = vmatpush3.bf16.msra.mxu1 %v9854_v46  ;;  %v6309_v46 = vrot.slane %v11482_v48, 5 }
 0x483   : > { %9086 = vmatprep.subr.bf16.mxu1 %v9855_v34  ;;  %v5931_v60 = vor.u32 %v5930_v3, %v5927_v13  ;;  %v6300_v48 = vsel %vm10509_vm6, %v7969_v56, %v6299_v10 }
 0x485   : > { %9055 = vmatmul.mubr.bf16.gmra.mrb[8].mxu1 %v11626_v0  ;;  %v5934_v0 = vshll.u32 %v11377_v7, 16 }
 0x486   : > { %9058 = vmatprep.mubr.bf16.mxu1 %v11637_v29  ;;  %9087 = vmatpush3.bf16.msra.mxu1 %v9855_v34  ;;  %v5938_v29 = vshrl.u32 %v11377_v7, 16  ;;  %v6210_v7 = vld [vmem:[#allocation2] sm:$0xe]  ;;  %v6301_v34 = vrot.slane %v6299_v10, 4  ;;  %v9872_v10 = vld [vmem:[%s11981_s3 + $0x238] sm:$0xff]  }
 0x487   : > { %9088 = vmatprep.subr.bf16.mxu1 %v9856_v39  ;;  %v5936_v43 = vrot.slane %v5934_v0, 5  ;;  %v7966_v44 = vrot.slane %v6210_v7, 9  ;;  %v7374_v7 = vlaneseq }
 0x488   : > { %v5940_v62 = vrot.slane %v5938_v29, 4  ;;  %v6303_v13 = vsel %vm10509_vm6, %v6301_v34, %v6302_v8  ;;  %v11932_v8 = vld [vmem:[%s11982_s4] ss:$0 sm:$0xff] }
 0x489   : > { %v6279_v22 = vsel %vm10509_vm6, %v7966_v44, %v6278_v52  ;;  %v12081_v52 = vld [vmem:[#allocation4_spill] sm:$0xff] }
 0x48a   : > { %9089 = vmatpush3.bf16.msra.mxu1 %v9856_v39  ;;  %v5941_v12 = vor.u32 %v5940_v62, %v5936_v43  ;;  %v6214_v39 = vld [vmem:[#allocation2 + $0x30] sm:$0xe]  ;;  %v9861_v62 = vld [vmem:[%s11981_s3 + $0x160] sm:$0xff]  }
 0x48b   : > { %9122 = vmatprep.subr.bf16.mxu1 %v9857_v35  ;;  %v7970_v3 = vrot.slane %v6214_v39, 9 }
 0x48d   : > { %9059 = vmatmul.mubr.bf16.gmra.mrb[12].mxu1 %v11649_v57  ;;  %v5944_v57 = vshll.u32 %v11387_v45, 16  ;;  %v6282_v45 = vsel %vm10509_vm6, %v6280_v26, %v6281_v17  ;;  %v9886_v17 = vmov 839922192   ;;  %v12082_v26 = vld [vmem:[#allocation5_spill] sm:$0xff] }
 0x48e   : > { %9062 = vmatprep.mubr.bf16.mxu1 %v11654_v59  ;;  %v5932_v59 = vrot.slane %v5931_v60, 4  ;;  %v7998_v42 = vcombine.low %v6279_v22, %v6282_v45  ;;  %v9860_v60 = vld [vmem:[%s11981_s3 + $0x158] sm:$0xff]   ;;  %v7375_v45 = vshrl.u32 %v7374_v7, 7  ;;  %v12085_v22 = vld [vmem:[#allocation8_spill] sm:$0xff] }
 0x48f   : > { %v5946_v20 = vrot.slane %v5944_v57, 5  ;;  %v12080_v57 = vld [vmem:[#allocation3_spill] sm:$0xff] }
 0x495   : > { %9063 = vmatmul.mubr.bf16.gmra.mrb[16].mxu1 %v11668_v37  ;;  %v5937_v37 = vsel %vm10068_vm3, %v5932_v59, %v5936_v43  ;;  %v9863_v59 = vld [vmem:[%s11981_s3 + $0x170] sm:$0xff]  }
 0x496   : > { %9066 = vmatprep.mubr.bf16.mxu1 %v11672_v28  ;;  %v5942_v28 = vrot.slane %v5941_v12, 4  ;;  %v9864_v12 = vld [vmem:[%s11981_s3 + $0x178] sm:$0xff]  }
 0x498   : > { %v5947_v49 = vsel %vm10068_vm3, %v5942_v28, %v5946_v20  ;;  %v7372_v20 = vunpack.c.l.s4 %v9886_v17  ;;  %v9865_v28 = vld [vmem:[%s11981_s3 + $0x200] sm:$0xff]  }
 0x49a   : > { %v7373_v44 = vunpack.c.0.s8 %v7372_v20 }
 0x49d   : > { %9067 = vmatmul.mubr.bf16.gmra.mrb[20].mxu1 %v11680_v54  ;;  %v7957_v54 = vcombine.low %v5937_v37, %v5947_v49  ;;  %v12083_v37 = vld [vmem:[#allocation6_spill] sm:$0xff]  ;;  %v11856_v49 = vsub.s32 %v7373_v44, %v7375_v45 }
 0x49e   : > { %9070 = vmatprep.mubr.bf16.mxu1 %v7932_v53  ;;  %v6306_v53 = vrot.slane %v12078_v51, 5 }
 0x4a0   : > { %v6308_v16 = vrot.slane %v6306_v53, 4  ;;  %v6307_v29 = vsel %vm10509_vm6, %v7970_v3, %v6306_v53 }
 0x4a2   : > { %v6310_v0 = vsel %vm10509_vm6, %v6308_v16, %v6309_v46  ;;  %v7367_v21 = vpop.xlane.xlu0 %7366  ;;  %v12095_v16 = vld [vmem:[#allocation24_spill] sm:$0xff] }
 0x4a3   : > { %v11833_v43 = vcombine.low %v6307_v29, %v6310_v0 }
 0x4a5   : > { %9071 = vmatmul.mubr.bf16.gmra.mrb[24].mxu1 %v7957_v54  ;;  %v7369_v54 = vmul.f32 0.00390625, %v7367_v21 }
 0x4a6   : > { %9090 = vmatprep.mubr.bf16.mxu1 %v7998_v42 }
 0x4a7   : > { %v7377_v36 = vrot.slane %v7369_v54, %v11856_v49 }
 0x4a9   : > { %v11862_v5 = vsub.f32 %v11705_v27, %v7377_v36  ;;  %v12090_v27 = vld [vmem:[#allocation13_spill] sm:$0xff] }
 0x4ab   : > { %v7380_v42 = vmul.f32 %v11862_v5, %v11862_v5 }
 0x4ad   : > { %9091 = vmatmul.mubr.bf16.vlgmr.msra.gmra.mrb[28].mxu1 %v11803_v30  ;;  %v7382_v32 = vcombine.high %v7380_v42, %v7380_v42  ;;  %v7384_v47 = vsel %vm3604_vm8, %v7380_v42, 0.0 }
 0x4ae   : > { %9123 = vmatpush3.bf16.msra.mxu1 %v9857_v35  ;;  %9094 = vmatprep.mubr.bf16.mxu1 %v11811_v6  ;;  %v11826_v35 = vcombine.low %v6300_v48, %v6303_v13 }
 0x4af   : > { %9124 = vmatprep.subr.bf16.mxu1 %v9858_v9  ;;  %v7385_v33 = vsel %vm3604_vm8, %v7382_v32, 0.0 }
 0x4b0   : > { %v7386_v14 = vadd.f32 %v7385_v33, %v7384_v47 }
 0x4b2   : > { %9125 = vmatpush3.bf16.msra.mxu1 %v9858_v9  ;;  %7387 = vadd.xlane.f32.xlu0 %v7386_v14  ;;  %v12093_v9 = vld [vmem:[#allocation16_spill] sm:$0xff] }
 0x4b3   : > { %9126 = vmatprep.subr.bf16.mxu1 %v9859_v50  ;;  %v12094_v51 = vcombine.low %v12092_v15, %v12093_v9 }
 0x4b5   : > { %9095 = vmatmul.mubr.bf16.gmra.mrb[0].mxu1 %v11826_v35 }
 0x4b6   : > { %9098 = vmatprep.mubr.bf16.mxu1 %v11833_v43  ;;  %9127 = vmatpush3.bf16.msra.mxu1 %v9859_v50 }
 0x4b7   : > { %9128 = vmatprep.subr.bf16.mxu1 %v9860_v60 }
 0x4ba   : > { %9129 = vmatpush3.bf16.msra.mxu1 %v9860_v60 }
 0x4bb   : > { %9130 = vmatprep.subr.bf16.mxu1 %v9861_v62 }
 0x4bd   : > { %9099 = vmatmul.mubr.bf16.gmra.mrb[4].mxu1 %v12080_v57 }
 0x4be   : > { %9102 = vmatprep.mubr.bf16.mxu1 %v12081_v52  ;;  %9131 = vmatpush3.bf16.msra.mxu1 %v9861_v62 }
 0x4bf   : > { %9132 = vmatprep.subr.bf16.mxu1 %v9862_v63 }
 0x4c2   : > { %9133 = vmatpush3.bf16.msra.mxu1 %v9862_v63 }
 0x4c3   : > { %9134 = vmatprep.subr.bf16.mxu1 %v9863_v59 }
 0x4c5   : > { %9103 = vmatmul.mubr.bf16.gmra.mrb[8].mxu1 %v12082_v26 }
 0x4c6   : > { %9106 = vmatprep.mubr.bf16.mxu1 %v12083_v37  ;;  %9135 = vmatpush3.bf16.msra.mxu1 %v9863_v59 }
 0x4c7   : > { %9136 = vmatprep.subr.bf16.mxu1 %v9864_v12 }
 0x4ca   : > { %9137 = vmatpush3.bf16.msra.mxu1 %v9864_v12 }
 0x4cb   : > { %9170 = vmatprep.subr.bf16.mxu1 %v9865_v28 }
 0x4cd   : > { %9107 = vmatmul.mubr.bf16.gmra.mrb[12].mxu1 %v12084_v2 }
 0x4ce   : > { %9110 = vmatprep.mubr.bf16.mxu1 %v12085_v22 }
 0x4d5   : > { %9111 = vmatmul.mubr.bf16.gmra.mrb[16].mxu1 %v12086_v25 }
 0x4d6   : > { %9114 = vmatprep.mubr.bf16.mxu1 %v12087_v24 }
 0x4dd   : > { %9115 = vmatmul.mubr.bf16.gmra.mrb[20].mxu1 %v12088_v19 }
 0x4de   : > { %9118 = vmatprep.mubr.bf16.mxu1 %v12089_v58 }
 0x4e5   : > { %9119 = vmatmul.mubr.bf16.gmra.mrb[24].mxu1 %v12090_v27 }
 0x4e6   : > { %9138 = vmatprep.mubr.bf16.mxu1 %v11803_v30  ;;  %v12091_v30 = vld [vmem:[#allocation14_spill] sm:$0xff] }
 0x4ed   : > { %9139 = vmatmul.mubr.bf16.vlgmr.msra.gmra.mrb[28].mxu1 %v11811_v6 }
 0x4ee   : > { %9171 = vmatpush3.bf16.msra.mxu1 %v9865_v28  ;;  %9142 = vmatprep.mubr.bf16.mxu1 %v11826_v35 }
 0x4ef   : > { %9172 = vmatprep.subr.bf16.mxu1 %v9866_v23 }
 0x4f2   : > { %9173 = vmatpush3.bf16.msra.mxu1 %v9866_v23 }
 0x4f3   : > { %9174 = vmatprep.subr.bf16.mxu1 %v9867_v40 }
 0x4f5   : > { %9143 = vmatmul.mubr.bf16.gmra.mrb[0].mxu1 %v11833_v43 }
 0x4f6   : > { %9146 = vmatprep.mubr.bf16.mxu1 %v12080_v57  ;;  %9175 = vmatpush3.bf16.msra.mxu1 %v9867_v40 }
 0x4f7   : > { %9176 = vmatprep.subr.bf16.mxu1 %v9868_v41 }
 0x4fa   : > { %9177 = vmatpush3.bf16.msra.mxu1 %v9868_v41 }
 0x4fb   : > { %9178 = vmatprep.subr.bf16.mxu1 %v9869_v55 }
 0x4fd   : > { %9147 = vmatmul.mubr.bf16.gmra.mrb[4].mxu1 %v12081_v52 }
 0x4fe   : > { %9150 = vmatprep.mubr.bf16.mxu1 %v12082_v26  ;;  %9179 = vmatpush3.bf16.msra.mxu1 %v9869_v55 }
 0x4ff   : > { %9180 = vmatprep.subr.bf16.mxu1 %v9870_v1 }
 0x502   : > { %9181 = vmatpush3.bf16.msra.mxu1 %v9870_v1 }
 0x503   : > { %9182 = vmatprep.subr.bf16.mxu1 %v9871_v18 }
 0x505   : > { %9151 = vmatmul.mubr.bf16.gmra.mrb[8].mxu1 %v12083_v37 }
 0x506   : > { %9154 = vmatprep.mubr.bf16.mxu1 %v12084_v2  ;;  %9183 = vmatpush3.bf16.msra.mxu1 %v9871_v18 }
 0x507   : > { %9184 = vmatprep.subr.bf16.mxu1 %v9872_v10 }
 0x50a   : > { %9185 = vmatpush3.bf16.msra.mxu1 %v9872_v10 }
 0x50d   : > { %9155 = vmatmul.mubr.bf16.gmra.mrb[12].mxu1 %v12085_v22 }
 0x50e   : > { %9158 = vmatprep.mubr.bf16.mxu1 %v12086_v25 }
 0x515   : > { %9159 = vmatmul.mubr.bf16.gmra.mrb[16].mxu1 %v12087_v24 }
 0x516   : > { %9162 = vmatprep.mubr.bf16.mxu1 %v12088_v19 }
 0x51d   : > { %9163 = vmatmul.mubr.bf16.gmra.mrb[20].mxu1 %v12089_v58 }
 0x51e   : > { %9166 = vmatprep.mubr.bf16.mxu1 %v12090_v27 }
 0x525   : > { %9167 = vmatmul.mubr.bf16.gmra.mrb[24].mxu1 %v12091_v30 }
 0x526   : > { %9186 = vmatprep.mubr.bf16.mxu1 %v11811_v6 }
 0x52d   : > { %9187 = vmatmul.mubr.bf16.vlgmr.msra.gmra.mrb[28].mxu1 %v11826_v35 }
 0x52e   : > { %9190 = vmatprep.mubr.bf16.mxu1 %v11833_v43 }
 0x535   : > { %9191 = vmatmul.mubr.bf16.gmra.mrb[0].mxu1 %v12080_v57 }
 0x536   : > { %9194 = vmatprep.mubr.bf16.mxu1 %v12081_v52 }
 0x53d   : > { %9195 = vmatmul.mubr.bf16.gmra.mrb[4].mxu1 %v12082_v26 }
 0x53e   : > { %9198 = vmatprep.mubr.bf16.mxu1 %v12083_v37 }
 0x545   : > { %9199 = vmatmul.mubr.bf16.gmra.mrb[8].mxu1 %v12084_v2 }
 0x546   : > { %9202 = vmatprep.mubr.bf16.mxu1 %v12085_v22 }
 0x54d   : > { %9203 = vmatmul.mubr.bf16.gmra.mrb[12].mxu1 %v12086_v25 }
 0x54e   : > { %9206 = vmatprep.mubr.bf16.mxu1 %v12087_v24 }
 0x555   : > { %9207 = vmatmul.mubr.bf16.gmra.mrb[16].mxu1 %v12088_v19 }
 0x556   : > { %9210 = vmatprep.mubr.bf16.mxu1 %v12089_v58 }
 0x55d   : > { %9211 = vmatmul.mubr.bf16.gmra.mrb[20].mxu1 %v12090_v27 }
 0x55e   : > { %9214 = vmatprep.mubr.bf16.mxu1 %v12091_v30 }
 0x565   : > { %9215 = vmatmul.mubr.bf16.gmra.mrb[24].mxu1 %v12094_v51 }
 0x600   : > { %v9188_v53 = vpop.f32.mrb[28].mxu1 }
 0x601   : > { %v9234_v6 = vadd.f32 %v9188_v53, %v11492_v4  ;;  %v7095_v61 = vpop.f32.mrb[29].mxu1 }
 0x602   : > { %v9235_v11 = vadd.f32 %v7095_v61, %v11495_v38  ;;  %v9189_v46 = vpop.f32.mrb[30].mxu1 }
 0x603   : > { %v9236_v34 = vadd.f32 %v9189_v46, %v11499_v31  ;;  %v7098_v39 = vpop.f32.mrb[31].mxu1  ;;  %v7263_v35 = vadd.f32 %v9234_v6, %v11932_v8 }
 0x604   : > { %v9237_v50 = vadd.f32 %v7098_v39, %v12095_v16  ;;  %v7261_v56 = vadd.f32 %v9235_v11, %v11932_v8 }
 0x605   : > { %v7264_v29 = vadd.f32 %v9236_v34, %v11932_v8 }
 0x606   : > { %7293 = vxpose.xlu1.b32.start [1/16] (narrow) %v7261_v56, 8  ;;  %v7262_v4 = vadd.f32 %v9237_v50, %v11932_v8  ;;  %v7388_v50 = vpop.xlane.xlu0 %7387 }
 0x607   : > { %v7389_v56 = vmul.f32 0.00390625, %v7388_v50 }
 0x608   : > { %v9192_v13 = vpop.f32.mrb[0].mxu1 }
 0x609   : > { %v7111_v3 = vpop.f32.mrb[1].mxu1  ;;  %v7267_v17 = vadd.f32 %v9192_v13, %v11932_v8  ;;  %v7390_v13 = vadd.f32 1e-05, %v7389_v56 }
 0x60a   : > { %7294 = vxpose.xlu1.b32.cont [2/16] (narrow) %v7262_v4, 8  ;;  %v9193_v0 = vpop.f32.mrb[2].mxu1  ;;  %v7265_v62 = vadd.f32 %v11932_v8, %v7111_v3 }
 0x60b   : > { %v7114_v48 = vpop.f32.mrb[3].mxu1  ;;  %v7268_v20 = vadd.f32 %v9193_v0, %v11932_v8  ;;  %9873 = vrsqrt.f32 %v7390_v13 }
 0x60c   : > { %v7266_v63 = vadd.f32 %v11932_v8, %v7114_v48 }
 0x60e   : > { %7295 = vxpose.xlu1.b32.cont [3/16] (narrow) %v7263_v35, 8 }
 0x610   : > { %v9196_v38 = vpop.f32.mrb[4].mxu1 }
 0x611   : > { %v7127_v31 = vpop.f32.mrb[5].mxu1  ;;  %v7271_v32 = vadd.f32 %v9196_v38, %v11932_v8 }
 0x612   : > { %7296 = vxpose.xlu1.b32.cont [4/16] (narrow) %v7264_v29, 8  ;;  %v9197_v60 = vpop.f32.mrb[6].mxu1  ;;  %v7269_v45 = vadd.f32 %v11932_v8, %v7127_v31 }
 0x613   : > { %v7130_v43 = vpop.f32.mrb[7].mxu1  ;;  %v7272_v24 = vadd.f32 %v9197_v60, %v11932_v8 }
 0x614   : > { %v7270_v2 = vadd.f32 %v11932_v8, %v7130_v43 }
 0x615   : > { %v9874_v4 = vpop.eup %9873 }
 0x616   : > { %7297 = vxpose.xlu1.b32.cont [5/16] (narrow) %v7265_v62, 8  ;;  %v7399_v48 = vrot.slane %v9874_v4, %v11856_v49 }
 0x618   : > { %v9200_v57 = vpop.f32.mrb[8].mxu1  ;;  %v7401_v38 = vmul.f32 %v7399_v48, %v11862_v5 }
 0x619   : > { %v7143_v52 = vpop.f32.mrb[9].mxu1  ;;  %v7275_v11 = vadd.f32 %v9200_v57, %v11932_v8 }
 0x61a   : > { %7298 = vxpose.xlu1.b32.cont [6/16] (narrow) %v7266_v63, 8  ;;  %v9201_v59 = vpop.f32.mrb[10].mxu1  ;;  %v7273_v41 = vadd.f32 %v11932_v8, %v7143_v52 }
 0x61b   : > { %v7146_v12 = vpop.f32.mrb[11].mxu1  ;;  %v7276_v39 = vadd.f32 %v9201_v59, %v11932_v8 }
 0x61c   : > { %v7274_v18 = vadd.f32 %v11932_v8, %v7146_v12 }
 0x61e   : > { %7299 = vxpose.xlu1.b32.cont [7/16] (narrow) %v7267_v17, 8 }
 0x620   : > { %v9204_v7 = vpop.f32.mrb[12].mxu1 }
 0x621   : > { %v7159_v26 = vpop.f32.mrb[13].mxu1  ;;  %v7279_v36 = vadd.f32 %v9204_v7, %v11932_v8 }
 0x622   : > { %v7277_v37 = vadd.f32 %v11932_v8, %v7159_v26  ;;  %7300 = vxpose.xlu1.b32.cont [8/16] (narrow) %v7268_v20, 8  ;;  %v9205_v28 = vpop.f32.mrb[14].mxu1 }
 0x623   : > { %v7162_v44 = vpop.f32.mrb[15].mxu1  ;;  %v7280_v47 = vadd.f32 %v9205_v28, %v11932_v8 }
 0x624   : > { %7325 = vxpose.xlu0.b32.start [1/16] (narrow) %v7277_v37, 8  ;;  %v7278_v21 = vadd.f32 %v11932_v8, %v7162_v44 }
 0x626   : > { %7301 = vxpose.xlu1.b32.cont [9/16] (narrow) %v7269_v45, 8 }
 0x628   : > { %7326 = vxpose.xlu0.b32.cont [2/16] (narrow) %v7278_v21, 8  ;;  %v9208_v54 = vpop.f32.mrb[16].mxu1 }
 0x629   : > { %v7175_v22 = vpop.f32.mrb[17].mxu1  ;;  %v7283_v9 = vadd.f32 %v9208_v54, %v11932_v8 }
 0x62a   : > { %7302 = vxpose.xlu1.b32.cont [10/16] (narrow) %v7270_v2, 8  ;;  %v9209_v42 = vpop.f32.mrb[18].mxu1  ;;  %v7281_v58 = vadd.f32 %v11932_v8, %v7175_v22 }
 0x62b   : > { %v7178_v25 = vpop.f32.mrb[19].mxu1  ;;  %v7284_v34 = vadd.f32 %v9209_v42, %v11932_v8 }
 0x62c   : > { %7327 = vxpose.xlu0.b32.cont [3/16] (narrow) %v7279_v36, 8  ;;  %v7282_v1 = vadd.f32 %v11932_v8, %v7178_v25 }
 0x62e   : > { %7303 = vxpose.xlu1.b32.cont [11/16] (narrow) %v7271_v32, 8 }
 0x630   : > { %7328 = vxpose.xlu0.b32.cont [4/16] (narrow) %v7280_v47, 8  ;;  %v9212_v33 = vpop.f32.mrb[20].mxu1 }
 0x631   : > { %v7287_v14 = vadd.f32 %v9212_v33, %v11932_v8  ;;  %v7191_v19 = vpop.f32.mrb[21].mxu1 }
 0x632   : > { %7304 = vxpose.xlu1.b32.cont [12/16] (narrow) %v7272_v24, 8  ;;  %v9213_v27 = vpop.f32.mrb[22].mxu1  ;;  %v7285_v16 = vadd.f32 %v11932_v8, %v7191_v19 }
 0x633   : > { %v7288_v23 = vadd.f32 %v9213_v27, %v11932_v8  ;;  %v7194_v40 = vpop.f32.mrb[23].mxu1 }
 0x634   : > { %v7286_v55 = vadd.f32 %v11932_v8, %v7194_v40  ;;  %7329 = vxpose.xlu0.b32.cont [5/16] (narrow) %v7281_v58, 8 }
 0x636   : > { %7305 = vxpose.xlu1.b32.cont [13/16] (narrow) %v7273_v41, 8 }
 0x638   : > { %7330 = vxpose.xlu0.b32.cont [6/16] (narrow) %v7282_v1, 8  ;;  %v9216_v10 = vpop.f32.mrb[24].mxu1 }
 0x639   : > { %v7291_v30 = vadd.f32 %v9216_v10, %v11932_v8  ;;  %v7207_v15 = vpop.f32.mrb[25].mxu1 }
 0x63a   : > { %v7289_v51 = vadd.f32 %v11932_v8, %v7207_v15  ;;  %7306 = vxpose.xlu1.b32.cont [14/16] (narrow) %v7274_v18, 8  ;;  %v9217_v53 = vpop.f32.mrb[26].mxu1 }
 0x63b   : > { %v7292_v6 = vadd.f32 %v9217_v53, %v11932_v8  ;;  %v7210_v61 = vpop.f32.mrb[27].mxu1 }
 0x63c   : > { %v7290_v46 = vadd.f32 %v11932_v8, %v7210_v61  ;;  %7331 = vxpose.xlu0.b32.cont [7/16] (narrow) %v7283_v9, 8 }
 0x63e   : > { %7307 = vxpose.xlu1.b32.cont [15/16] (narrow) %v7275_v11, 8 }
 0x640   : > { %7332 = vxpose.xlu0.b32.cont [8/16] (narrow) %v7284_v34, 8 }
 0x642   : > { %7308 = vxpose.xlu1.b32.end [16/16] (narrow) %v7276_v39, 8 }
 0x644   : > { %7333 = vxpose.xlu0.b32.cont [9/16] (narrow) %v7285_v16, 8 }
 0x648   : > { %7334 = vxpose.xlu0.b32.cont [10/16] (narrow) %v7286_v55, 8 }
 0x64c   : > { %7335 = vxpose.xlu0.b32.cont [11/16] (narrow) %v7287_v14, 8 }
 0x650   : > { %7336 = vxpose.xlu0.b32.cont [12/16] (narrow) %v7288_v23, 8 }
 0x654   : > { %7337 = vxpose.xlu0.b32.cont [13/16] (narrow) %v7289_v51, 8 }
 0x658   : > { %7338 = vxpose.xlu0.b32.cont [14/16] (narrow) %v7290_v46, 8 }
 0x65c   : > { %7339 = vxpose.xlu0.b32.cont [15/16] (narrow) %v7291_v30, 8 }
 0x660   : > { %7340 = vxpose.xlu0.b32.end [16/16] (narrow) %v7292_v6, 8 }
 0x686   : > { %v7309_v3 = vpop.trf.xlu1 }
 0x687   : > { %v7402_v0 = vadd.f32 1.0, %v7309_v3 }
 0x6a4   : > { %v7341_v8 = vpop.trf.xlu0 }
 0x6a5   : > { %v7403_v35 = vadd.f32 1.0, %v7341_v8  ;;  %v7411_v60 = vcombine.high %v7309_v3, %v7341_v8 }
 0x6a7   : > { %v7406_v29 = vcombine.low %v7402_v0, %v7403_v35 }
 0x6a9   : > { %v7408_v31 = vmul.f32 %v7406_v29, %v7401_v38 }
 0x6ab   : > { %v7413_v43 = vadd.f32 %v7411_v60, %v7408_v31 }
 0x6ad   : > { %7414 = vst [vmem:[%s271_s26] sm:$0xff] %v7413_v43 }
 0x6ae PF: > { %s16_s21 = sadd.s32 1, %s9884_s21  }
 0x6af   : > { %p13_p4 = scmp.ge.s32.totalorder %s16_s21, 4  }
 0x6b1   :  { %15 = sbr.rel (!%p13_p4) target bundleno = 1 (0x1), region = 95 }

</bundles_post_ra>
